<compile_context>
chip_gen: v7x
topology: tpu7x:2x2x1
jax: 0.10.0
libtpu: 0.0.40
codegen_flags: <defaults>
</compile_context>

<pallas_src>
from functools import lru_cache, partial

import jax
import jax.numpy as jnp
from jax.experimental import pallas as pl
from jax.experimental.pallas import tpu as pltpu


# ----------------------------------------------------------------------------
# helpers
# ----------------------------------------------------------------------------
def _round_up(n, m):
    return ((n + m - 1) // m) * m


def _pad2(a, rows, cols):
    r, c = a.shape
    if r == rows and c == cols:
        return a
    return jnp.pad(a, ((0, rows - r), (0, cols - c)))


def _nonfinite_count(v):
    # finiteness without relying on lax.is_finite lowering:
    # |x| < inf is False for both nan and +/-inf.
    return jnp.sum(jnp.where(jnp.abs(v) < jnp.float32(jnp.inf), 0.0, 1.0),
                   keepdims=True)                                   # (1, 1)


# ----------------------------------------------------------------------------
# The single fused Pallas kernel:
#   frozen fwd + adaptive fwd + loss reductions + anchor sum
#   + analytic SGD gradients + finiteness flags.
# ----------------------------------------------------------------------------
def _fused_tta_kernel(
    x_ref,
    w1a_ref, b1a_ref, w2a_ref, b2a_ref,      # adaptive params (updated by SGD)
    w10_ref, b10_ref, w20_ref, b20_ref,      # frozen == initial snapshot (shared)
    feats_ref, out_ref, stats_ref,
    gw1_ref, gb1_ref, gw2_ref, gb2_ref,
    *, b_real, o_real, lam, eps,
):
    f32, bf16 = jnp.float32, jnp.bfloat16

    x = x_ref[...]
    x_b = x.astype(bf16)
    w1a = w1a_ref[...]
    w2a = w2a_ref[...]
    w10 = w10_ref[...]
    w20 = w20_ref[...]

    # ---- frozen forward (no-grad path; bf16 MXU operands, f32 accumulate) ----
    # TODO(synk): if self.steps > 1 this frozen forward could be hoisted out of
    # the per-step kernel (it only depends on x and the frozen snapshot).
    hf = jnp.maximum(
        jnp.dot(x_b, w10.astype(bf16), preferred_element_type=f32) + b10_ref[...],
        0.0)
    out_pre = (jnp.dot(hf.astype(bf16), w20.astype(bf16),
                       preferred_element_type=f32) + b20_ref[...])

    # ---- adaptive forward ----
    h = jnp.maximum(
        jnp.dot(x_b, w1a.astype(bf16), preferred_element_type=f32) + b1a_ref[...],
        0.0)
    h_b = h.astype(bf16)
    out = jnp.dot(h_b, w2a.astype(bf16), preferred_element_type=f32) + b2a_ref[...]
    feats_ref[...] = h
    out_ref[...] = out

    # ---- masked self-consistency reductions.  Padded output *columns* are
    #      exactly zero by construction; only padded batch *rows* need masking,
    #      via a cheap (b_pad, 1) mask broadcast across lanes. ----
    b_pad = out.shape[0]
    row = jax.lax.broadcasted_iota(jnp.int32, (b_pad, 1), 0)
    valid = row < b_real                                            # (b_pad, 1)
    diff = jnp.where(valid, out - out_pre, 0.0)
    pre_m = jnp.where(valid, out_pre, 0.0)
    ssd = jnp.sum(diff * diff, keepdims=True)                       # (1, 1)
    ssr = jnp.sum(pre_m * pre_m, keepdims=True)                     # (1, 1)

    # ---- anchor loss:  sum_p ||p - p0||^2  (pad regions are zero in both) ----
    d_w1 = w1a - w10
    d_b1 = b1a_ref[...] - b10_ref[...]
    d_w2 = w2a - w20
    d_b2 = b2a_ref[...] - b20_ref[...]
    anchor = (jnp.sum(d_w1 * d_w1, keepdims=True)
              + jnp.sum(d_b1 * d_b1, keepdims=True)
              + jnp.sum(d_w2 * d_w2, keepdims=True)
              + jnp.sum(d_b2 * d_b2, keepdims=True))

    # ---- analytic backward of
    #        L = 0.5*sqrt(mse) + 0.5*mse/max(ref, eps) + lam*anchor
    #      with out_pre (and hence ref) constant w.r.t. the adaptive params.
    #      NOTE divergence from torch: rsqrt is guarded with max(mse, eps); at
    #      mse == 0 torch's sqrt backward would yield NaN grads and poison the
    #      params, here the gradient is cleanly zero instead. ----
    n = float(b_real * o_real)
    mse = ssd / n
    ref_den = jnp.maximum(ssr / n, eps)
    coef = 0.25 * jax.lax.rsqrt(jnp.maximum(mse, eps)) + 0.5 / ref_den
    g_out = (coef * (2.0 / n)) * diff                               # masked rows
    g_out_b = g_out.astype(bf16)

    # gradient matmuls use the MXU's native transposed-LHS feed
    # (dot_general contracting dim 0 of both operands == pl.dot(trans_a=True)).
    gb2 = jnp.sum(g_out, axis=0, keepdims=True) + (2.0 * lam) * d_b2
    gw2 = jax.lax.dot_general(
        h_b, g_out_b, (((0,), (0,)), ((), ())),                     # h^T @ g_out
        preferred_element_type=f32) + (2.0 * lam) * d_w2

    g_h = jax.lax.dot_general(
        g_out_b, w2a.astype(bf16), (((1,), (1,)), ((), ())),        # g_out @ W2^T
        preferred_element_type=f32)
    g_hlin = jnp.where(h > 0.0, g_h, 0.0)                           # relu backward

    gb1 = jnp.sum(g_hlin, axis=0, keepdims=True) + (2.0 * lam) * d_b1
    gw1 = jax.lax.dot_general(
        x_b, g_hlin.astype(bf16), (((0,), (0,)), ((), ())),         # x^T @ g_hlin
        preferred_element_type=f32) + (2.0 * lam) * d_w1

    gw1_ref[...] = gw1
    gb1_ref[...] = gb1
    gw2_ref[...] = gw2
    gb2_ref[...] = gb2

    # ---- finiteness flags (counts of non-finite elements) ----
    fo_bad = _nonfinite_count(h) + _nonfinite_count(out)
    g_bad = (_nonfinite_count(gw1) + _nonfinite_count(gb1)
             + _nonfinite_count(gw2) + _nonfinite_count(gb2))

    # ---- scalar stats packed into ONE lane-dense (1,128) row:
    #      [ssd, ssr, anchor, nonfinite(feats/out), nonfinite(grads), 0, ...] ----
    lane = jax.lax.broadcasted_iota(jnp.int32, (1, 128), 1)
    stats_ref[...] = jnp.where(
        lane == 0, ssd,
        jnp.where(lane == 1, ssr,
                  jnp.where(lane == 2, anchor,
                            jnp.where(lane == 3, fo_bad,
                                      jnp.where(lane == 4, g_bad, 0.0)))))


@lru_cache(maxsize=None)
def _build_fused_step(b_pad, d_pad, h_pad, o_pad, b_real, o_real, lam, eps):
    """Build (and cache) the pallas_call for a fixed set of padded shapes."""
    kernel = partial(_fused_tta_kernel,
                     b_real=b_real, o_real=o_real, lam=lam, eps=eps)

    # No grid: a single invocation with every operand resident in VMEM
    # (no pipeline => no double buffers).  Total footprint at the demo shapes
    # is < 2 MiB, far inside even v7x's 64 MiB VMEM.  For real PMNet d_in the
    # d_pad axis would be tiled (512-1024 per tile) with a "parallel" grid
    # axis and an explicit vmem_limit_bytes.
    vmem = pltpu.MemorySpace.VMEM
    in_specs = [pl.BlockSpec(memory_space=vmem) for _ in range(9)]

    out_shapes = [
        (b_pad, h_pad),     # feats
        (b_pad, o_pad),     # outputs
        (1, 128),           # packed stats [ssd, ssr, anchor, bad_feat, bad_grad]
        (d_pad, h_pad),     # grad w1
        (1, h_pad),         # grad b1
        (h_pad, o_pad),     # grad w2
        (1, o_pad),         # grad b2
    ]
    out_specs = tuple(pl.BlockSpec(memory_space=vmem) for _ in out_shapes)
    out_shape = tuple(jax.ShapeDtypeStruct(s, jnp.float32) for s in out_shapes)

    return pl.pallas_call(kernel, in_specs=in_specs, out_specs=out_specs,
                          out_shape=out_shape)


# ----------------------------------------------------------------------------
# Post-step: memory-bank add + retrieval + cosine distance + lr schedule +
# gated SGD update, all in ONE jitted function with static shapes.
# ----------------------------------------------------------------------------
@partial(jax.jit, static_argnames=("b_real", "hidden", "out_dim", "k_mem",
                                   "d_ret", "base_lr", "tau", "lam", "eps"))
def _post_step(stats, feats_p, out_p, grads, params,
               mem_keys, mem_count, mem_ptr, dist_min, dist_max,
               *, b_real, hidden, out_dim, k_mem, d_ret,
               base_lr, tau, lam, eps):
    f32 = jnp.float32
    feats = feats_p[:b_real, :hidden]
    outputs = out_p[:b_real, :out_dim]

    ssd, ssr, anchor = stats[0, 0], stats[0, 1], stats[0, 2]
    fo_bad, g_bad = stats[0, 3], stats[0, 4]

    n = float(b_real * out_dim)
    mse = ssd / n
    rmse_loss = jnp.sqrt(mse)
    mse_ref = jnp.maximum(ssr / n, eps)
    loss = 0.5 * rmse_loss + 0.5 * (mse / mse_ref) + lam * anchor

    # --- MemoryBank.add, gated on finiteness (mirrors the torch guard) ---
    # TODO(synk): the reference also stores the output vectors per entry, but
    # retrieve() never reads them, so only the feature keys are kept.
    add_ok = fo_bad == 0
    idx = (mem_ptr + jnp.arange(b_real, dtype=jnp.int32)) % k_mem
    mem_keys = jnp.where(add_ok, mem_keys.at[idx].set(feats), mem_keys)
    mem_ptr = jnp.where(add_ok, (mem_ptr + b_real) % k_mem, mem_ptr)
    mem_count = jnp.where(add_ok, jnp.minimum(mem_count + b_real, k_mem),
                          mem_count)

    # --- retrieval: static top-k over all K slots, invalid slots masked ---
    # TODO(synk): torch F.cosine_similarity(keys, q, dim=1) is only defined
    # when n_keys == batch; the query is reduced to its batch mean so the
    # retrieval is well-defined for any memory occupancy.
    has_mem = mem_count > 0
    valid = jnp.arange(k_mem, dtype=jnp.int32) < mem_count
    q = jnp.mean(feats, axis=0)                                     # (hidden,)
    q_norm = jnp.sqrt(jnp.sum(q * q))
    k_norm = jnp.sqrt(jnp.sum(mem_keys * mem_keys, axis=1))
    sims = (mem_keys @ q) / jnp.maximum(k_norm * q_norm, 1e-8)
    sims = jnp.where(valid, sims, -jnp.inf)
    top_v, top_i = jax.lax.top_k(sims, d_ret)
    w = jnp.isfinite(top_v).astype(f32)            # weight the <= D valid picks
    support = mem_keys[top_i]                                       # (D, hidden)
    centers = (jnp.sum(w[:, None] * support, axis=0)
               / jnp.maximum(jnp.sum(w), 1.0))
    centers = centers / jnp.maximum(jnp.sqrt(jnp.sum(centers * centers)), 1e-12)
    feats_n = feats / jnp.maximum(
        jnp.sqrt(jnp.sum(feats * feats, axis=1, keepdims=True)), 1e-12)
    feats_m = jnp.mean(feats_n, axis=0)
    cnum = jnp.sum(feats_m * centers)
    cden = jnp.maximum(jnp.sqrt(jnp.sum(feats_m * feats_m))
                       * jnp.sqrt(jnp.sum(centers * centers)), 1e-8)
    dist = 1.0 - cnum / cden
    new_min = jnp.minimum(dist_min, dist)
    new_max = jnp.maximum(dist_max, dist)
    dist_norm = (dist - new_min) / (new_max - new_min + eps)
    adjusted_lr = jnp.where(has_mem, base_lr * jnp.exp(tau * dist_norm),
                            jnp.asarray(base_lr, f32))
    dist_min = jnp.where(has_mem, new_min, dist_min)
    dist_max = jnp.where(has_mem, new_max, dist_max)

    # --- gated plain-SGD update with the kernel-produced gradients ---
    # TODO(synk): prepare_model_and_optimizer is unspecified; plain SGD is
    # assumed, and non-finite gradients additionally mask the update.
    update_ok = jnp.isfinite(loss) & (g_bad == 0)
    new_params = {k: jnp.where(update_ok, params[k] - adjusted_lr * grads[k],
                               params[k]) for k in params}

    return outputs, new_params, mem_keys, mem_count, mem_ptr, dist_min, dist_max


# ----------------------------------------------------------------------------
# The TTA wrapper (mirrors pmnettta / MemoryBank)
# ----------------------------------------------------------------------------
class PMNetTTAPallas:
    def __init__(self, params, base_lr=2e-5, tau=0.05, lambda_anchor=0.1):
        self.steps = 1
        w1 = jnp.asarray(params["w1"], jnp.float32)
        b1 = jnp.asarray(params["b1"], jnp.float32).reshape(1, -1)
        w2 = jnp.asarray(params["w2"], jnp.float32)
        b2 = jnp.asarray(params["b2"], jnp.float32).reshape(1, -1)

        self.d_in, self.hidden = w1.shape
        self.out_dim = w2.shape[1]
        self.d_pad = _round_up(self.d_in, 128)
        self.h_pad = _round_up(self.hidden, 128)
        self.o_pad = _round_up(self.out_dim, 128)

        padded = {
            "w1": _pad2(w1, self.d_pad, self.h_pad),
            "b1": _pad2(b1, 1, self.h_pad),
            "w2": _pad2(w2, self.h_pad, self.o_pad),
            "b2": _pad2(b2, 1, self.o_pad),
        }
        # adaptive params (updated by SGD) and the single shared snapshot that
        # serves as BOTH the frozen model and the anchor (they are identical
        # by construction and never change).
        self.params = dict(padded)
        self.snapshot = dict(padded)

        self.K = 100
        self.retrieval_size = 7
        self.base_lr = float(base_lr)
        self.tau = float(tau)
        self.lambda_anchor = float(lambda_anchor)
        self.epsilon = 1e-8

        # fixed-shape device state (no per-step retraces, no host syncs)
        self.mem_keys = jnp.zeros((self.K, self.hidden), jnp.float32)
        self.mem_count = jnp.array(0, jnp.int32)
        self.mem_ptr = jnp.array(0, jnp.int32)
        self.dist_min = jnp.array(jnp.inf, jnp.float32)
        self.dist_max = jnp.array(-jnp.inf, jnp.float32)

    def forward(self, inputs):
        outputs = None
        for _ in range(self.steps):
            outputs = self._forward_and_adapt(inputs)
        return outputs

    def _forward_and_adapt(self, inputs):
        B = inputs.shape[0]
        x_flat = jnp.asarray(inputs, jnp.float32).reshape(B, -1)
        b_pad = _round_up(max(B, 8), 8)
        x_p = _pad2(x_flat, b_pad, self.d_pad)

        step_fn = _build_fused_step(b_pad, self.d_pad, self.h_pad, self.o_pad,
                                    B, self.out_dim,
                                    self.lambda_anchor, self.epsilon)
        pa, p0 = self.params, self.snapshot
        feats_p, out_p, stats, gw1, gb1, gw2, gb2 = step_fn(
            x_p,
            pa["w1"], pa["b1"], pa["w2"], pa["b2"],
            p0["w1"], p0["b1"], p0["w2"], p0["b2"])

        grads = {"w1": gw1, "b1": gb1, "w2": gw2, "b2": gb2}
        (outputs, self.params, self.mem_keys, self.mem_count, self.mem_ptr,
         self.dist_min, self.dist_max) = _post_step(
            stats, feats_p, out_p, grads, self.params,
            self.mem_keys, self.mem_count, self.mem_ptr,
            self.dist_min, self.dist_max,
            b_real=B, hidden=self.hidden, out_dim=self.out_dim,
            k_mem=self.K, d_ret=self.retrieval_size,
            base_lr=self.base_lr, tau=self.tau,
            lam=self.lambda_anchor, eps=self.epsilon)

        return outputs


# ----------------------------------------------------------------------------
# Demo
# ----------------------------------------------------------------------------
if __name__ == "__main__":
    key = jax.random.PRNGKey(0)
    B, C, H, W = 2, 4, 16, 16
    hidden, out_dim = 32, 32
    d_in = C * H * W

    k_x, k_w1, k_w2 = jax.random.split(key, 3)
    x = jax.random.normal(k_x, (B, C, H, W), dtype=jnp.float32)

    params = {
        "w1": 0.02 * jax.random.normal(k_w1, (d_in, hidden), dtype=jnp.float32),
        "b1": jnp.zeros((1, hidden), dtype=jnp.float32),
        "w2": 0.02 * jax.random.normal(k_w2, (hidden, out_dim), dtype=jnp.float32),
        "b2": jnp.zeros((1, out_dim), dtype=jnp.float32),
    }

    tta = PMNetTTAPallas(params, base_lr=2e-5, tau=0.05, lambda_anchor=0.1)
    out = tta.forward(x)
    jax.block_until_ready(out)
    assert out.shape == (B, out_dim)
    assert bool(jnp.all(jnp.isfinite(out)))
    print("KERNEL_OK")
</pallas_src>

<mosaic_0001>
module attributes {stable_mosaic.version = 11 : i64} {
  func.func @_fused_tta_kernel(%arg0: memref<8x1024xf32, #tpu.memory_space<vmem>>, %arg1: memref<1024x128xf32, #tpu.memory_space<vmem>>, %arg2: memref<1x128xf32, #tpu.memory_space<vmem>>, %arg3: memref<128x128xf32, #tpu.memory_space<vmem>>, %arg4: memref<1x128xf32, #tpu.memory_space<vmem>>, %arg5: memref<1024x128xf32, #tpu.memory_space<vmem>>, %arg6: memref<1x128xf32, #tpu.memory_space<vmem>>, %arg7: memref<128x128xf32, #tpu.memory_space<vmem>>, %arg8: memref<1x128xf32, #tpu.memory_space<vmem>>, %arg9: memref<8x128xf32, #tpu.memory_space<vmem>>, %arg10: memref<8x128xf32, #tpu.memory_space<vmem>>, %arg11: memref<1x128xf32, #tpu.memory_space<vmem>>, %arg12: memref<1024x128xf32, #tpu.memory_space<vmem>>, %arg13: memref<1x128xf32, #tpu.memory_space<vmem>>, %arg14: memref<128x128xf32, #tpu.memory_space<vmem>>, %arg15: memref<1x128xf32, #tpu.memory_space<vmem>>) attributes {dimension_semantics = [], scalar_prefetch = 0 : i64, scratch_operands = 0 : i64, tpu.core_type = #tpu.core_type<tc>} {
    %c0 = arith.constant 0 : index
    %c0_0 = arith.constant 0 : index
    %0 = vector.load %arg0[%c0, %c0_0] : memref<8x1024xf32, #tpu.memory_space<vmem>>, vector<8x1024xf32>
    %1 = arith.truncf %0 : vector<8x1024xf32> to vector<8x1024xbf16>
    %c0_1 = arith.constant 0 : index
    %c0_2 = arith.constant 0 : index
    %2 = vector.load %arg1[%c0_1, %c0_2] : memref<1024x128xf32, #tpu.memory_space<vmem>>, vector<1024x128xf32>
    %c0_3 = arith.constant 0 : index
    %c0_4 = arith.constant 0 : index
    %3 = vector.load %arg3[%c0_3, %c0_4] : memref<128x128xf32, #tpu.memory_space<vmem>>, vector<128x128xf32>
    %c0_5 = arith.constant 0 : index
    %c0_6 = arith.constant 0 : index
    %4 = vector.load %arg5[%c0_5, %c0_6] : memref<1024x128xf32, #tpu.memory_space<vmem>>, vector<1024x128xf32>
    %c0_7 = arith.constant 0 : index
    %c0_8 = arith.constant 0 : index
    %5 = vector.load %arg7[%c0_7, %c0_8] : memref<128x128xf32, #tpu.memory_space<vmem>>, vector<128x128xf32>
    %6 = arith.truncf %4 : vector<1024x128xf32> to vector<1024x128xbf16>
    %cst = arith.constant dense<0.000000e+00> : vector<8x128xf32>
    %7 = tpu.matmul %1, %6, %cst {dimension_numbers = #tpu.dot_dimension_numbers<[1], [0], [0], [1], [0, 0, 1, 1], [], []>} : vector<8x1024xbf16>, vector<1024x128xbf16>, vector<8x128xf32> -> vector<8x128xf32>
    %c0_9 = arith.constant 0 : index
    %c0_10 = arith.constant 0 : index
    %8 = vector.load %arg6[%c0_9, %c0_10] : memref<1x128xf32, #tpu.memory_space<vmem>>, vector<1x128xf32>
    %9 = vector.broadcast %8 : vector<1x128xf32> to vector<8x128xf32>
    %10 = arith.addf %7, %9 : vector<8x128xf32>
    %cst_11 = arith.constant 0.000000e+00 : f32
    %11 = vector.broadcast %cst_11 : f32 to vector<8x128xf32>
    %12 = arith.maximumf %10, %11 : vector<8x128xf32>
    %13 = arith.truncf %12 : vector<8x128xf32> to vector<8x128xbf16>
    %14 = arith.truncf %5 : vector<128x128xf32> to vector<128x128xbf16>
    %cst_12 = arith.constant dense<0.000000e+00> : vector<8x128xf32>
    %15 = tpu.matmul %13, %14, %cst_12 {dimension_numbers = #tpu.dot_dimension_numbers<[1], [0], [0], [1], [0, 0, 1, 1], [], []>} : vector<8x128xbf16>, vector<128x128xbf16>, vector<8x128xf32> -> vector<8x128xf32>
    %c0_13 = arith.constant 0 : index
    %c0_14 = arith.constant 0 : index
    %16 = vector.load %arg8[%c0_13, %c0_14] : memref<1x128xf32, #tpu.memory_space<vmem>>, vector<1x128xf32>
    %17 = vector.broadcast %16 : vector<1x128xf32> to vector<8x128xf32>
    %18 = arith.addf %15, %17 : vector<8x128xf32>
    %19 = arith.truncf %2 : vector<1024x128xf32> to vector<1024x128xbf16>
    %cst_15 = arith.constant dense<0.000000e+00> : vector<8x128xf32>
    %20 = tpu.matmul %1, %19, %cst_15 {dimension_numbers = #tpu.dot_dimension_numbers<[1], [0], [0], [1], [0, 0, 1, 1], [], []>} : vector<8x1024xbf16>, vector<1024x128xbf16>, vector<8x128xf32> -> vector<8x128xf32>
    %c0_16 = arith.constant 0 : index
    %c0_17 = arith.constant 0 : index
    %21 = vector.load %arg2[%c0_16, %c0_17] : memref<1x128xf32, #tpu.memory_space<vmem>>, vector<1x128xf32>
    %22 = vector.broadcast %21 : vector<1x128xf32> to vector<8x128xf32>
    %23 = arith.addf %20, %22 : vector<8x128xf32>
    %cst_18 = arith.constant 0.000000e+00 : f32
    %24 = vector.broadcast %cst_18 : f32 to vector<8x128xf32>
    %25 = arith.maximumf %23, %24 : vector<8x128xf32>
    %26 = arith.truncf %25 : vector<8x128xf32> to vector<8x128xbf16>
    %27 = arith.truncf %3 : vector<128x128xf32> to vector<128x128xbf16>
    %cst_19 = arith.constant dense<0.000000e+00> : vector<8x128xf32>
    %28 = tpu.matmul %26, %27, %cst_19 {dimension_numbers = #tpu.dot_dimension_numbers<[1], [0], [0], [1], [0, 0, 1, 1], [], []>} : vector<8x128xbf16>, vector<128x128xbf16>, vector<8x128xf32> -> vector<8x128xf32>
    %c0_20 = arith.constant 0 : index
    %c0_21 = arith.constant 0 : index
    %29 = vector.load %arg4[%c0_20, %c0_21] : memref<1x128xf32, #tpu.memory_space<vmem>>, vector<1x128xf32>
    %30 = vector.broadcast %29 : vector<1x128xf32> to vector<8x128xf32>
    %31 = arith.addf %28, %30 : vector<8x128xf32>
    %c0_22 = arith.constant 0 : index
    %c0_23 = arith.constant 0 : index
    %32 = vector.load %arg9[%c0_22, %c0_23] : memref<8x128xf32, #tpu.memory_space<vmem>>, vector<8x128xf32>
    tpu.vector_store %arg9[%c0_22, %c0_23], %25 {strides = array<i32>} : memref<8x128xf32, #tpu.memory_space<vmem>>, vector<8x128xf32>,
    %c0_24 = arith.constant 0 : index
    %c0_25 = arith.constant 0 : index
    %33 = vector.load %arg10[%c0_24, %c0_25] : memref<8x128xf32, #tpu.memory_space<vmem>>, vector<8x128xf32>
    tpu.vector_store %arg10[%c0_24, %c0_25], %31 {strides = array<i32>} : memref<8x128xf32, #tpu.memory_space<vmem>>, vector<8x128xf32>,
    %34 = tpu.iota {dimensions = array<i32: 0>} : vector<8x1xi32>
    %c2_i32 = arith.constant 2 : i32
    %35 = vector.broadcast %c2_i32 : i32 to vector<8x1xi32>
    %36 = arith.cmpi slt, %34, %35 : vector<8x1xi32>
    %37 = arith.subf %31, %18 : vector<8x128xf32>
    %cst_26 = arith.constant 0.000000e+00 : f32
    %38 = vector.shape_cast %36 : vector<8x1xi1> to vector<8x1xi1>
    %39 = vector.broadcast %38 : vector<8x1xi1> to vector<8x128xi1>
    %40 = vector.broadcast %cst_26 : f32 to vector<8x128xf32>
    %41 = arith.select %39, %37, %40 : vector<8x128xi1>, vector<8x128xf32>
    %cst_27 = arith.constant 0.000000e+00 : f32
    %42 = vector.shape_cast %36 : vector<8x1xi1> to vector<8x1xi1>
    %43 = vector.broadcast %42 : vector<8x1xi1> to vector<8x128xi1>
    %44 = vector.broadcast %cst_27 : f32 to vector<8x128xf32>
    %45 = arith.select %43, %18, %44 : vector<8x128xi1>, vector<8x128xf32>
    %46 = arith.mulf %41, %41 : vector<8x128xf32>
    %47 = vector.shape_cast %46 : vector<8x128xf32> to vector<1x8x128xf32>
    %cst_28 = arith.constant dense<0.000000e+00> : vector<1xf32>
    %48 = vector.multi_reduction <add>, %47, %cst_28 [1, 2] : vector<1x8x128xf32> to vector<1xf32>
    %49 = vector.shape_cast %48 : vector<1xf32> to vector<1x1x1xf32>
    %50 = vector.extract %49[0, 0, 0] : f32 from vector<1x1x1xf32>
    %51 = vector.broadcast %50 : f32 to vector<1x1xf32>
    %52 = arith.mulf %45, %45 : vector<8x128xf32>
    %53 = vector.shape_cast %52 : vector<8x128xf32> to vector<1x8x128xf32>
    %cst_29 = arith.constant dense<0.000000e+00> : vector<1xf32>
    %54 = vector.multi_reduction <add>, %53, %cst_29 [1, 2] : vector<1x8x128xf32> to vector<1xf32>
    %55 = vector.shape_cast %54 : vector<1xf32> to vector<1x1x1xf32>
    %56 = vector.extract %55[0, 0, 0] : f32 from vector<1x1x1xf32>
    %57 = vector.broadcast %56 : f32 to vector<1x1xf32>
    %58 = arith.subf %2, %4 : vector<1024x128xf32>
    %c0_30 = arith.constant 0 : index
    %c0_31 = arith.constant 0 : index
    %59 = vector.load %arg2[%c0_30, %c0_31] : memref<1x128xf32, #tpu.memory_space<vmem>>, vector<1x128xf32>
    %c0_32 = arith.constant 0 : index
    %c0_33 = arith.constant 0 : index
    %60 = vector.load %arg6[%c0_32, %c0_33] : memref<1x128xf32, #tpu.memory_space<vmem>>, vector<1x128xf32>
    %61 = arith.subf %59, %60 : vector<1x128xf32>
    %62 = arith.subf %3, %5 : vector<128x128xf32>
    %c0_34 = arith.constant 0 : index
    %c0_35 = arith.constant 0 : index
    %63 = vector.load %arg4[%c0_34, %c0_35] : memref<1x128xf32, #tpu.memory_space<vmem>>, vector<1x128xf32>
    %c0_36 = arith.constant 0 : index
    %c0_37 = arith.constant 0 : index
    %64 = vector.load %arg8[%c0_36, %c0_37] : memref<1x128xf32, #tpu.memory_space<vmem>>, vector<1x128xf32>
    %65 = arith.subf %63, %64 : vector<1x128xf32>
    %66 = arith.mulf %58, %58 : vector<1024x128xf32>
    %67 = vector.shape_cast %66 : vector<1024x128xf32> to vector<1x1024x128xf32>
    %cst_38 = arith.constant dense<0.000000e+00> : vector<1xf32>
    %68 = vector.multi_reduction <add>, %67, %cst_38 [1, 2] : vector<1x1024x128xf32> to vector<1xf32>
    %69 = vector.shape_cast %68 : vector<1xf32> to vector<1x1x1xf32>
    %70 = vector.extract %69[0, 0, 0] : f32 from vector<1x1x1xf32>
    %71 = vector.broadcast %70 : f32 to vector<1x1xf32>
    %72 = arith.mulf %61, %61 : vector<1x128xf32>
    %73 = vector.shape_cast %72 : vector<1x128xf32> to vector<1x1x128xf32>
    %cst_39 = arith.constant dense<0.000000e+00> : vector<1xf32>
    %74 = vector.multi_reduction <add>, %73, %cst_39 [1, 2] : vector<1x1x128xf32> to vector<1xf32>
    %75 = vector.shape_cast %74 : vector<1xf32> to vector<1x1x1xf32>
    %76 = vector.extract %75[0, 0, 0] : f32 from vector<1x1x1xf32>
    %77 = vector.broadcast %76 : f32 to vector<1x1xf32>
    %78 = arith.addf %71, %77 : vector<1x1xf32>
    %79 = arith.mulf %62, %62 : vector<128x128xf32>
    %80 = vector.shape_cast %79 : vector<128x128xf32> to vector<1x128x128xf32>
    %cst_40 = arith.constant dense<0.000000e+00> : vector<1xf32>
    %81 = vector.multi_reduction <add>, %80, %cst_40 [1, 2] : vector<1x128x128xf32> to vector<1xf32>
    %82 = vector.shape_cast %81 : vector<1xf32> to vector<1x1x1xf32>
    %83 = vector.extract %82[0, 0, 0] : f32 from vector<1x1x1xf32>
    %84 = vector.broadcast %83 : f32 to vector<1x1xf32>
    %85 = arith.addf %78, %84 : vector<1x1xf32>
    %86 = arith.mulf %65, %65 : vector<1x128xf32>
    %87 = vector.shape_cast %86 : vector<1x128xf32> to vector<1x1x128xf32>
    %cst_41 = arith.constant dense<0.000000e+00> : vector<1xf32>
    %88 = vector.multi_reduction <add>, %87, %cst_41 [1, 2] : vector<1x1x128xf32> to vector<1xf32>
    %89 = vector.shape_cast %88 : vector<1xf32> to vector<1x1x1xf32>
    %90 = vector.extract %89[0, 0, 0] : f32 from vector<1x1x1xf32>
    %91 = vector.broadcast %90 : f32 to vector<1x1xf32>
    %92 = arith.addf %85, %91 : vector<1x1xf32>
    %cst_42 = arith.constant 6.400000e+01 : f32
    %93 = vector.broadcast %cst_42 : f32 to vector<1x1xf32>
    %94 = arith.divf %51, %93 : vector<1x1xf32>
    %cst_43 = arith.constant 6.400000e+01 : f32
    %95 = vector.broadcast %cst_43 : f32 to vector<1x1xf32>
    %96 = arith.divf %57, %95 : vector<1x1xf32>
    %cst_44 = arith.constant 9.99999993E-9 : f32
    %97 = vector.broadcast %cst_44 : f32 to vector<1x1xf32>
    %98 = arith.maximumf %96, %97 : vector<1x1xf32>
    %cst_45 = arith.constant 9.99999993E-9 : f32
    %99 = vector.broadcast %cst_45 : f32 to vector<1x1xf32>
    %100 = arith.maximumf %94, %99 : vector<1x1xf32>
    %101 = math.rsqrt %100 : vector<1x1xf32>
    %cst_46 = arith.constant 2.500000e-01 : f32
    %102 = vector.broadcast %cst_46 : f32 to vector<1x1xf32>
    %103 = arith.mulf %102, %101 : vector<1x1xf32>
    %cst_47 = arith.constant 5.000000e-01 : f32
    %104 = vector.broadcast %cst_47 : f32 to vector<1x1xf32>
    %105 = arith.divf %104, %98 : vector<1x1xf32>
    %106 = arith.addf %103, %105 : vector<1x1xf32>
    %cst_48 = arith.constant 3.125000e-02 : f32
    %107 = vector.broadcast %cst_48 : f32 to vector<1x1xf32>
    %108 = arith.mulf %106, %107 : vector<1x1xf32>
    %109 = vector.broadcast %108 : vector<1x1xf32> to vector<8x128xf32>
    %110 = arith.mulf %109, %41 : vector<8x128xf32>
    %111 = arith.truncf %110 : vector<8x128xf32> to vector<8x128xbf16>
    %cst_49 = arith.constant dense<0.000000e+00> : vector<128xf32>
    %112 = vector.multi_reduction <add>, %110, %cst_49 [0] : vector<8x128xf32> to vector<128xf32>
    %113 = vector.shape_cast %112 : vector<128xf32> to vector<1x128xf32>
    %cst_50 = arith.constant 2.000000e-01 : f32
    %114 = vector.broadcast %cst_50 : f32 to vector<1x128xf32>
    %115 = arith.mulf %114, %65 : vector<1x128xf32>
    %116 = arith.addf %113, %115 : vector<1x128xf32>
    %cst_51 = arith.constant dense<0.000000e+00> : vector<128x128xf32>
    %117 = tpu.matmul %26, %111, %cst_51 {dimension_numbers = #tpu.dot_dimension_numbers<[0], [0], [1], [1], [0, 1, 1, 1], [], []>} : vector<8x128xbf16>, vector<8x128xbf16>, vector<128x128xf32> -> vector<128x128xf32>
    %cst_52 = arith.constant 2.000000e-01 : f32
    %118 = vector.broadcast %cst_52 : f32 to vector<128x128xf32>
    %119 = arith.mulf %118, %62 : vector<128x128xf32>
    %120 = arith.addf %117, %119 : vector<128x128xf32>
    %121 = arith.truncf %3 : vector<128x128xf32> to vector<128x128xbf16>
    %cst_53 = arith.constant dense<0.000000e+00> : vector<8x128xf32>
    %122 = tpu.matmul %111, %121, %cst_53 {dimension_numbers = #tpu.dot_dimension_numbers<[1], [1], [0], [0], [0, 0, 1, 0], [], []>} : vector<8x128xbf16>, vector<128x128xbf16>, vector<8x128xf32> -> vector<8x128xf32>
    %cst_54 = arith.constant 0.000000e+00 : f32
    %123 = vector.broadcast %cst_54 : f32 to vector<8x128xf32>
    %124 = arith.cmpf ogt, %25, %123 : vector<8x128xf32>
    %cst_55 = arith.constant 0.000000e+00 : f32
    %125 = vector.broadcast %cst_55 : f32 to vector<8x128xf32>
    %126 = arith.select %124, %122, %125 : vector<8x128xi1>, vector<8x128xf32>
    %cst_56 = arith.constant dense<0.000000e+00> : vector<128xf32>
    %127 = vector.multi_reduction <add>, %126, %cst_56 [0] : vector<8x128xf32> to vector<128xf32>
    %128 = vector.shape_cast %127 : vector<128xf32> to vector<1x128xf32>
    %cst_57 = arith.constant 2.000000e-01 : f32
    %129 = vector.broadcast %cst_57 : f32 to vector<1x128xf32>
    %130 = arith.mulf %129, %61 : vector<1x128xf32>
    %131 = arith.addf %128, %130 : vector<1x128xf32>
    %132 = arith.truncf %126 : vector<8x128xf32> to vector<8x128xbf16>
    %cst_58 = arith.constant dense<0.000000e+00> : vector<1024x128xf32>
    %133 = tpu.matmul %1, %132, %cst_58 {dimension_numbers = #tpu.dot_dimension_numbers<[0], [0], [1], [1], [0, 1, 1, 1], [], []>} : vector<8x1024xbf16>, vector<8x128xbf16>, vector<1024x128xf32> -> vector<1024x128xf32>
    %cst_59 = arith.constant 2.000000e-01 : f32
    %134 = vector.broadcast %cst_59 : f32 to vector<1024x128xf32>
    %135 = arith.mulf %134, %58 : vector<1024x128xf32>
    %136 = arith.addf %133, %135 : vector<1024x128xf32>
    %c0_60 = arith.constant 0 : index
    %c0_61 = arith.constant 0 : index
    %137 = vector.load %arg12[%c0_60, %c0_61] : memref<1024x128xf32, #tpu.memory_space<vmem>>, vector<1024x128xf32>
    tpu.vector_store %arg12[%c0_60, %c0_61], %136 {strides = array<i32>} : memref<1024x128xf32, #tpu.memory_space<vmem>>, vector<1024x128xf32>,
    %c0_62 = arith.constant 0 : index
    %c0_63 = arith.constant 0 : index
    %138 = vector.load %arg13[%c0_62, %c0_63] : memref<1x128xf32, #tpu.memory_space<vmem>>, vector<1x128xf32>
    tpu.vector_store %arg13[%c0_62, %c0_63], %131 {strides = array<i32>} : memref<1x128xf32, #tpu.memory_space<vmem>>, vector<1x128xf32>,
    %c0_64 = arith.constant 0 : index
    %c0_65 = arith.constant 0 : index
    %139 = vector.load %arg14[%c0_64, %c0_65] : memref<128x128xf32, #tpu.memory_space<vmem>>, vector<128x128xf32>
    tpu.vector_store %arg14[%c0_64, %c0_65], %120 {strides = array<i32>} : memref<128x128xf32, #tpu.memory_space<vmem>>, vector<128x128xf32>,
    %c0_66 = arith.constant 0 : index
    %c0_67 = arith.constant 0 : index
    %140 = vector.load %arg15[%c0_66, %c0_67] : memref<1x128xf32, #tpu.memory_space<vmem>>, vector<1x128xf32>
    tpu.vector_store %arg15[%c0_66, %c0_67], %116 {strides = array<i32>} : memref<1x128xf32, #tpu.memory_space<vmem>>, vector<1x128xf32>,
    %141 = math.absf %25 : vector<8x128xf32>
    %cst_68 = arith.constant 0x7F800000 : f32
    %142 = vector.broadcast %cst_68 : f32 to vector<8x128xf32>
    %143 = arith.cmpf olt, %141, %142 : vector<8x128xf32>
    %cst_69 = arith.constant 0.000000e+00 : f32
    %cst_70 = arith.constant 1.000000e+00 : f32
    %144 = vector.broadcast %cst_69 : f32 to vector<8x128xf32>
    %145 = vector.broadcast %cst_70 : f32 to vector<8x128xf32>
    %146 = arith.select %143, %144, %145 : vector<8x128xi1>, vector<8x128xf32>
    %147 = vector.shape_cast %146 : vector<8x128xf32> to vector<1x8x128xf32>
    %cst_71 = arith.constant dense<0.000000e+00> : vector<1xf32>
    %148 = vector.multi_reduction <add>, %147, %cst_71 [1, 2] : vector<1x8x128xf32> to vector<1xf32>
    %149 = vector.shape_cast %148 : vector<1xf32> to vector<1x1x1xf32>
    %150 = vector.extract %149[0, 0, 0] : f32 from vector<1x1x1xf32>
    %151 = vector.broadcast %150 : f32 to vector<1x1xf32>
    %152 = math.absf %31 : vector<8x128xf32>
    %cst_72 = arith.constant 0x7F800000 : f32
    %153 = vector.broadcast %cst_72 : f32 to vector<8x128xf32>
    %154 = arith.cmpf olt, %152, %153 : vector<8x128xf32>
    %cst_73 = arith.constant 0.000000e+00 : f32
    %cst_74 = arith.constant 1.000000e+00 : f32
    %155 = vector.broadcast %cst_73 : f32 to vector<8x128xf32>
    %156 = vector.broadcast %cst_74 : f32 to vector<8x128xf32>
    %157 = arith.select %154, %155, %156 : vector<8x128xi1>, vector<8x128xf32>
    %158 = vector.shape_cast %157 : vector<8x128xf32> to vector<1x8x128xf32>
    %cst_75 = arith.constant dense<0.000000e+00> : vector<1xf32>
    %159 = vector.multi_reduction <add>, %158, %cst_75 [1, 2] : vector<1x8x128xf32> to vector<1xf32>
    %160 = vector.shape_cast %159 : vector<1xf32> to vector<1x1x1xf32>
    %161 = vector.extract %160[0, 0, 0] : f32 from vector<1x1x1xf32>
    %162 = vector.broadcast %161 : f32 to vector<1x1xf32>
    %163 = arith.addf %151, %162 : vector<1x1xf32>
    %164 = math.absf %136 : vector<1024x128xf32>
    %cst_76 = arith.constant 0x7F800000 : f32
    %165 = vector.broadcast %cst_76 : f32 to vector<1024x128xf32>
    %166 = arith.cmpf olt, %164, %165 : vector<1024x128xf32>
    %cst_77 = arith.constant 0.000000e+00 : f32
    %cst_78 = arith.constant 1.000000e+00 : f32
    %167 = vector.broadcast %cst_77 : f32 to vector<1024x128xf32>
    %168 = vector.broadcast %cst_78 : f32 to vector<1024x128xf32>
    %169 = arith.select %166, %167, %168 : vector<1024x128xi1>, vector<1024x128xf32>
    %170 = vector.shape_cast %169 : vector<1024x128xf32> to vector<1x1024x128xf32>
    %cst_79 = arith.constant dense<0.000000e+00> : vector<1xf32>
    %171 = vector.multi_reduction <add>, %170, %cst_79 [1, 2] : vector<1x1024x128xf32> to vector<1xf32>
    %172 = vector.shape_cast %171 : vector<1xf32> to vector<1x1x1xf32>
    %173 = vector.extract %172[0, 0, 0] : f32 from vector<1x1x1xf32>
    %174 = vector.broadcast %173 : f32 to vector<1x1xf32>
    %175 = math.absf %131 : vector<1x128xf32>
    %cst_80 = arith.constant 0x7F800000 : f32
    %176 = vector.broadcast %cst_80 : f32 to vector<1x128xf32>
    %177 = arith.cmpf olt, %175, %176 : vector<1x128xf32>
    %cst_81 = arith.constant 0.000000e+00 : f32
    %cst_82 = arith.constant 1.000000e+00 : f32
    %178 = vector.broadcast %cst_81 : f32 to vector<1x128xf32>
    %179 = vector.broadcast %cst_82 : f32 to vector<1x128xf32>
    %180 = arith.select %177, %178, %179 : vector<1x128xi1>, vector<1x128xf32>
    %181 = vector.shape_cast %180 : vector<1x128xf32> to vector<1x1x128xf32>
    %cst_83 = arith.constant dense<0.000000e+00> : vector<1xf32>
    %182 = vector.multi_reduction <add>, %181, %cst_83 [1, 2] : vector<1x1x128xf32> to vector<1xf32>
    %183 = vector.shape_cast %182 : vector<1xf32> to vector<1x1x1xf32>
    %184 = vector.extract %183[0, 0, 0] : f32 from vector<1x1x1xf32>
    %185 = vector.broadcast %184 : f32 to vector<1x1xf32>
    %186 = arith.addf %174, %185 : vector<1x1xf32>
    %187 = math.absf %120 : vector<128x128xf32>
    %cst_84 = arith.constant 0x7F800000 : f32
    %188 = vector.broadcast %cst_84 : f32 to vector<128x128xf32>
    %189 = arith.cmpf olt, %187, %188 : vector<128x128xf32>
    %cst_85 = arith.constant 0.000000e+00 : f32
    %cst_86 = arith.constant 1.000000e+00 : f32
    %190 = vector.broadcast %cst_85 : f32 to vector<128x128xf32>
    %191 = vector.broadcast %cst_86 : f32 to vector<128x128xf32>
    %192 = arith.select %189, %190, %191 : vector<128x128xi1>, vector<128x128xf32>
    %193 = vector.shape_cast %192 : vector<128x128xf32> to vector<1x128x128xf32>
    %cst_87 = arith.constant dense<0.000000e+00> : vector<1xf32>
    %194 = vector.multi_reduction <add>, %193, %cst_87 [1, 2] : vector<1x128x128xf32> to vector<1xf32>
    %195 = vector.shape_cast %194 : vector<1xf32> to vector<1x1x1xf32>
    %196 = vector.extract %195[0, 0, 0] : f32 from vector<1x1x1xf32>
    %197 = vector.broadcast %196 : f32 to vector<1x1xf32>
    %198 = arith.addf %186, %197 : vector<1x1xf32>
    %199 = math.absf %116 : vector<1x128xf32>
    %cst_88 = arith.constant 0x7F800000 : f32
    %200 = vector.broadcast %cst_88 : f32 to vector<1x128xf32>
    %201 = arith.cmpf olt, %199, %200 : vector<1x128xf32>
    %cst_89 = arith.constant 0.000000e+00 : f32
    %cst_90 = arith.constant 1.000000e+00 : f32
    %202 = vector.broadcast %cst_89 : f32 to vector<1x128xf32>
    %203 = vector.broadcast %cst_90 : f32 to vector<1x128xf32>
    %204 = arith.select %201, %202, %203 : vector<1x128xi1>, vector<1x128xf32>
    %205 = vector.shape_cast %204 : vector<1x128xf32> to vector<1x1x128xf32>
    %cst_91 = arith.constant dense<0.000000e+00> : vector<1xf32>
    %206 = vector.multi_reduction <add>, %205, %cst_91 [1, 2] : vector<1x1x128xf32> to vector<1xf32>
    %207 = vector.shape_cast %206 : vector<1xf32> to vector<1x1x1xf32>
    %208 = vector.extract %207[0, 0, 0] : f32 from vector<1x1x1xf32>
    %209 = vector.broadcast %208 : f32 to vector<1x1xf32>
    %210 = arith.addf %198, %209 : vector<1x1xf32>
    %211 = tpu.iota {dimensions = array<i32: 1>} : vector<1x128xi32>
    %c0_i32 = arith.constant 0 : i32
    %212 = vector.broadcast %c0_i32 : i32 to vector<1x128xi32>
    %213 = arith.cmpi eq, %211, %212 : vector<1x128xi32>
    %c1_i32 = arith.constant 1 : i32
    %214 = vector.broadcast %c1_i32 : i32 to vector<1x128xi32>
    %215 = arith.cmpi eq, %211, %214 : vector<1x128xi32>
    %c2_i32_92 = arith.constant 2 : i32
    %216 = vector.broadcast %c2_i32_92 : i32 to vector<1x128xi32>
    %217 = arith.cmpi eq, %211, %216 : vector<1x128xi32>
    %c3_i32 = arith.constant 3 : i32
    %218 = vector.broadcast %c3_i32 : i32 to vector<1x128xi32>
    %219 = arith.cmpi eq, %211, %218 : vector<1x128xi32>
    %c4_i32 = arith.constant 4 : i32
    %220 = vector.broadcast %c4_i32 : i32 to vector<1x128xi32>
    %221 = arith.cmpi eq, %211, %220 : vector<1x128xi32>
    %cst_93 = arith.constant 0.000000e+00 : f32
    %222 = vector.shape_cast %210 : vector<1x1xf32> to vector<1x1xf32>
    %223 = vector.broadcast %222 : vector<1x1xf32> to vector<1x128xf32>
    %224 = vector.broadcast %cst_93 : f32 to vector<1x128xf32>
    %225 = arith.select %221, %223, %224 : vector<1x128xi1>, vector<1x128xf32>
    %226 = vector.shape_cast %163 : vector<1x1xf32> to vector<1x1xf32>
    %227 = vector.broadcast %226 : vector<1x1xf32> to vector<1x128xf32>
    %228 = arith.select %219, %227, %225 : vector<1x128xi1>, vector<1x128xf32>
    %229 = vector.shape_cast %92 : vector<1x1xf32> to vector<1x1xf32>
    %230 = vector.broadcast %229 : vector<1x1xf32> to vector<1x128xf32>
    %231 = arith.select %217, %230, %228 : vector<1x128xi1>, vector<1x128xf32>
    %232 = vector.shape_cast %57 : vector<1x1xf32> to vector<1x1xf32>
    %233 = vector.broadcast %232 : vector<1x1xf32> to vector<1x128xf32>
    %234 = arith.select %215, %233, %231 : vector<1x128xi1>, vector<1x128xf32>
    %235 = vector.shape_cast %51 : vector<1x1xf32> to vector<1x1xf32>
    %236 = vector.broadcast %235 : vector<1x1xf32> to vector<1x128xf32>
    %237 = arith.select %213, %236, %234 : vector<1x128xi1>, vector<1x128xf32>
    %c0_94 = arith.constant 0 : index
    %c0_95 = arith.constant 0 : index
    %238 = vector.load %arg11[%c0_94, %c0_95] : memref<1x128xf32, #tpu.memory_space<vmem>>, vector<1x128xf32>
    tpu.vector_store %arg11[%c0_94, %c0_95], %237 {strides = array<i32>} : memref<1x128xf32, #tpu.memory_space<vmem>>, vector<1x128xf32>,
    return
  }
}

</mosaic_0001>

<bundles_post_ra>
// kernel: tpu_custom_call.1
= control target key start
LH: loop header
LB: loop body
LE: loop exit
PB: predicated region body
PF: predicated region fallthrough
CT: control target
= control target key end

     0   :  { %s7405_s0 = inlined_call_operand.hbm [shape: f32[8,1024], index: 0, kind: input, shape index: {}]   ;;  %s7406_s1 = inlined_call_operand.hbm [shape: f32[1024,128], index: 1, kind: input, shape index: {}]   ;;  %s7407_s2 = inlined_call_operand.vmem [shape: f32[1,128], index: 2, kind: input, shape index: {}]   ;;  %s7408_s3 = inlined_call_operand.hbm [shape: f32[128,128], index: 3, kind: input, shape index: {}]   ;;  %s7409_s4 = inlined_call_operand.vmem [shape: f32[1,128], index: 4, kind: input, shape index: {}]   ;;  %s7410_s5 = inlined_call_operand.hbm [shape: f32[1024,128], index: 5, kind: input, shape index: {}]   ;;  %s7411_s6 = inlined_call_operand.vmem [shape: f32[1,128], index: 6, kind: input, shape index: {}]   ;;  %s7412_s7 = inlined_call_operand.hbm [shape: f32[128,128], index: 7, kind: input, shape index: {}]   ;;  %s7413_s8 = inlined_call_operand.vmem [shape: f32[1,128], index: 8, kind: input, shape index: {}]   ;;  %s7414_s9 = inlined_call_operand.hbm [shape: f32[8,128], index: 9, kind: output, shape index: {0}]   ;;  %s7415_s10 = inlined_call_operand.hbm [shape: f32[8,128], index: 10, kind: output, shape index: {1}]   ;;  %s7416_s11 = inlined_call_operand.hbm [shape: f32[1,128], index: 11, kind: output, shape index: {2}]   ;;  %s7417_s12 = inlined_call_operand.hbm [shape: f32[1024,128], index: 12, kind: output, shape index: {3}]   ;;  %s7418_s13 = inlined_call_operand.hbm [shape: f32[1,128], index: 13, kind: output, shape index: {4}]   ;;  %s7419_s14 = inlined_call_operand.hbm [shape: f32[128,128], index: 14, kind: output, shape index: {5}]   ;;  %s7420_s15 = inlined_call_operand.hbm [shape: f32[1,128], index: 15, kind: output, shape index: {6}]  }
   0x1   :  { %7612 = sst [smem:[#allocation201_spill]] %s7416_s11 }
   0x2   :  { %21 = vsyncpa [#allocation3], 0 }
   0x3   :  { %22 = vsyncpa [#allocation6], 0 }
   0x4   :  { %23 = vsyncpa [#allocation9], 0 }
   0x5   :  { %24 = vsyncpa [#allocation4], 0 }
   0x6   :  { %25 = vsyncpa [#allocation13], 0 }
   0x7   :  { %26 = vsyncpa [#allocation16], 0 }
   0x8   :  { %27 = vsyncpa [#allocation19], 0  ;;  %s4691_s18 = smov [#allocation5]   ;;  %s4413_s22 = scalar_lea.hbm %s7406_s1, 16384 }
   0x9   :  { %s43_s19 = sshll.u32 %s4691_s18, 4  ;;  %p4414_p0 = scmp.ne.s32.totalorder %s7406_s1, %s4413_s22  ;;  %s44_s19 = int_to_ptr.vmem [resolvable:$true] %s43_s19 }
   0xa   :  { %p4417_p1 = scmp.lt.u32.totalorder %s4413_s22, %s7406_s1 }
   0xc   :  { %p4419_p2 = pnand %p4417_p1, %p4414_p0 }
   0xe   :  { %4422 = shalt.err (!%p4419_p2)
}
   0xf   :  { %s4423_s27 = scalar_lea.vmem %s44_s19, 16384  ;;  %p4428_p4 = scmp.lt.s32.totalorder %s44_s19, %s44_s19 }
  0x10   :  { %p4424_p3 = scmp.ne.s32.totalorder %s44_s19, %s4423_s27  ;;  %p4429_p5 = scmp.lt.s32.totalorder %s4423_s27, %s4423_s27 }
  0x12   :  { %p4430_p6 = por %p4429_p5, %p4428_p4 }
  0x14   :  { %p4431_p7 = pnand %p4430_p6, %p4424_p3 }
  0x16   :  { %4434 = shalt.err (!%p4431_p7)
}
  0x17   :  { %s4692_s28 = smov 128   ;;  %s4693_s29 = smov 8  }
  0x18   :  { %49 = dma.hbm_to_vmem [thread:$0]  %s7406_s1, 16384, %s44_s19, [#allocation6], %s4692_s28, %s4692_s28, %s4693_s29  }
  0x19   :  { %s4694_s17 = smov [#allocation8]   ;;  %s4695_s20 = smov [#allocation2]  }
  0x1a   :  { %s71_s18 = sshll.u32 %s4694_s17, 4  ;;  %s34_s21 = sshll.u32 %s4695_s20, 4  ;;  %s72_s18 = int_to_ptr.vmem [resolvable:$true] %s71_s18  ;;  %s35_s21 = int_to_ptr.vmem [resolvable:$true] %s34_s21 }
  0x1b   :  { %s4435_s24 = scalar_lea.hbm %s7410_s5, 16384 }
  0x1c   :  { %p4436_p8 = scmp.ne.s32.totalorder %s7410_s5, %s4435_s24  ;;  %p4439_p9 = scmp.lt.u32.totalorder %s4435_s24, %s7410_s5 }
  0x1e   :  { %p4441_p10 = pnand %p4439_p9, %p4436_p8 }
  0x20   :  { %4444 = shalt.err (!%p4441_p10)
}
  0x21   :  { %s4445_s1 = scalar_lea.vmem %s72_s18, 16384  ;;  %p4450_p12 = scmp.lt.s32.totalorder %s72_s18, %s72_s18 }
  0x22   :  { %p4446_p11 = scmp.ne.s32.totalorder %s72_s18, %s4445_s1  ;;  %p4451_p13 = scmp.lt.s32.totalorder %s4445_s1, %s4445_s1 }
  0x24   :  { %p4452_p0 = por %p4451_p13, %p4450_p12 }
  0x26   :  { %p4453_p1 = pnand %p4452_p0, %p4446_p11 }
  0x28   :  { %4456 = shalt.err (!%p4453_p1)
}
  0x29   :  { %77 = dma.hbm_to_vmem [thread:$0]  %s7410_s5, 16384, %s72_s18, [#allocation9], %s4692_s28, %s4692_s28, %s4693_s29  }
  0x2a   :  { %s4457_s17 = scalar_lea.hbm %s7405_s0, 1024 }
  0x2b   :  { %p4458_p2 = scmp.ne.s32.totalorder %s7405_s0, %s4457_s17  ;;  %p4461_p3 = scmp.lt.u32.totalorder %s4457_s17, %s7405_s0 }
  0x2d   :  { %p4463_p4 = pnand %p4461_p3, %p4458_p2 }
  0x2f   :  { %4466 = shalt.err (!%p4463_p4)
}
  0x30   :  { %s4467_s25 = scalar_lea.vmem %s35_s21, 1024  ;;  %p4472_p6 = scmp.lt.s32.totalorder %s35_s21, %s35_s21 }
  0x31   :  { %p4468_p5 = scmp.ne.s32.totalorder %s35_s21, %s4467_s25  ;;  %p4473_p7 = scmp.lt.s32.totalorder %s4467_s25, %s4467_s25 }
  0x33   :  { %p4474_p8 = por %p4473_p7, %p4472_p6 }
  0x35   :  { %p4475_p9 = pnand %p4474_p8, %p4468_p5 }
  0x37   :  { %4478 = shalt.err (!%p4475_p9)
}
  0x38   :  { %37 = dma.hbm_to_vmem [thread:$0]  %s7405_s0, 1024, %s35_s21, [#allocation3]  }
  0x39   :  { %s4696_s26 = smov [#allocation7]   ;;  %s4697_s1 = smov [#allocation10]  }
  0x3a   :  { %s57_s27 = sshll.u32 %s4696_s26, 4  ;;  %s85_s19 = sshll.u32 %s4697_s1, 4  ;;  %s58_s27 = int_to_ptr.vmem [resolvable:$true] %s57_s27  ;;  %s86_s19 = int_to_ptr.vmem [resolvable:$true] %s85_s19 }
  0x3b   :  { %s4479_s11 = scalar_lea.hbm %s7408_s3, 2048 }
  0x3c   :  { %p4480_p10 = scmp.ne.s32.totalorder %s7408_s3, %s4479_s11  ;;  %p4483_p11 = scmp.lt.u32.totalorder %s4479_s11, %s7408_s3 }
  0x3e   :  { %p4485_p12 = pnand %p4483_p11, %p4480_p10 }
  0x40   :  { %4488 = shalt.err (!%p4485_p12)
}
  0x41   :  { %s4489_s0 = scalar_lea.vmem %s58_s27, 2048  ;;  %p4494_p0 = scmp.lt.s32.totalorder %s58_s27, %s58_s27 }
  0x42   :  { %p4490_p13 = scmp.ne.s32.totalorder %s58_s27, %s4489_s0  ;;  %p4495_p1 = scmp.lt.s32.totalorder %s4489_s0, %s4489_s0 }
  0x44   :  { %p4496_p2 = por %p4495_p1, %p4494_p0 }
  0x46   :  { %p4497_p3 = pnand %p4496_p2, %p4490_p13 }
  0x48   :  { %4500 = shalt.err (!%p4497_p3)
}
  0x49   :  { %63 = dma.hbm_to_vmem [thread:$0]  %s7408_s3, 2048, %s58_s27, [#allocation6], %s4692_s28, %s4692_s28, %s4693_s29  }
  0x4a   :  { %s4501_s18 = scalar_lea.hbm %s7412_s7, 2048 }
  0x4b   :  { %p4502_p4 = scmp.ne.s32.totalorder %s7412_s7, %s4501_s18  ;;  %p4505_p5 = scmp.lt.u32.totalorder %s4501_s18, %s7412_s7 }
  0x4d   :  { %p4507_p6 = pnand %p4505_p5, %p4502_p4 }
  0x4f   :  { %4510 = shalt.err (!%p4507_p6)
}
  0x50   :  { %s4511_s11 = scalar_lea.vmem %s86_s19, 2048  ;;  %p4516_p8 = scmp.lt.s32.totalorder %s86_s19, %s86_s19 }
  0x51   :  { %p4512_p7 = scmp.ne.s32.totalorder %s86_s19, %s4511_s11  ;;  %p4517_p9 = scmp.lt.s32.totalorder %s4511_s11, %s4511_s11 }
  0x53   :  { %p4518_p10 = por %p4517_p9, %p4516_p8 }
  0x55   :  { %p4519_p11 = pnand %p4518_p10, %p4512_p7 }
  0x57   :  { %4522 = shalt.err (!%p4519_p11)
}
  0x58   :  { %91 = dma.hbm_to_vmem [thread:$0]  %s7412_s7, 2048, %s86_s19, [#allocation9], %s4692_s28, %s4692_s28, %s4693_s29  }
  0x59   :  { %4677 = dma.done.wait [#allocation3], 1024  }
  0x5a   :  { %4678 = vsyncadd [#allocation3], 4294966272 }
  0x5b   :  { %4679 = dma.done.wait [#allocation6], 18432  }
  0x5c   :  { %4680 = vsyncadd [#allocation6], 4294948864 }
  0x5d   :  { %4681 = dma.done.wait [#allocation9], 18432  }
  0x5e   :  { %4682 = vsyncadd [#allocation9], 4294948864  ;;  %v286_v0 = vld [vmem:[#allocation8 + $0x80] sm:$0xff]  ;;  %v287_v1 = vld [vmem:[#allocation8 + $0x88] sm:$0xff]  ;;  %vm4699_vm0 = vmmov 0   ;;  %vm1438_vm1 = vcmask 1040384  }
  0x5f   :  { %v422_v2 = vpack.c.bf16 %v287_v1, %v286_v0  ;;  %v318_v3 = vld [vmem:[#allocation8 + $0x180] sm:$0xff]  ;;  %v319_v4 = vld [vmem:[#allocation8 + $0x188] sm:$0xff]  ;;  %v288_v17 = vld [vmem:[#allocation8 + $0x90] sm:$0xff]  ;;  %vm1584_vm5 = vcmask 1043456   ;;  %vm1559_vm6 = vcmask 64512   ;;  %s4701_s30 = smov [#allocation12]  }
  0x60   :  { %v4860_v5 = vld [vmem:[#allocation5] sm:$0xff]  ;;  %v438_v6 = vpack.c.bf16 %v319_v4, %v318_v3  ;;  %v4862_v7 = vld [vmem:[#allocation5 + $0x8] sm:$0xff]  ;;  %v289_v18 = vld [vmem:[#allocation8 + $0x98] sm:$0xff]  ;;  %s3559_s16 = sshll.u32 %s4701_s30, 4  ;;  %s4702_s11 = smov [#allocation15]   ;;  %s3560_s16 = int_to_ptr.vmem [resolvable:$true] %s3559_s16 }
  0x61   :  { %v270_v8 = vld [vmem:[#allocation8] sm:$0xff]  ;;  %v271_v9 = vld [vmem:[#allocation8 + $0x8] sm:$0xff]  ;;  %3721 = vmatprep.subr.bf16.mxu0 %v422_v2  ;;  %v320_v22 = vld [vmem:[#allocation8 + $0x190] sm:$0xff]  ;;  %v423_v24 = vpack.c.bf16 %v289_v18, %v288_v17  ;;  %s3578_s3 = sshll.u32 %s4702_s11, 4  ;;  %s4523_s27 = scalar_lea.vmem %s3560_s16, 128  ;;  %s7303_s3 = int_to_ptr.vmem [resolvable:$true] %s3578_s3 }
  0x62   :  { %v414_v10 = vpack.c.bf16 %v271_v9, %v270_v8  ;;  %v4865_v11 = vsub.f32 %v4860_v5, %v270_v8  ;;  %v158_v12 = vld [vmem:[#allocation5 + $0x100] sm:$0xff]  ;;  %v159_v13 = vld [vmem:[#allocation5 + $0x108] sm:$0xff]  ;;  %3743 = vmatprep.subr.bf16.mxu1 %v438_v6  ;;  %v4868_v15 = vsub.f32 %v4862_v7, %v271_v9  ;;  %v321_v23 = vld [vmem:[#allocation8 + $0x198] sm:$0xff]  ;;  %p4524_p12 = scmp.ne.s32.totalorder %s3560_s16, %s4523_s27  ;;  %p4528_p13 = scmp.lt.s32.totalorder %s3560_s16, %s3560_s16 }
  0x63   :  { %v302_v14 = vld [vmem:[#allocation8 + $0x100] sm:$0xff]  ;;  %v303_v16 = vld [vmem:[#allocation8 + $0x108] sm:$0xff]  ;;  %v439_v25 = vpack.c.bf16 %v321_v23, %v320_v22  ;;  %v4874_v26 = vld [vmem:[#allocation8 + $0x10] sm:$0xff]  ;;  %p4529_p0 = scmp.lt.s32.totalorder %s4523_s27, %s4523_s27 }
  0x64   :  { %7613 = vst [vmem:[#allocation28_spill] sm:$0xff] %v4865_v11  ;;  %7614 = vst [vmem:[#allocation29_spill] sm:$0xff] %v4868_v15  ;;  %3722 = vmatpush3.bf16.msra.mxu0 %v414_v10  ;;  %v430_v19 = vpack.c.bf16 %v303_v16, %v302_v14  ;;  %v4870_v20 = vsub.f32 %v158_v12, %v302_v14  ;;  %v4872_v21 = vsub.f32 %v159_v13, %v303_v16  ;;  %v4876_v27 = vld [vmem:[#allocation8 + $0x18] sm:$0xff]  ;;  %v304_v29 = vld [vmem:[#allocation8 + $0x110] sm:$0xff] }
  0x65   :  { %v415_v28 = vpack.c.bf16 %v4876_v27, %v4874_v26  ;;  %3723 = vmatprep.subr.bf16.mxu0 %v423_v24  ;;  %v305_v30 = vld [vmem:[#allocation8 + $0x118] sm:$0xff]  ;;  %v290_v31 = vld [vmem:[#allocation8 + $0xa0] sm:$0xff]  ;;  %v291_v32 = vld [vmem:[#allocation8 + $0xa8] sm:$0xff]  ;;  %p4530_p1 = por %p4529_p0, %p4528_p13 }
  0x66   :  { %7615 = vst [vmem:[#allocation30_spill] sm:$0xff] %v4870_v20  ;;  %7616 = vst [vmem:[#allocation31_spill] sm:$0xff] %v4872_v21  ;;  %3744 = vmatpush3.bf16.msra.mxu1 %v430_v19  ;;  %v431_v33 = vpack.c.bf16 %v305_v30, %v304_v29  ;;  %v424_v34 = vpack.c.bf16 %v291_v32, %v290_v31  ;;  %v322_v35 = vld [vmem:[#allocation8 + $0x1a0] sm:$0xff]  ;;  %v323_v36 = vld [vmem:[#allocation8 + $0x1a8] sm:$0xff] }
  0x67   :  { %3745 = vmatprep.subr.bf16.mxu1 %v439_v25  ;;  %v440_v37 = vpack.c.bf16 %v323_v36, %v322_v35  ;;  %v4880_v38 = vld [vmem:[#allocation8 + $0x20] sm:$0xff]  ;;  %v4882_v39 = vld [vmem:[#allocation8 + $0x28] sm:$0xff]  ;;  %v292_v43 = vld [vmem:[#allocation8 + $0xb0] sm:$0xff]  ;;  %p4531_p2 = pnand %p4530_p1, %p4524_p12 }
  0x68   :  { %3724 = vmatpush3.bf16.msra.mxu0 %v415_v28  ;;  %v416_v40 = vpack.c.bf16 %v4882_v39, %v4880_v38  ;;  %v306_v41 = vld [vmem:[#allocation8 + $0x120] sm:$0xff]  ;;  %v307_v42 = vld [vmem:[#allocation8 + $0x128] sm:$0xff]  ;;  %v293_v44 = vld [vmem:[#allocation8 + $0xb8] sm:$0xff] }
  0x69   :  { %3725 = vmatprep.subr.bf16.mxu0 %v424_v34  ;;  %v432_v45 = vpack.c.bf16 %v307_v42, %v306_v41  ;;  %v425_v46 = vpack.c.bf16 %v293_v44, %v292_v43  ;;  %v324_v47 = vld [vmem:[#allocation8 + $0x1b0] sm:$0xff]  ;;  %v325_v48 = vld [vmem:[#allocation8 + $0x1b8] sm:$0xff]  ;;  %v294_v55 = vld [vmem:[#allocation8 + $0xc0] sm:$0xff] }
  0x6a   :  { %3746 = vmatpush3.bf16.msra.mxu1 %v431_v33  ;;  %v441_v49 = vpack.c.bf16 %v325_v48, %v324_v47  ;;  %v4886_v50 = vld [vmem:[#allocation8 + $0x30] sm:$0xff]  ;;  %v4888_v51 = vld [vmem:[#allocation8 + $0x38] sm:$0xff]  ;;  %v295_v56 = vld [vmem:[#allocation8 + $0xc8] sm:$0xff] }
  0x6b   :  { %3747 = vmatprep.subr.bf16.mxu1 %v440_v37  ;;  %v417_v52 = vpack.c.bf16 %v4888_v51, %v4886_v50  ;;  %v308_v53 = vld [vmem:[#allocation8 + $0x130] sm:$0xff]  ;;  %v309_v54 = vld [vmem:[#allocation8 + $0x138] sm:$0xff]  ;;  %v426_v58 = vpack.c.bf16 %v295_v56, %v294_v55  ;;  %v326_v59 = vld [vmem:[#allocation8 + $0x1c0] sm:$0xff] }
  0x6c   :  { %3726 = vmatpush3.bf16.msra.mxu0 %v416_v40  ;;  %v433_v57 = vpack.c.bf16 %v309_v54, %v308_v53  ;;  %v327_v60 = vld [vmem:[#allocation8 + $0x1c8] sm:$0xff]  ;;  %v4892_v62 = vld [vmem:[#allocation8 + $0x40] sm:$0xff]  ;;  %v296_v3 = vld [vmem:[#allocation8 + $0xd0] sm:$0xff] }
  0x6d   :  { %3727 = vmatprep.subr.bf16.mxu0 %v425_v46  ;;  %v442_v61 = vpack.c.bf16 %v327_v60, %v326_v59  ;;  %v4894_v63 = vld [vmem:[#allocation8 + $0x48] sm:$0xff]  ;;  %v310_v1 = vld [vmem:[#allocation8 + $0x140] sm:$0xff]  ;;  %v297_v4 = vld [vmem:[#allocation8 + $0xd8] sm:$0xff] }
  0x6e   :  { %3748 = vmatpush3.bf16.msra.mxu1 %v432_v45  ;;  %v418_v0 = vpack.c.bf16 %v4894_v63, %v4892_v62  ;;  %v311_v2 = vld [vmem:[#allocation8 + $0x148] sm:$0xff]  ;;  %v427_v8 = vpack.c.bf16 %v297_v4, %v296_v3  ;;  %v328_v9 = vld [vmem:[#allocation8 + $0x1d0] sm:$0xff]  ;;  %v329_v10 = vld [vmem:[#allocation8 + $0x1d8] sm:$0xff] }
  0x6f   :  { %3749 = vmatprep.subr.bf16.mxu1 %v441_v49  ;;  %v434_v6 = vpack.c.bf16 %v311_v2, %v310_v1  ;;  %v443_v12 = vpack.c.bf16 %v329_v10, %v328_v9  ;;  %v4898_v13 = vld [vmem:[#allocation8 + $0x50] sm:$0xff]  ;;  %v4900_v14 = vld [vmem:[#allocation8 + $0x58] sm:$0xff]  ;;  %v298_v19 = vld [vmem:[#allocation8 + $0xe0] sm:$0xff] }
  0x70   :  { %3728 = vmatpush3.bf16.msra.mxu0 %v417_v52  ;;  %v419_v16 = vpack.c.bf16 %v4900_v14, %v4898_v13  ;;  %v312_v17 = vld [vmem:[#allocation8 + $0x150] sm:$0xff]  ;;  %v313_v18 = vld [vmem:[#allocation8 + $0x158] sm:$0xff]  ;;  %v299_v22 = vld [vmem:[#allocation8 + $0xe8] sm:$0xff] }
  0x71   :  { %3729 = vmatprep.subr.bf16.mxu0 %v426_v58  ;;  %v435_v23 = vpack.c.bf16 %v313_v18, %v312_v17  ;;  %v428_v24 = vpack.c.bf16 %v299_v22, %v298_v19  ;;  %v330_v25 = vld [vmem:[#allocation8 + $0x1e0] sm:$0xff]  ;;  %v331_v28 = vld [vmem:[#allocation8 + $0x1e8] sm:$0xff]  ;;  %v300_v35 = vld [vmem:[#allocation8 + $0xf0] sm:$0xff] }
  0x72   :  { %3750 = vmatpush3.bf16.msra.mxu1 %v433_v57  ;;  %v444_v29 = vpack.c.bf16 %v331_v28, %v330_v25  ;;  %v4904_v30 = vld [vmem:[#allocation8 + $0x60] sm:$0xff]  ;;  %v4906_v31 = vld [vmem:[#allocation8 + $0x68] sm:$0xff]  ;;  %v301_v36 = vld [vmem:[#allocation8 + $0xf8] sm:$0xff] }
  0x73   :  { %3751 = vmatprep.subr.bf16.mxu1 %v442_v61  ;;  %v420_v32 = vpack.c.bf16 %v4906_v31, %v4904_v30  ;;  %v314_v33 = vld [vmem:[#allocation8 + $0x160] sm:$0xff]  ;;  %v315_v34 = vld [vmem:[#allocation8 + $0x168] sm:$0xff]  ;;  %v429_v40 = vpack.c.bf16 %v301_v36, %v300_v35  ;;  %v332_v41 = vld [vmem:[#allocation8 + $0x1f0] sm:$0xff] }
  0x74   :  { %3730 = vmatpush3.bf16.msra.mxu0 %v418_v0  ;;  %v436_v37 = vpack.c.bf16 %v315_v34, %v314_v33  ;;  %v333_v42 = vld [vmem:[#allocation8 + $0x1f8] sm:$0xff]  ;;  %v4910_v44 = vld [vmem:[#allocation8 + $0x70] sm:$0xff]  ;;  %v111_v49 = vld [vmem:[#allocation2 + $0x8] sm:$0xff] }
  0x75   :  { %3731 = vmatprep.subr.bf16.mxu0 %v427_v8  ;;  %v445_v43 = vpack.c.bf16 %v333_v42, %v332_v41  ;;  %v4912_v45 = vld [vmem:[#allocation8 + $0x78] sm:$0xff]  ;;  %v316_v47 = vld [vmem:[#allocation8 + $0x170] sm:$0xff]  ;;  %v4916_v54 = vpack.c.bf16 %v111_v49, %v111_v49  ;;  %v110_v55 = vld [vmem:[#allocation2] sm:$0xff] }
  0x76   :  { %3752 = vmatpush3.bf16.msra.mxu1 %v434_v6  ;;  %v421_v46 = vpack.c.bf16 %v4912_v45, %v4910_v44  ;;  %v317_v48 = vld [vmem:[#allocation8 + $0x178] sm:$0xff]  ;;  %v112_v56 = vld [vmem:[#allocation2 + $0x10] sm:$0xff]  ;;  %v350_v57 = vld [vmem:[#allocation8 + $0x280] sm:$0xff]  ;;  %v4921_v0 = vpack.c.bf16 %v110_v55, %v110_v55 }
  0x77   :  { %3753 = vmatprep.subr.bf16.mxu1 %v443_v12  ;;  %v113_v52 = vld [vmem:[#allocation2 + $0x18] sm:$0xff]  ;;  %v437_v53 = vpack.c.bf16 %v317_v48, %v316_v47  ;;  %7617 = vst [vmem:[#allocation32_spill] sm:$0xff] %v4916_v54  ;;  %v351_v59 = vld [vmem:[#allocation8 + $0x288] sm:$0xff]  ;;  %v382_v60 = vld [vmem:[#allocation8 + $0x380] sm:$0xff]  ;;  %517 = vmatprep.mubr.bf16.mxu0 %v4916_v54  ;;  %v4923_v1 = vpack.c.bf16 %v112_v56, %v112_v56 }
  0x78   :  { %3732 = vmatpush3.bf16.msra.mxu0 %v419_v16  ;;  %v4918_v58 = vpack.c.bf16 %v113_v52, %v113_v52  ;;  %v383_v61 = vld [vmem:[#allocation8 + $0x388] sm:$0xff]  ;;  %7619 = vst [vmem:[#allocation34_spill] sm:$0xff] %v4921_v0  ;;  %v334_v2 = vld [vmem:[#allocation8 + $0x200] sm:$0xff]  ;;  %v454_v6 = vpack.c.bf16 %v351_v59, %v350_v57  ;;  %v352_v12 = vld [vmem:[#allocation8 + $0x290] sm:$0xff] }
  0x79   :  { %3733 = vmatprep.subr.bf16.mxu0 %v428_v24  ;;  %v335_v3 = vld [vmem:[#allocation8 + $0x208] sm:$0xff]  ;;  %v366_v4 = vld [vmem:[#allocation8 + $0x300] sm:$0xff]  ;;  %v470_v8 = vpack.c.bf16 %v383_v61, %v382_v60  ;;  %v353_v16 = vld [vmem:[#allocation8 + $0x298] sm:$0xff] }
  0x7a   :  { %3754 = vmatpush3.bf16.msra.mxu1 %v435_v23  ;;  %7618 = vst [vmem:[#allocation33_spill] sm:$0xff] %v4918_v58  ;;  %557 = vmatprep.mubr.bf16.mxu1 %v4918_v58  ;;  %v446_v9 = vpack.c.bf16 %v335_v3, %v334_v2  ;;  %v367_v10 = vld [vmem:[#allocation8 + $0x308] sm:$0xff]  ;;  %v455_v18 = vpack.c.bf16 %v353_v16, %v352_v12  ;;  %v384_v19 = vld [vmem:[#allocation8 + $0x390] sm:$0xff]  ;;  %v385_v22 = vld [vmem:[#allocation8 + $0x398] sm:$0xff] }
  0x7b   :  { %3755 = vmatprep.subr.bf16.mxu1 %v444_v29  ;;  %v462_v17 = vpack.c.bf16 %v367_v10, %v366_v4  ;;  %v336_v23 = vld [vmem:[#allocation8 + $0x210] sm:$0xff]  ;;  %v471_v24 = vpack.c.bf16 %v385_v22, %v384_v19  ;;  %v337_v25 = vld [vmem:[#allocation8 + $0x218] sm:$0xff]  ;;  %v354_v33 = vld [vmem:[#allocation8 + $0x2a0] sm:$0xff] }
  0x7c   :  { %3734 = vmatpush3.bf16.msra.mxu0 %v420_v32  ;;  %v368_v28 = vld [vmem:[#allocation8 + $0x310] sm:$0xff]  ;;  %v369_v29 = vld [vmem:[#allocation8 + $0x318] sm:$0xff]  ;;  %v447_v32 = vpack.c.bf16 %v337_v25, %v336_v23  ;;  %v355_v34 = vld [vmem:[#allocation8 + $0x2a8] sm:$0xff] }
  0x7d   :  { %3735 = vmatprep.subr.bf16.mxu0 %v429_v40  ;;  %v386_v35 = vld [vmem:[#allocation8 + $0x3a0] sm:$0xff]  ;;  %v463_v36 = vpack.c.bf16 %v369_v29, %v368_v28  ;;  %v387_v40 = vld [vmem:[#allocation8 + $0x3a8] sm:$0xff]  ;;  %v356_v48 = vld [vmem:[#allocation8 + $0x2b0] sm:$0xff] }
  0x7e   :  { %3756 = vmatpush3.bf16.msra.mxu1 %v436_v37  ;;  %v456_v37 = vpack.c.bf16 %v355_v34, %v354_v33  ;;  %v338_v41 = vld [vmem:[#allocation8 + $0x220] sm:$0xff]  ;;  %v339_v42 = vld [vmem:[#allocation8 + $0x228] sm:$0xff]  ;;  %v357_v49 = vld [vmem:[#allocation8 + $0x2b8] sm:$0xff] }
  0x7f   :  { %3757 = vmatprep.subr.bf16.mxu1 %v445_v43  ;;  %v472_v43 = vpack.c.bf16 %v387_v40, %v386_v35  ;;  %v371_v47 = vld [vmem:[#allocation8 + $0x328] sm:$0xff]  ;;  %v388_v52 = vld [vmem:[#allocation8 + $0x3b0] sm:$0xff]  ;;  %v448_v55 = vpack.c.bf16 %v339_v42, %v338_v41  ;;  %v457_v57 = vpack.c.bf16 %v357_v49, %v356_v48  ;;  %v341_v60 = vld [vmem:[#allocation8 + $0x238] sm:$0xff] }
  0x80   :  { %3736 = vmatpush3.bf16.msra.mxu0 %v421_v46  ;;  %v370_v46 = vld [vmem:[#allocation8 + $0x320] sm:$0xff]  ;;  %v340_v59 = vld [vmem:[#allocation8 + $0x230] sm:$0xff]  ;;  %v373_v3 = vld [vmem:[#allocation8 + $0x338] sm:$0xff] }
  0x81   :  { %3765 = vmatprep.subr.bf16.mxu0 %v454_v6  ;;  %v464_v56 = vpack.c.bf16 %v371_v47, %v370_v46  ;;  %v372_v61 = vld [vmem:[#allocation8 + $0x330] sm:$0xff]  ;;  %v358_v4 = vld [vmem:[#allocation8 + $0x2c0] sm:$0xff]  ;;  %v359_v6 = vld [vmem:[#allocation8 + $0x2c8] sm:$0xff]  ;;  %v449_v10 = vpack.c.bf16 %v341_v60, %v340_v59 }
  0x82   :  { %3758 = vmatpush3.bf16.msra.mxu1 %v437_v53  ;;  %v389_v53 = vld [vmem:[#allocation8 + $0x3b8] sm:$0xff]  ;;  %v465_v12 = vpack.c.bf16 %v373_v3, %v372_v61  ;;  %v458_v16 = vpack.c.bf16 %v359_v6, %v358_v4  ;;  %v374_v19 = vld [vmem:[#allocation8 + $0x340] sm:$0xff]  ;;  %v375_v23 = vld [vmem:[#allocation8 + $0x348] sm:$0xff] }
  0x83   :  { %518 = vmatmul.mubr.bf16.vlgmr.msra.gmra.mrb[0].mxu0 %v4921_v0  ;;  %3787 = vmatprep.subr.bf16.mxu1 %v470_v8  ;;  %v473_v2 = vpack.c.bf16 %v389_v53, %v388_v52  ;;  %v390_v8 = vld [vmem:[#allocation8 + $0x3c0] sm:$0xff]  ;;  %v361_v25 = vld [vmem:[#allocation8 + $0x2d8] sm:$0xff]  ;;  %v392_v28 = vld [vmem:[#allocation8 + $0x3d0] sm:$0xff]  ;;  %v466_v34 = vpack.c.bf16 %v375_v23, %v374_v19 }
  0x84   :  { %3766 = vmatpush3.bf16.msra.mxu0 %v446_v9  ;;  %v391_v9 = vld [vmem:[#allocation8 + $0x3c8] sm:$0xff]  ;;  %v393_v29 = vld [vmem:[#allocation8 + $0x3d8] sm:$0xff]  ;;  %v344_v33 = vld [vmem:[#allocation8 + $0x250] sm:$0xff] }
  0x85   :  { %558 = vmatmul.mubr.bf16.vlgmr.msra.gmra.mrb[0].mxu1 %v4923_v1  ;;  %3767 = vmatprep.subr.bf16.mxu0 %v455_v18  ;;  %v343_v18 = vld [vmem:[#allocation8 + $0x248] sm:$0xff]  ;;  %v474_v22 = vpack.c.bf16 %v391_v9, %v390_v8  ;;  %v377_v40 = vld [vmem:[#allocation8 + $0x358] sm:$0xff]  ;;  %v475_v41 = vpack.c.bf16 %v393_v29, %v392_v28  ;;  %v362_v42 = vld [vmem:[#allocation8 + $0x2e0] sm:$0xff] }
  0x86   :  { %3788 = vmatpush3.bf16.msra.mxu1 %v462_v17  ;;  %v342_v17 = vld [vmem:[#allocation8 + $0x240] sm:$0xff]  ;;  %v395_v47 = vld [vmem:[#allocation8 + $0x3e8] sm:$0xff]  ;;  %v117_v53 = vld [vmem:[#allocation2 + $0x38] sm:$0xff] }
  0x87   :  { %3789 = vmatprep.subr.bf16.mxu1 %v471_v24  ;;  %v360_v24 = vld [vmem:[#allocation8 + $0x2d0] sm:$0xff]  ;;  %v394_v46 = vld [vmem:[#allocation8 + $0x3e0] sm:$0xff]  ;;  %v115_v52 = vld [vmem:[#allocation2 + $0x28] sm:$0xff]  ;;  %v4930_v61 = vpack.c.bf16 %v117_v53, %v117_v53 }
  0x88   :  { %3768 = vmatpush3.bf16.msra.mxu0 %v447_v32  ;;  %v450_v32 = vpack.c.bf16 %v343_v18, %v342_v17  ;;  %v459_v35 = vpack.c.bf16 %v361_v25, %v360_v24  ;;  %v378_v59 = vld [vmem:[#allocation8 + $0x360] sm:$0xff]  ;;  %v4928_v60 = vpack.c.bf16 %v115_v52, %v115_v52  ;;  %v379_v3 = vld [vmem:[#allocation8 + $0x368] sm:$0xff]  ;;  %v364_v4 = vld [vmem:[#allocation8 + $0x2f0] sm:$0xff] }
  0x89   :  { %3769 = vmatprep.subr.bf16.mxu0 %v456_v37  ;;  %v376_v37 = vld [vmem:[#allocation8 + $0x350] sm:$0xff]  ;;  %7621 = vst [vmem:[#allocation36_spill] sm:$0xff] %v4930_v61  ;;  %v365_v6 = vld [vmem:[#allocation8 + $0x2f8] sm:$0xff]  ;;  %637 = vmatprep.mubr.bf16.mxu1 %v4930_v61  ;;  %v114_v25 = vld [vmem:[#allocation2 + $0x20] sm:$0xff] }
  0x8a   :  { %3790 = vmatpush3.bf16.msra.mxu1 %v463_v36  ;;  %v345_v36 = vld [vmem:[#allocation8 + $0x258] sm:$0xff]  ;;  %v467_v49 = vpack.c.bf16 %v377_v40, %v376_v37  ;;  %7620 = vst [vmem:[#allocation35_spill] sm:$0xff] %v4928_v60  ;;  %v396_v8 = vld [vmem:[#allocation8 + $0x3f0] sm:$0xff]  ;;  %597 = vmatprep.mubr.bf16.mxu0 %v4928_v60  ;;  %v5051_v21 = vld [vmem:[#allocation5 + $0x208] sm:$0xff] }
  0x8b   :  { %3791 = vmatprep.subr.bf16.mxu1 %v472_v43  ;;  %v363_v43 = vld [vmem:[#allocation8 + $0x2e8] sm:$0xff]  ;;  %v451_v48 = vpack.c.bf16 %v345_v36, %v344_v33  ;;  %v397_v9 = vld [vmem:[#allocation8 + $0x3f8] sm:$0xff]  ;;  %v348_v17 = vld [vmem:[#allocation8 + $0x270] sm:$0xff]  ;;  %v702_v36 = vpack.c.bf16 %v4862_v7, %v4860_v5  ;;  %7628 = vst [vmem:[#allocation43_spill] sm:$0xff] %v5051_v21 }
  0x8c   :  { %3770 = vmatpush3.bf16.msra.mxu0 %v448_v55  ;;  %v460_v55 = vpack.c.bf16 %v363_v43, %v362_v42  ;;  %v349_v18 = vld [vmem:[#allocation8 + $0x278] sm:$0xff]  ;;  %v477_v19 = vpack.c.bf16 %v397_v9, %v396_v8  ;;  %v116_v29 = vld [vmem:[#allocation2 + $0x30] sm:$0xff]  ;;  %v399_v42 = vld [vmem:[#allocation10 + $0x8] sm:$0xff] }
  0x8d   :  { %3771 = vmatprep.subr.bf16.mxu0 %v457_v57  ;;  %v347_v57 = vld [vmem:[#allocation8 + $0x268] sm:$0xff]  ;;  %v381_v23 = vld [vmem:[#allocation8 + $0x378] sm:$0xff]  ;;  %v453_v24 = vpack.c.bf16 %v349_v18, %v348_v17  ;;  %v4936_v33 = vpack.c.bf16 %v116_v29, %v116_v29  ;;  %v4947_v37 = vld [vmem:[#allocation5 + $0x10] sm:$0xff] }
  0x8e   :  { %3792 = vmatpush3.bf16.msra.mxu1 %v464_v56  ;;  %v346_v56 = vld [vmem:[#allocation8 + $0x260] sm:$0xff]  ;;  %v4949_v40 = vld [vmem:[#allocation5 + $0x18] sm:$0xff]  ;;  %v4954_v52 = vld [vmem:[#allocation5 + $0x90] sm:$0xff] }
  0x8f   :  { %3793 = vmatprep.subr.bf16.mxu1 %v473_v2  ;;  %v476_v2 = vpack.c.bf16 %v395_v47, %v394_v46  ;;  %7623 = vst [vmem:[#allocation38_spill] sm:$0xff] %v4936_v33  ;;  %v400_v46 = vld [vmem:[#allocation10 + $0x10] sm:$0xff]  ;;  %v7429_v47 = vmov 0.0   ;;  %v4956_v53 = vld [vmem:[#allocation5 + $0x98] sm:$0xff]  ;;  %v4960_v7 = vld [vmem:[#allocation5 + $0xa0] sm:$0xff] }
  0x90   :  { %3772 = vmatpush3.bf16.msra.mxu0 %v449_v10  ;;  %v452_v10 = vpack.c.bf16 %v347_v57, %v346_v56  ;;  %v711_v5 = vpack.c.bf16 %v4956_v53, %v4954_v52  ;;  %v703_v57 = vpack.c.bf16 %v4949_v40, %v4947_v37  ;;  %v4973_v8 = vld [vmem:[#allocation5 + $0xb0] sm:$0xff]  ;;  %v4975_v9 = vld [vmem:[#allocation5 + $0xb8] sm:$0xff] }
  0x91   :  { %3773 = vmatprep.subr.bf16.mxu0 %v458_v16  ;;  %v461_v16 = vpack.c.bf16 %v365_v6, %v364_v4  ;;  %v403_v4 = vld [vmem:[#allocation10 + $0x28] sm:$0xff]  ;;  %v4981_v17 = vld [vmem:[#allocation5 + $0x38] sm:$0xff]  ;;  %v404_v18 = vld [vmem:[#allocation10 + $0x30] sm:$0xff] }
  0x92   :  { %3794 = vmatpush3.bf16.msra.mxu1 %v465_v12  ;;  %v468_v12 = vpack.c.bf16 %v379_v3, %v378_v59  ;;  %v4966_v59 = vld [vmem:[#allocation5 + $0xa8] sm:$0xff]  ;;  %v402_v3 = vld [vmem:[#allocation10 + $0x20] sm:$0xff]  ;;  %v5058_v20 = vld [vmem:[#allocation5 + $0x218] sm:$0xff] }
  0x93   :  { %3795 = vmatprep.subr.bf16.mxu1 %v474_v22  ;;  %v380_v22 = vld [vmem:[#allocation8 + $0x370] sm:$0xff]  ;;  %v712_v6 = vpack.c.bf16 %v4966_v59, %v4960_v7  ;;  %7630 = vst [vmem:[#allocation45_spill] sm:$0xff] %v5058_v20 }
  0x94   :  { %3774 = vmatpush3.bf16.msra.mxu0 %v450_v32  ;;  %v469_v28 = vpack.c.bf16 %v381_v23, %v380_v22  ;;  %v4934_v32 = vpack.c.bf16 %v114_v25, %v114_v25  ;;  %v713_v22 = vpack.c.bf16 %v4975_v9, %v4973_v8  ;;  %v4986_v23 = vld [vmem:[#allocation5 + $0xc0] sm:$0xff] }
  0x95   :  { %3775 = vmatprep.subr.bf16.mxu0 %v459_v35  ;;  %v4943_v35 = vld [vmem:[#allocation5 + $0x88] sm:$0xff]  ;;  %v4990_v25 = vld [vmem:[#allocation5 + $0x40] sm:$0xff] }
  0x96   :  { %3796 = vmatpush3.bf16.msra.mxu1 %v466_v34  ;;  %7622 = vst [vmem:[#allocation37_spill] sm:$0xff] %v4934_v32  ;;  %v4941_v34 = vld [vmem:[#allocation5 + $0x80] sm:$0xff] }
  0x97   :  { %3797 = vmatprep.subr.bf16.mxu1 %v475_v41  ;;  %v398_v41 = vld [vmem:[#allocation10] sm:$0xff]  ;;  %v710_v43 = vpack.c.bf16 %v4943_v35, %v4941_v34 }
  0x98   :  { %3776 = vmatpush3.bf16.msra.mxu0 %v451_v48  ;;  %v647_v48 = vpack.c.bf16 %v399_v42, %v398_v41  ;;  %v406_v41 = vld [vmem:[#allocation10 + $0x40] sm:$0xff]  ;;  %v407_v42 = vld [vmem:[#allocation10 + $0x48] sm:$0xff] }
  0x99   :  { %3777 = vmatprep.subr.bf16.mxu0 %v460_v55  ;;  %v4962_v55 = vld [vmem:[#allocation5 + $0x20] sm:$0xff] }
  0x9a   :  { %3798 = vmatpush3.bf16.msra.mxu1 %v467_v49  ;;  %v401_v49 = vld [vmem:[#allocation10 + $0x18] sm:$0xff] }
  0x9b   :  { %3799 = vmatprep.subr.bf16.mxu1 %v476_v2  ;;  %v648_v56 = vpack.c.bf16 %v401_v49, %v400_v46  ;;  %v4968_v2 = vld [vmem:[#allocation5 + $0x28] sm:$0xff]  ;;  %v651_v46 = vpack.c.bf16 %v407_v42, %v406_v41  ;;  %v5003_v49 = vld [vmem:[#allocation5 + $0x50] sm:$0xff]  ;;  %v5020_v41 = vld [vmem:[#allocation5 + $0xe0] sm:$0xff] }
  0x9c   :  { %3778 = vmatpush3.bf16.msra.mxu0 %v452_v10  ;;  %v4977_v10 = vld [vmem:[#allocation5 + $0x30] sm:$0xff]  ;;  %v5022_v42 = vld [vmem:[#allocation5 + $0xe8] sm:$0xff] }
  0x9d   :  { %3779 = vmatprep.subr.bf16.mxu0 %v461_v16  ;;  %v704_v16 = vpack.c.bf16 %v4968_v2, %v4962_v55  ;;  %v705_v29 = vpack.c.bf16 %v4981_v17, %v4977_v10 }
  0x9e   :  { %3800 = vmatpush3.bf16.msra.mxu1 %v468_v12  ;;  %v649_v12 = vpack.c.bf16 %v403_v4, %v402_v3  ;;  %v5007_v4 = vld [vmem:[#allocation5 + $0xd0] sm:$0xff] }
  0x9f   :  { %3801 = vmatprep.subr.bf16.mxu1 %v477_v19  ;;  %v405_v19 = vld [vmem:[#allocation10 + $0x38] sm:$0xff] }
  0xa0   :  { %3780 = vmatpush3.bf16.msra.mxu0 %v453_v24  ;;  %v4988_v24 = vld [vmem:[#allocation5 + $0xc8] sm:$0xff] }
  0xa1   :  { %3998 = vmatprep.subr.bf16.mxu0 %v7429_v47 }
  0xa2   :  { %3802 = vmatpush3.bf16.msra.mxu1 %v469_v28  ;;  %v650_v28 = vpack.c.bf16 %v405_v19, %v404_v18  ;;  %v5017_v19 = vld [vmem:[#allocation5 + $0x68] sm:$0xff] }
  0xa3   :  { %598 = vmatmul.mubr.bf16.vlgmr.msra.gmra.mrb[4].mxu0 %v4934_v32  ;;  %3818 = vmatprep.subr.bf16.mxu1 %v710_v43  ;;  %v714_v43 = vpack.c.bf16 %v4988_v24, %v4986_v23 }
  0xa4   :  { %3999 = vmatpush3.bf16.msra.mxu0 %v647_v48  ;;  %4014 = vmatprep.mubr.msk.bf16.mxu0 %vm4699_vm0, %v7429_v47 }
  0xa5   :  { %638 = vmatmul.mubr.bf16.vlgmr.msra.gmra.mrb[4].mxu1 %v4936_v33  ;;  %4000 = vmatprep.subr.bf16.mxu0 %v7429_v47  ;;  %v5049_v33 = vld [vmem:[#allocation5 + $0x200] sm:$0xff] }
  0xa6   :  { %805 = vmatprep.mubr.bf16.mxu1 %v4916_v54  ;;  %3819 = vmatpush3.bf16.msra.mxu1 %v702_v36  ;;  %v4994_v36 = vld [vmem:[#allocation5 + $0x48] sm:$0xff]  ;;  %7627 = vst [vmem:[#allocation42_spill] sm:$0xff] %v5049_v33 }
  0xa7   :  { %3820 = vmatprep.subr.bf16.mxu1 %v711_v5  ;;  %v706_v48 = vpack.c.bf16 %v4994_v36, %v4990_v25  ;;  %v5005_v5 = vld [vmem:[#allocation5 + $0x58] sm:$0xff]  ;;  %v5039_v54 = vld [vmem:[#allocation5 + $0x188] sm:$0xff] }
  0xa8   :  { %4001 = vmatpush3.bf16.msra.mxu0 %v648_v56  ;;  %v408_v56 = vld [vmem:[#allocation10 + $0x50] sm:$0xff]  ;;  %v707_v18 = vpack.c.bf16 %v5005_v5, %v5003_v49  ;;  %7626 = vst [vmem:[#allocation41_spill] sm:$0xff] %v5039_v54 }
  0xa9   :  { %4002 = vmatprep.subr.bf16.mxu0 %v7429_v47 }
  0xaa   :  { %3821 = vmatpush3.bf16.msra.mxu1 %v703_v57  ;;  %v409_v57 = vld [vmem:[#allocation10 + $0x58] sm:$0xff] }
  0xab   :  { %3822 = vmatprep.subr.bf16.mxu1 %v712_v6  ;;  %v652_v3 = vpack.c.bf16 %v409_v57, %v408_v56  ;;  %v5009_v6 = vld [vmem:[#allocation5 + $0xd8] sm:$0xff]  ;;  %v412_v57 = vld [vmem:[#allocation10 + $0x70] sm:$0xff] }
  0xac   :  { %4003 = vmatpush3.bf16.msra.mxu0 %v649_v12  ;;  %v715_v12 = vpack.c.bf16 %v5009_v6, %v5007_v4  ;;  %v5030_v56 = vld [vmem:[#allocation5 + $0x78] sm:$0xff] }
  0xad   :  { %4004 = vmatprep.subr.bf16.mxu0 %v7429_v47 }
  0xae   :  { %3823 = vmatpush3.bf16.msra.mxu1 %v704_v16  ;;  %v5013_v16 = vld [vmem:[#allocation5 + $0x60] sm:$0xff] }
  0xaf   :  { %3824 = vmatprep.subr.bf16.mxu1 %v713_v22  ;;  %v410_v22 = vld [vmem:[#allocation10 + $0x60] sm:$0xff] }
  0xb0   :  { %4005 = vmatpush3.bf16.msra.mxu0 %v650_v28  ;;  %v411_v28 = vld [vmem:[#allocation10 + $0x68] sm:$0xff] }
  0xb1   :  { %4006 = vmatprep.subr.bf16.mxu0 %v7429_v47 }
  0xb2   :  { %3825 = vmatpush3.bf16.msra.mxu1 %v705_v29  ;;  %v653_v29 = vpack.c.bf16 %v411_v28, %v410_v22  ;;  %v5035_v22 = vld [vmem:[#allocation5 + $0xf8] sm:$0xff]  ;;  %v5037_v28 = vld [vmem:[#allocation5 + $0x180] sm:$0xff] }
  0xb3   :  { %3826 = vmatprep.subr.bf16.mxu1 %v714_v43  ;;  %v716_v43 = vpack.c.bf16 %v5022_v42, %v5020_v41  ;;  %7624 = vst [vmem:[#allocation39_spill] sm:$0xff] %v5035_v22  ;;  %7625 = vst [vmem:[#allocation40_spill] sm:$0xff] %v5037_v28 }
  0xb4   :  { %4007 = vmatpush3.bf16.msra.mxu0 %v651_v46  ;;  %v5026_v46 = vld [vmem:[#allocation5 + $0x70] sm:$0xff] }
  0xb5   :  { %4008 = vmatprep.subr.bf16.mxu0 %v7429_v47 }
  0xb6   :  { %3827 = vmatpush3.bf16.msra.mxu1 %v706_v48  ;;  %v708_v48 = vpack.c.bf16 %v5017_v19, %v5013_v16 }
  0xb7   :  { %3828 = vmatprep.subr.bf16.mxu1 %v715_v12 }
  0xb8   :  { %4009 = vmatpush3.bf16.msra.mxu0 %v652_v3  ;;  %v413_v3 = vld [vmem:[#allocation10 + $0x78] sm:$0xff] }
  0xb9   :  { %4010 = vmatprep.subr.bf16.mxu0 %v7429_v47  ;;  %v654_v12 = vpack.c.bf16 %v413_v3, %v412_v57  ;;  %v206_v57 = vld [vmem:[#allocation5 + $0x280] sm:$0xff]  ;;  %v207_v3 = vld [vmem:[#allocation5 + $0x288] sm:$0xff] }
  0xba   :  { %3829 = vmatpush3.bf16.msra.mxu1 %v707_v18  ;;  %v5033_v18 = vld [vmem:[#allocation5 + $0xf0] sm:$0xff] }
  0xbb   :  { %3830 = vmatprep.subr.bf16.mxu1 %v716_v43  ;;  %v709_v43 = vpack.c.bf16 %v5030_v56, %v5026_v46 }
  0xbc   :  { %4011 = vmatpush3.bf16.msra.mxu0 %v653_v29  ;;  %v717_v29 = vpack.c.bf16 %v5035_v22, %v5033_v18  ;;  %v213_v22 = vld [vmem:[#allocation5 + $0x2b8] sm:$0xff] }
  0xbd   :  { %4012 = vmatprep.subr.bf16.mxu0 %v7429_v47 }
  0xbe   :  { %3831 = vmatpush3.bf16.msra.mxu1 %v708_v48  ;;  %v726_v48 = vpack.c.bf16 %v5039_v54, %v5037_v28  ;;  %v209_v54 = vld [vmem:[#allocation5 + $0x298] sm:$0xff]  ;;  %v5056_v28 = vld [vmem:[#allocation5 + $0x210] sm:$0xff] }
  0xbf   :  { %3832 = vmatprep.subr.bf16.mxu1 %v717_v29  ;;  %v734_v29 = vpack.c.bf16 %v5051_v21, %v5049_v33  ;;  %7629 = vst [vmem:[#allocation44_spill] sm:$0xff] %v5056_v28  ;;  %v5065_v21 = vld [vmem:[#allocation5 + $0x228] sm:$0xff]  ;;  %v212_v33 = vld [vmem:[#allocation5 + $0x2b0] sm:$0xff] }
  0xc0   :  { %4013 = vmatpush3.bf16.msra.mxu0 %v654_v12  ;;  %v742_v12 = vpack.c.bf16 %v207_v3, %v206_v57  ;;  %v210_v57 = vld [vmem:[#allocation5 + $0x2a0] sm:$0xff]  ;;  %v211_v3 = vld [vmem:[#allocation5 + $0x2a8] sm:$0xff]  ;;  %7632 = vst [vmem:[#allocation47_spill] sm:$0xff] %v5065_v21 }
  0xc1   :  { %3840 = vmatprep.subr.bf16.mxu0 %v726_v48  ;;  %v735_v48 = vpack.c.bf16 %v5058_v20, %v5056_v28  ;;  %v5075_v20 = vld [vmem:[#allocation5 + $0x2c0] sm:$0xff] }
  0xc2   :  { %3833 = vmatpush3.bf16.msra.mxu1 %v709_v43  ;;  %v208_v43 = vld [vmem:[#allocation5 + $0x290] sm:$0xff]  ;;  %7635 = vst [vmem:[#allocation50_spill] sm:$0xff] %v5075_v20  ;;  %v5090_v28 = vld [vmem:[#allocation5 + $0x260] sm:$0xff] }
  0xc3   :  { %3862 = vmatprep.subr.bf16.mxu1 %v742_v12  ;;  %v743_v47 = vpack.c.bf16 %v209_v54, %v208_v43  ;;  %v744_v12 = vpack.c.bf16 %v211_v3, %v210_v57  ;;  %v5069_v54 = vld [vmem:[#allocation5 + $0x230] sm:$0xff]  ;;  %v745_v43 = vpack.c.bf16 %v213_v22, %v212_v33  ;;  %v5077_v57 = vld [vmem:[#allocation5 + $0x240] sm:$0xff]  ;;  %v5079_v3 = vld [vmem:[#allocation5 + $0x248] sm:$0xff] }
  0xc4   :  { %7633 = vst [vmem:[#allocation48_spill] sm:$0xff] %v5069_v54  ;;  %7636 = vst [vmem:[#allocation51_spill] sm:$0xff] %v5079_v3  ;;  %v5084_v33 = vld [vmem:[#allocation5 + $0x250] sm:$0xff]  ;;  %v5086_v22 = vld [vmem:[#allocation5 + $0x258] sm:$0xff] }
  0xc5   :  { %806 = vmatmul.mubr.bf16.vlgmr.msra.gmra.mrb[8].mxu1 %v4921_v0  ;;  %v5063_v0 = vld [vmem:[#allocation5 + $0x220] sm:$0xff]  ;;  %7637 = vst [vmem:[#allocation52_spill] sm:$0xff] %v5084_v33  ;;  %7638 = vst [vmem:[#allocation53_spill] sm:$0xff] %v5086_v22 }
  0xc6   :  { %3863 = vmatpush3.bf16.msra.mxu1 %v734_v29  ;;  %885 = vmatprep.mubr.bf16.mxu1 %v4928_v60  ;;  %7631 = vst [vmem:[#allocation46_spill] sm:$0xff] %v5063_v0  ;;  %v736_v29 = vpack.c.bf16 %v5065_v21, %v5063_v0  ;;  %v216_v21 = vld [vmem:[#allocation5 + $0x2d0] sm:$0xff]  ;;  %v217_v0 = vld [vmem:[#allocation5 + $0x2d8] sm:$0xff] }
  0xc7   :  { %3864 = vmatprep.subr.bf16.mxu1 %v743_v47  ;;  %v5071_v47 = vld [vmem:[#allocation5 + $0x238] sm:$0xff] }
  0xc8   :  { %7634 = vst [vmem:[#allocation49_spill] sm:$0xff] %v5071_v47  ;;  %v737_v60 = vpack.c.bf16 %v5071_v47, %v5069_v54  ;;  %v739_v47 = vpack.c.bf16 %v5086_v22, %v5084_v33  ;;  %v218_v54 = vld [vmem:[#allocation5 + $0x2e0] sm:$0xff]  ;;  %v7639_v33 = vmov 0.0  }
  0xca   :  { %3865 = vmatpush3.bf16.msra.mxu1 %v735_v48  ;;  %v215_v48 = vld [vmem:[#allocation5 + $0x2c8] sm:$0xff] }
  0xcb   :  { %3866 = vmatprep.subr.bf16.mxu1 %v744_v12  ;;  %v746_v12 = vpack.c.bf16 %v215_v48, %v5075_v20  ;;  %v5092_v48 = vld [vmem:[#allocation5 + $0x268] sm:$0xff] }
  0xce   :  { %3867 = vmatpush3.bf16.msra.mxu1 %v736_v29  ;;  %v738_v29 = vpack.c.bf16 %v5079_v3, %v5077_v57  ;;  %v221_v3 = vld [vmem:[#allocation5 + $0x2f8] sm:$0xff] }
  0xcf   :  { %3868 = vmatprep.subr.bf16.mxu1 %v745_v43  ;;  %v747_v43 = vpack.c.bf16 %v217_v0, %v216_v21  ;;  %v5096_v21 = vld [vmem:[#allocation5 + $0x270] sm:$0xff]  ;;  %v5098_v0 = vld [vmem:[#allocation5 + $0x278] sm:$0xff] }
  0xd0   :  { %v741_v22 = vpack.c.bf16 %v5098_v0, %v5096_v21 }
  0xd2   :  { %3869 = vmatpush3.bf16.msra.mxu1 %v737_v60  ;;  %v219_v60 = vld [vmem:[#allocation5 + $0x2e8] sm:$0xff] }
  0xd3   :  { %3870 = vmatprep.subr.bf16.mxu1 %v746_v12  ;;  %v748_v20 = vpack.c.bf16 %v219_v60, %v218_v54  ;;  %v740_v12 = vpack.c.bf16 %v5092_v48, %v5090_v28  ;;  %v1173_v54 = vmul.f32 %v4868_v15, %v4868_v15 }
  0xd6   :  { %3871 = vmatpush3.bf16.msra.mxu1 %v738_v29  ;;  %v220_v29 = vld [vmem:[#allocation5 + $0x2f0] sm:$0xff] }
  0xd7   :  { %3872 = vmatprep.subr.bf16.mxu1 %v747_v43  ;;  %v749_v43 = vpack.c.bf16 %v221_v3, %v220_v29 }
  0xda   :  { %3873 = vmatpush3.bf16.msra.mxu1 %v739_v47  ;;  %v5112_v47 = vsub.f32 %v4947_v37, %v4874_v26  ;;  %v5128_v26 = vsub.f32 %v4968_v2, %v4882_v39 }
  0xdb   :  { %3874 = vmatprep.subr.bf16.mxu1 %v748_v20  ;;  %v1172_v20 = vmul.f32 %v4865_v11, %v4865_v11  ;;  %v5377_v11 = vld [vmem:[#allocation5 + $0x320] sm:$0xff] }
  0xdc   :  { %7640 = vst [vmem:[#allocation54_spill] sm:$0xff] %v5112_v47  ;;  %v1174_v60 = vmul.f32 %v5112_v47, %v5112_v47  ;;  %7643 = vst [vmem:[#allocation57_spill] sm:$0xff] %v5128_v26  ;;  %v1177_v37 = vmul.f32 %v5128_v26, %v5128_v26  ;;  %v5381_v47 = vld [vmem:[#allocation5 + $0x3b0] sm:$0xff] }
  0xdd   :  { %v1300_v3 = vadd.f32 %v1173_v54, %v1172_v20  ;;  %v5136_v20 = vsub.f32 %v4977_v10, %v4886_v50  ;;  %v3645_v50 = vld [vmem:[%s7411_s6] ss:$0 sm:$0xff]  ;;  %7673 = vst [vmem:[#allocation87_spill] sm:$0xff] %v5381_v47 }
  0xde   :  { %3875 = vmatpush3.bf16.msra.mxu1 %v740_v12 }
  0xdf   :  { %3876 = vmatprep.subr.bf16.mxu1 %v749_v43  ;;  %v1301_v29 = vadd.f32 %v1300_v3, %v1174_v60  ;;  %v5124_v43 = vsub.f32 %v4962_v55, %v4880_v38  ;;  %7644 = vst [vmem:[#allocation58_spill] sm:$0xff] %v5136_v20  ;;  %v5140_v38 = vsub.f32 %v4981_v17, %v4888_v51 }
  0xe0   :  { %v1178_v39 = vmul.f32 %v5136_v20, %v5136_v20  ;;  %v5148_v3 = vsub.f32 %v4990_v25, %v4892_v62  ;;  %v5155_v17 = vsub.f32 %v4994_v36, %v4894_v63  ;;  %v5360_v20 = vld [vmem:[#allocation5 + $0x318] sm:$0xff] }
  0xe1   :  { %7642 = vst [vmem:[#allocation56_spill] sm:$0xff] %v5124_v43  ;;  %7645 = vst [vmem:[#allocation59_spill] sm:$0xff] %v5140_v38  ;;  %v1179_v55 = vmul.f32 %v5140_v38, %v5140_v38 }
  0xe2   :  { %3877 = vmatpush3.bf16.msra.mxu1 %v741_v22  ;;  %v5116_v22 = vsub.f32 %v4949_v40, %v4876_v27  ;;  %v1176_v27 = vmul.f32 %v5124_v43, %v5124_v43  ;;  %7646 = vst [vmem:[#allocation60_spill] sm:$0xff] %v5148_v3  ;;  %7647 = vst [vmem:[#allocation61_spill] sm:$0xff] %v5155_v17  ;;  %v1181_v26 = vmul.f32 %v5155_v17, %v5155_v17  ;;  %v5330_v17 = vld [vmem:[#allocation5 + $0x388] sm:$0xff]  ;;  %v5358_v43 = vld [vmem:[#allocation5 + $0x310] sm:$0xff] }
  0xe3   :  { %4018 = vmatprep.subr.bf16.mxu1 %v7639_v33  ;;  %7665 = vst [vmem:[#allocation79_spill] sm:$0xff] %v5330_v17 }
  0xe4   :  { %7641 = vst [vmem:[#allocation55_spill] sm:$0xff] %v5116_v22  ;;  %v1175_v12 = vmul.f32 %v5116_v22, %v5116_v22  ;;  %v5364_v22 = vld [vmem:[#allocation5 + $0x3a8] sm:$0xff] }
  0xe5   :  { %886 = vmatmul.mubr.bf16.vlgmr.msra.gmra.mrb[12].mxu1 %v4934_v32  ;;  %7671 = vst [vmem:[#allocation85_spill] sm:$0xff] %v5364_v22  ;;  %v7689_v32 = vld [vmem:[#allocation30_spill] sm:$0xff] }
  0xe6   :  { %4034 = vmatprep.mubr.msk.bf16.mxu1 %vm4699_vm0, %v7639_v33  ;;  %v1302_v15 = vadd.f32 %v1301_v29, %v1175_v12  ;;  %v1180_v12 = vmul.f32 %v5148_v3, %v5148_v3  ;;  %v5343_v3 = vld [vmem:[#allocation5 + $0x308] sm:$0xff] }
  0xe8   :  { %v1303_v40 = vadd.f32 %v1302_v15, %v1176_v27 }
  0xea   :  { %v1304_v54 = vadd.f32 %v1303_v40, %v1177_v37 }
  0xec   :  { %v1305_v2 = vadd.f32 %v1304_v54, %v1178_v39 }
  0xee   :  { %v1306_v51 = vadd.f32 %v1305_v2, %v1179_v55  ;;  %v5163_v55 = vsub.f32 %v5003_v49, %v4898_v13  ;;  %v5167_v2 = vsub.f32 %v5005_v5, %v4900_v14  ;;  %v5179_v13 = vsub.f32 %v5017_v19, %v4906_v31 }
  0xf0   :  { %v1307_v38 = vadd.f32 %v1306_v51, %v1180_v12  ;;  %7648 = vst [vmem:[#allocation62_spill] sm:$0xff] %v5163_v55  ;;  %7649 = vst [vmem:[#allocation63_spill] sm:$0xff] %v5167_v2  ;;  %v1185_v49 = vmul.f32 %v5179_v13, %v5179_v13 }
  0xf1   :  { %7651 = vst [vmem:[#allocation65_spill] sm:$0xff] %v5179_v13 }
  0xf2   :  { %v1308_v36 = vadd.f32 %v1307_v38, %v1181_v26  ;;  %v5187_v26 = vsub.f32 %v5026_v46, %v4910_v44 }
  0xf4   :  { %7652 = vst [vmem:[#allocation66_spill] sm:$0xff] %v5187_v26  ;;  %v1186_v31 = vmul.f32 %v5187_v26, %v5187_v26  ;;  %v5317_v26 = vld [vmem:[#allocation5 + $0x170] sm:$0xff] }
 0x156   :  { %v3737_v15 = vpop.f32.mrb[0].mxu0 }
 0x157   :  { %v3738_v10 = vpop.f32.mrb[1].mxu0 }
 0x158   :  { %v3759_v60 = vpop.f32.mrb[0].mxu1  ;;  %v3739_v29 = vadd.f32 %v3738_v10, %v3737_v15  ;;  %v3740_v37 = vpop.f32.mrb[2].mxu0  ;;  %v1182_v15 = vmul.f32 %v5163_v55, %v5163_v55  ;;  %v5175_v10 = vsub.f32 %v5013_v16, %v4904_v30  ;;  %v5191_v30 = vsub.f32 %v5030_v56, %v4912_v45  ;;  %v4257_v16 = vld [vmem:[#allocation8 + $0x80] sm:$0xff]  ;;  %v5347_v55 = vld [vmem:[#allocation5 + $0x398] sm:$0xff] }
 0x159   :  { %v3760_v27 = vpop.f32.mrb[1].mxu1  ;;  %v3741_v40 = vpop.f32.mrb[3].mxu0  ;;  %v5196_v19 = vsub.f32 %v4941_v34, %v4257_v16  ;;  %v4258_v37 = vld [vmem:[#allocation8 + $0x88] sm:$0xff]  ;;  %v4260_v16 = vld [vmem:[#allocation5 + $0x100] sm:$0xff]  ;;  %7668 = vst [vmem:[#allocation82_spill] sm:$0xff] %v5347_v55 }
 0x15a   :  { %v3761_v62 = vadd.f32 %v3760_v27, %v3759_v60  ;;  %v3762_v25 = vpop.f32.mrb[2].mxu1  ;;  %v520_v54 = vadd.f32 %v3739_v29, %v3645_v50  ;;  %v1183_v60 = vmul.f32 %v5167_v2, %v5167_v2  ;;  %v1309_v50 = vadd.f32 %v1308_v36, %v1182_v15  ;;  %7650 = vst [vmem:[#allocation64_spill] sm:$0xff] %v5175_v10 }
 0x15b   :  { %v3763_v39 = vpop.f32.mrb[3].mxu1  ;;  %v1184_v14 = vmul.f32 %v5175_v10, %v5175_v10  ;;  %7653 = vst [vmem:[#allocation67_spill] sm:$0xff] %v5191_v30  ;;  %7654 = vst [vmem:[#allocation68_spill] sm:$0xff] %v5196_v19  ;;  %v1187_v12 = vmul.f32 %v5191_v30, %v5191_v30  ;;  %v5201_v44 = vsub.f32 %v4943_v35, %v4258_v37  ;;  %v4259_v35 = vld [vmem:[#allocation8 + $0x90] sm:$0xff]  ;;  %v5216_v37 = vld [vmem:[#allocation5 + $0x118] sm:$0xff] }
 0x15c   :  { %v560_v63 = vadd.f32 %v3761_v62, %v520_v54  ;;  %v1310_v51 = vadd.f32 %v1309_v50, %v1183_v60  ;;  %v1188_v45 = vmul.f32 %v5196_v19, %v5196_v19  ;;  %v5296_v19 = vld [vmem:[#allocation5 + $0x1e8] sm:$0xff]  ;;  %v5313_v30 = vld [vmem:[#allocation5 + $0x1f8] sm:$0xff] }
 0x15d   :  { %7655 = vst [vmem:[#allocation69_spill] sm:$0xff] %v5201_v44  ;;  %v1189_v50 = vmul.f32 %v5201_v44, %v5201_v44 }
 0x15e   :  { %v1311_v5 = vadd.f32 %v1310_v51, %v1184_v14  ;;  %v5208_v14 = vsub.f32 %v4954_v52, %v4259_v35  ;;  %v5245_v35 = vld [vmem:[#allocation5 + $0x1b8] sm:$0xff] }
 0x160   :  { %v1312_v38 = vadd.f32 %v1311_v5, %v1185_v49  ;;  %7656 = vst [vmem:[#allocation70_spill] sm:$0xff] %v5208_v14  ;;  %v5210_v5 = vld [vmem:[#allocation5 + $0x190] sm:$0xff]  ;;  %v1190_v52 = vmul.f32 %v5208_v14, %v5208_v14 }
 0x162   :  { %v1313_v29 = vadd.f32 %v1312_v38, %v1186_v31  ;;  %v5212_v38 = vld [vmem:[#allocation5 + $0x198] sm:$0xff] }
 0x164   :  { %v1314_v46 = vadd.f32 %v1313_v29, %v1187_v12  ;;  %v4261_v12 = vld [vmem:[#allocation5 + $0x108] sm:$0xff] }
 0x165   :  { %v718_v29 = vpack.c.bf16 %v4261_v12, %v4260_v16  ;;  %v5251_v16 = vld [vmem:[#allocation5 + $0x138] sm:$0xff] }
 0x166   :  { %v1315_v51 = vadd.f32 %v1314_v46, %v1188_v45 }
 0x176   :  { %v3781_v27 = vpop.f32.mrb[4].mxu0 }
 0x177   :  { %v3782_v62 = vpop.f32.mrb[5].mxu0 }
 0x178   :  { %v3803_v56 = vpop.f32.mrb[4].mxu1  ;;  %v3783_v25 = vadd.f32 %v3782_v62, %v3781_v27  ;;  %v3784_v54 = vpop.f32.mrb[6].mxu0  ;;  %v1316_v27 = vadd.f32 %v1315_v51, %v1189_v50  ;;  %v727_v62 = vpack.c.bf16 %v5212_v38, %v5210_v5  ;;  %v5243_v51 = vld [vmem:[#allocation5 + $0x1b0] sm:$0xff] }
 0x179   :  { %v3804_v40 = vpop.f32.mrb[5].mxu1  ;;  %v3785_v36 = vpop.f32.mrb[7].mxu0 }
 0x17a   :  { %v3805_v34 = vadd.f32 %v3804_v40, %v3803_v56  ;;  %v3806_v39 = vpop.f32.mrb[6].mxu1  ;;  %v600_v15 = vadd.f32 %v3783_v25, %v560_v63  ;;  %v5214_v63 = vld [vmem:[#allocation5 + $0x110] sm:$0xff]  ;;  %v4262_v56 = vld [vmem:[#allocation8 + $0x98] sm:$0xff]  ;;  %v5225_v25 = vld [vmem:[#allocation5 + $0x1a0] sm:$0xff]  ;;  %v1317_v36 = vadd.f32 %v1316_v27, %v1190_v52 }
 0x17b   :  { %v3807_v60 = vpop.f32.mrb[7].mxu1  ;;  %v5219_v45 = vsub.f32 %v4956_v53, %v4262_v56  ;;  %v5227_v40 = vld [vmem:[#allocation5 + $0x1a8] sm:$0xff]  ;;  %v719_v54 = vpack.c.bf16 %v5216_v37, %v5214_v63  ;;  %v5232_v53 = vld [vmem:[#allocation5 + $0x120] sm:$0xff]  ;;  %v729_v56 = vpack.c.bf16 %v5245_v35, %v5243_v51 }
 0x17c   :  { %v640_v49 = vadd.f32 %v3805_v34, %v600_v15  ;;  %v5234_v34 = vld [vmem:[#allocation5 + $0x128] sm:$0xff]  ;;  %v4263_v15 = vld [vmem:[#allocation8 + $0xa0] sm:$0xff]  ;;  %v728_v50 = vpack.c.bf16 %v5227_v40, %v5225_v25 }
 0x17d   :  { %7657 = vst [vmem:[#allocation71_spill] sm:$0xff] %v5219_v45  ;;  %v1191_v39 = vmul.f32 %v5219_v45, %v5219_v45  ;;  %v5239_v60 = vsub.f32 %v4960_v7, %v4263_v15  ;;  %v5260_v52 = vld [vmem:[#allocation5 + $0x1c0] sm:$0xff]  ;;  %v4265_v15 = vld [vmem:[#allocation8 + $0xb0] sm:$0xff] }
 0x17e   :  { %v645_v31 = vmax.f32 %v640_v49, 0.0  ;;  %v720_v49 = vpack.c.bf16 %v5234_v34, %v5232_v53  ;;  %v5283_v45 = vld [vmem:[#allocation5 + $0x150] sm:$0xff] }
 0x17f   :  { %7658 = vst [vmem:[#allocation72_spill] sm:$0xff] %v5239_v60  ;;  %v1318_v12 = vadd.f32 %v1317_v36, %v1191_v39  ;;  %v1192_v27 = vmul.f32 %v5239_v60, %v5239_v60  ;;  %v5268_v39 = vld [vmem:[#allocation5 + $0x148] sm:$0xff]  ;;  %v5279_v60 = vld [vmem:[#allocation5 + $0x1d8] sm:$0xff] }
 0x180   :  { %v646_v46 = vpack.c.bf16 %v645_v31, %v645_v31  ;;  %v5249_v31 = vld [vmem:[#allocation5 + $0x130] sm:$0xff] }
 0x181   :  { %v1319_v36 = vadd.f32 %v1318_v12, %v1192_v27  ;;  %v4266_v27 = vld [vmem:[#allocation8 + $0xb8] sm:$0xff] }
 0x182   :  { %4015 = vmatmul.mubr.bf16.vlgmr.msra.gmra.mrb[8].mxu0 %v646_v46  ;;  %v5262_v46 = vld [vmem:[#allocation5 + $0x1c8] sm:$0xff] }
 0x183   :  { %3841 = vmatpush3.bf16.msra.mxu0 %v718_v29  ;;  %845 = vmatprep.mubr.bf16.mxu0 %v4918_v58  ;;  %v4264_v29 = vld [vmem:[#allocation8 + $0xa8] sm:$0xff]  ;;  %v5383_v58 = vld [vmem:[#allocation5 + $0x3b8] sm:$0xff] }
 0x184   :  { %3842 = vmatprep.subr.bf16.mxu0 %v727_v62  ;;  %v5254_v7 = vsub.f32 %v4966_v59, %v4264_v29  ;;  %v721_v62 = vpack.c.bf16 %v5251_v16, %v5249_v31  ;;  %v730_v29 = vpack.c.bf16 %v5262_v46, %v5260_v52  ;;  %7674 = vst [vmem:[#allocation88_spill] sm:$0xff] %v5383_v58 }
 0x186   :  { %7659 = vst [vmem:[#allocation73_spill] sm:$0xff] %v5254_v7  ;;  %v1193_v59 = vmul.f32 %v5254_v7, %v5254_v7  ;;  %v5285_v7 = vld [vmem:[#allocation5 + $0x158] sm:$0xff] }
 0x187   :  { %3843 = vmatpush3.bf16.msra.mxu0 %v719_v54  ;;  %v5266_v54 = vld [vmem:[#allocation5 + $0x140] sm:$0xff]  ;;  %v723_v14 = vpack.c.bf16 %v5285_v7, %v5283_v45 }
 0x188   :  { %3844 = vmatprep.subr.bf16.mxu0 %v728_v50  ;;  %v5273_v50 = vsub.f32 %v4973_v8, %v4265_v15  ;;  %v722_v44 = vpack.c.bf16 %v5268_v39, %v5266_v54  ;;  %v1320_v12 = vadd.f32 %v1319_v36, %v1193_v59  ;;  %v5288_v8 = vsub.f32 %v4975_v9, %v4266_v27  ;;  %v5300_v59 = vld [vmem:[#allocation5 + $0x160] sm:$0xff]  ;;  %v5302_v36 = vld [vmem:[#allocation5 + $0x168] sm:$0xff] }
 0x189   :  { %v724_v10 = vpack.c.bf16 %v5302_v36, %v5300_v59 }
 0x18a   :  { %7660 = vst [vmem:[#allocation74_spill] sm:$0xff] %v5273_v50  ;;  %7661 = vst [vmem:[#allocation75_spill] sm:$0xff] %v5288_v8  ;;  %v1195_v9 = vmul.f32 %v5288_v8, %v5288_v8  ;;  %v5319_v8 = vld [vmem:[#allocation5 + $0x178] sm:$0xff] }
 0x18b   :  { %3845 = vmatpush3.bf16.msra.mxu0 %v720_v49  ;;  %v5277_v49 = vld [vmem:[#allocation5 + $0x1d0] sm:$0xff]  ;;  %v725_v2 = vpack.c.bf16 %v5319_v8, %v5317_v26 }
 0x18c   :  { %3846 = vmatprep.subr.bf16.mxu0 %v729_v56  ;;  %v1194_v56 = vmul.f32 %v5273_v50, %v5273_v50  ;;  %v731_v15 = vpack.c.bf16 %v5279_v60, %v5277_v49 }
 0x18e   :  { %v1321_v27 = vadd.f32 %v1320_v12, %v1194_v56  ;;  %v4268_v56 = vld [vmem:[#allocation8 + $0xc8] sm:$0xff] }
 0x18f   :  { %3847 = vmatpush3.bf16.msra.mxu0 %v721_v62  ;;  %v5294_v62 = vld [vmem:[#allocation5 + $0x1e0] sm:$0xff] }
 0x190   :  { %3848 = vmatprep.subr.bf16.mxu0 %v730_v29  ;;  %v4267_v29 = vld [vmem:[#allocation8 + $0xc0] sm:$0xff]  ;;  %v732_v13 = vpack.c.bf16 %v5296_v19, %v5294_v62  ;;  %v1322_v12 = vadd.f32 %v1321_v27, %v1195_v9  ;;  %v4269_v27 = vld [vmem:[#allocation8 + $0xd0] sm:$0xff] }
 0x191   :  { %v5307_v50 = vsub.f32 %v4986_v23, %v4267_v29  ;;  %v5322_v23 = vsub.f32 %v4988_v24, %v4268_v56  ;;  %v5337_v56 = vsub.f32 %v5007_v4, %v4269_v27 }
 0x193   :  { %3849 = vmatpush3.bf16.msra.mxu0 %v722_v44  ;;  %7662 = vst [vmem:[#allocation76_spill] sm:$0xff] %v5307_v50  ;;  %v5311_v44 = vld [vmem:[#allocation5 + $0x1f0] sm:$0xff]  ;;  %7663 = vst [vmem:[#allocation77_spill] sm:$0xff] %v5322_v23  ;;  %v1197_v9 = vmul.f32 %v5322_v23, %v5322_v23  ;;  %v4270_v23 = vld [vmem:[#allocation8 + $0xd8] sm:$0xff] }
 0x194   :  { %3850 = vmatprep.subr.bf16.mxu0 %v731_v15  ;;  %v1196_v15 = vmul.f32 %v5307_v50, %v5307_v50  ;;  %v733_v29 = vpack.c.bf16 %v5313_v30, %v5311_v44  ;;  %7666 = vst [vmem:[#allocation80_spill] sm:$0xff] %v5337_v56  ;;  %v5341_v50 = vld [vmem:[#allocation5 + $0x300] sm:$0xff]  ;;  %v5352_v4 = vsub.f32 %v5009_v6, %v4270_v23 }
 0x195   :  { %v751_v6 = vpack.c.bf16 %v5360_v20, %v5358_v43 }
 0x196   :  { %v1323_v24 = vadd.f32 %v1322_v12, %v1196_v15  ;;  %v750_v12 = vpack.c.bf16 %v5343_v3, %v5341_v50  ;;  %7669 = vst [vmem:[#allocation83_spill] sm:$0xff] %v5352_v4  ;;  %v1199_v23 = vmul.f32 %v5352_v4, %v5352_v4  ;;  %v4272_v4 = vld [vmem:[#allocation8 + $0xe8] sm:$0xff] }
 0x197   :  { %3851 = vmatpush3.bf16.msra.mxu0 %v723_v14  ;;  %v5328_v14 = vld [vmem:[#allocation5 + $0x380] sm:$0xff] }
 0x198   :  { %3852 = vmatprep.subr.bf16.mxu0 %v732_v13  ;;  %7664 = vst [vmem:[#allocation78_spill] sm:$0xff] %v5328_v14  ;;  %v758_v13 = vpack.c.bf16 %v5330_v17, %v5328_v14  ;;  %v1324_v15 = vadd.f32 %v1323_v24, %v1197_v9  ;;  %v4271_v24 = vld [vmem:[#allocation8 + $0xe0] sm:$0xff]  ;;  %v5434_v17 = vld [vmem:[#allocation5 + $0x3e8] sm:$0xff] }
 0x199   :  { %7684 = vst [vmem:[#allocation96_spill] sm:$0xff] %v5434_v17 }
 0x19b   :  { %3853 = vmatpush3.bf16.msra.mxu0 %v724_v10  ;;  %v5345_v10 = vld [vmem:[#allocation5 + $0x390] sm:$0xff] }
 0x19c   :  { %3854 = vmatprep.subr.bf16.mxu0 %v733_v29  ;;  %7667 = vst [vmem:[#allocation81_spill] sm:$0xff] %v5345_v10  ;;  %v1198_v29 = vmul.f32 %v5337_v56, %v5337_v56  ;;  %v759_v27 = vpack.c.bf16 %v5347_v55, %v5345_v10  ;;  %v5417_v55 = vld [vmem:[#allocation5 + $0x3d8] sm:$0xff] }
 0x19d   :  { %7680 = vst [vmem:[#allocation94_spill] sm:$0xff] %v5417_v55  ;;  %v5430_v10 = vld [vmem:[#allocation5 + $0x358] sm:$0xff] }
 0x19e   :  { %v1325_v9 = vadd.f32 %v1324_v15, %v1198_v29 }
 0x19f   :  { %3855 = vmatpush3.bf16.msra.mxu0 %v725_v2  ;;  %v5362_v2 = vld [vmem:[#allocation5 + $0x3a0] sm:$0xff] }
 0x1a0   :  { %3884 = vmatprep.subr.bf16.mxu0 %v758_v13  ;;  %7670 = vst [vmem:[#allocation84_spill] sm:$0xff] %v5362_v2  ;;  %v5373_v13 = vsub.f32 %v5020_v41, %v4271_v24  ;;  %v760_v56 = vpack.c.bf16 %v5364_v22, %v5362_v2  ;;  %v1326_v29 = vadd.f32 %v1325_v9, %v1199_v23  ;;  %v5396_v22 = vld [vmem:[#allocation5 + $0x338] sm:$0xff]  ;;  %v5400_v2 = vld [vmem:[#allocation5 + $0x3c8] sm:$0xff] }
 0x1a1   :  { %v5388_v41 = vsub.f32 %v5022_v42, %v4272_v4  ;;  %v761_v24 = vpack.c.bf16 %v5383_v58, %v5381_v47  ;;  %7677 = vst [vmem:[#allocation91_spill] sm:$0xff] %v5400_v2  ;;  %v5411_v58 = vld [vmem:[#allocation5 + $0x340] sm:$0xff]  ;;  %v5413_v47 = vld [vmem:[#allocation5 + $0x348] sm:$0xff] }
 0x1a2   :  { %846 = vmatmul.mubr.bf16.vlgmr.msra.gmra.mrb[12].mxu0 %v4923_v1  ;;  %7672 = vst [vmem:[#allocation86_spill] sm:$0xff] %v5373_v13 }
 0x1a3   :  { %3885 = vmatpush3.bf16.msra.mxu0 %v750_v12  ;;  %925 = vmatprep.mubr.bf16.mxu0 %v4930_v61  ;;  %v5379_v12 = vld [vmem:[#allocation5 + $0x328] sm:$0xff]  ;;  %7675 = vst [vmem:[#allocation89_spill] sm:$0xff] %v5388_v41  ;;  %v5394_v61 = vld [vmem:[#allocation5 + $0x330] sm:$0xff]  ;;  %v1201_v4 = vmul.f32 %v5388_v41, %v5388_v41  ;;  %v4274_v41 = vld [vmem:[#allocation8 + $0xf8] sm:$0xff] }
 0x1a4   :  { %3886 = vmatprep.subr.bf16.mxu0 %v759_v27  ;;  %v752_v15 = vpack.c.bf16 %v5379_v12, %v5377_v11  ;;  %v1200_v27 = vmul.f32 %v5373_v13, %v5373_v13  ;;  %v753_v42 = vpack.c.bf16 %v5396_v22, %v5394_v61 }
 0x1a6   :  { %v1327_v23 = vadd.f32 %v1326_v29, %v1200_v27  ;;  %v754_v29 = vpack.c.bf16 %v5413_v47, %v5411_v58 }
 0x1a7   :  { %3887 = vmatpush3.bf16.msra.mxu0 %v751_v6  ;;  %v5398_v6 = vld [vmem:[#allocation5 + $0x3c0] sm:$0xff] }
 0x1a8   :  { %3888 = vmatprep.subr.bf16.mxu0 %v760_v56  ;;  %7676 = vst [vmem:[#allocation90_spill] sm:$0xff] %v5398_v6  ;;  %v4273_v56 = vld [vmem:[#allocation8 + $0xf0] sm:$0xff]  ;;  %v762_v13 = vpack.c.bf16 %v5400_v2, %v5398_v6  ;;  %v1328_v27 = vadd.f32 %v1327_v23, %v1201_v4 }
 0x1a9   :  { %v5407_v9 = vsub.f32 %v5033_v18, %v4273_v56  ;;  %v7681_v18 = vld [vmem:[#allocation39_spill] sm:$0xff] }
 0x1aa   :  { %v5422_v56 = vsub.f32 %v7681_v18, %v4274_v41  ;;  %v5428_v6 = vld [vmem:[#allocation5 + $0x350] sm:$0xff]  ;;  %v5442_v18 = vld [vmem:[#allocation5 + $0x360] sm:$0xff] }
 0x1ab   :  { %3889 = vmatpush3.bf16.msra.mxu0 %v752_v15  ;;  %7678 = vst [vmem:[#allocation92_spill] sm:$0xff] %v5407_v9  ;;  %v5415_v15 = vld [vmem:[#allocation5 + $0x3d0] sm:$0xff]  ;;  %v755_v41 = vpack.c.bf16 %v5430_v10, %v5428_v6  ;;  %7685 = vst [vmem:[#allocation97_spill] sm:$0xff] %v5442_v18 }
 0x1ac   :  { %3890 = vmatprep.subr.bf16.mxu0 %v761_v24  ;;  %7679 = vst [vmem:[#allocation93_spill] sm:$0xff] %v5415_v15  ;;  %7682 = vst [vmem:[#allocation39_spill] sm:$0xff] %v5422_v56  ;;  %v1202_v24 = vmul.f32 %v5407_v9, %v5407_v9  ;;  %v763_v2 = vpack.c.bf16 %v5417_v55, %v5415_v15  ;;  %v1203_v4 = vmul.f32 %v5422_v56, %v5422_v56  ;;  %v5444_v9 = vld [vmem:[#allocation5 + $0x368] sm:$0xff]  ;;  %v5446_v55 = vld [vmem:[#allocation5 + $0x3f0] sm:$0xff] }
 0x1ad   :  { %7686 = vst [vmem:[#allocation98_spill] sm:$0xff] %v5444_v9  ;;  %7687 = vst [vmem:[#allocation99_spill] sm:$0xff] %v5446_v55  ;;  %v5448_v15 = vld [vmem:[#allocation5 + $0x3f8] sm:$0xff]  ;;  %v1204_v56 = vmul.f32 %v7689_v32, %v7689_v32 }
 0x1ae   :  { %v1329_v23 = vadd.f32 %v1328_v27, %v1202_v24  ;;  %7688 = vst [vmem:[#allocation100_spill] sm:$0xff] %v5448_v15  ;;  %v5456_v24 = vld [vmem:[#allocation5 + $0x370] sm:$0xff] }
 0x1af   :  { %3891 = vmatpush3.bf16.msra.mxu0 %v753_v42  ;;  %v5432_v42 = vld [vmem:[#allocation5 + $0x3e0] sm:$0xff] }
 0x1b0   :  { %3892 = vmatprep.subr.bf16.mxu0 %v762_v13  ;;  %7683 = vst [vmem:[#allocation95_spill] sm:$0xff] %v5432_v42  ;;  %v764_v13 = vpack.c.bf16 %v5434_v17, %v5432_v42  ;;  %v1330_v27 = vadd.f32 %v1329_v23, %v1203_v4  ;;  %v5458_v17 = vld [vmem:[#allocation5 + $0x378] sm:$0xff] }
 0x1b1   :  { %v757_v42 = vpack.c.bf16 %v5458_v17, %v5456_v24  ;;  %v4276_v23 = vld [vmem:[#allocation8 + $0x118] sm:$0xff] }
 0x1b2   :  { %v1331_v4 = vadd.f32 %v1330_v27, %v1204_v56  ;;  %v4278_v56 = vld [vmem:[#allocation8 + $0x128] sm:$0xff] }
 0x1b3   :  { %3893 = vmatpush3.bf16.msra.mxu0 %v754_v29  ;;  %v756_v29 = vpack.c.bf16 %v5444_v9, %v5442_v18  ;;  %v4275_v9 = vld [vmem:[#allocation8 + $0x110] sm:$0xff] }
 0x1b4   :  { %3894 = vmatprep.subr.bf16.mxu0 %v763_v2  ;;  %v765_v2 = vpack.c.bf16 %v5448_v15, %v5446_v55  ;;  %v5465_v18 = vsub.f32 %v5214_v63, %v4275_v9  ;;  %v7693_v15 = vld [vmem:[#allocation38_spill] sm:$0xff] }
 0x1b5   :  { %v4277_v55 = vld [vmem:[#allocation8 + $0x120] sm:$0xff] }
 0x1b6   :  { %7691 = vst [vmem:[#allocation101_spill] sm:$0xff] %v5465_v18  ;;  %v5476_v63 = vsub.f32 %v5232_v53, %v4277_v55 }
 0x1b7   :  { %3895 = vmatpush3.bf16.msra.mxu0 %v755_v41  ;;  %v7690_v41 = vld [vmem:[#allocation31_spill] sm:$0xff] }
 0x1b8   :  { %3896 = vmatprep.subr.bf16.mxu0 %v764_v13  ;;  %v1205_v14 = vmul.f32 %v7690_v41, %v7690_v41  ;;  %v5468_v13 = vsub.f32 %v5216_v37, %v4276_v23  ;;  %7694 = vst [vmem:[#allocation38_spill] sm:$0xff] %v5476_v63  ;;  %v1208_v37 = vmul.f32 %v5476_v63, %v5476_v63 }
 0x1ba   :  { %7692 = vst [vmem:[#allocation102_spill] sm:$0xff] %v5468_v13  ;;  %v1332_v32 = vadd.f32 %v1331_v4, %v1205_v14  ;;  %v1207_v41 = vmul.f32 %v5468_v13, %v5468_v13  ;;  %v4280_v13 = vld [vmem:[#allocation8 + $0x138] sm:$0xff] }
 0x1bb   :  { %3897 = vmatpush3.bf16.msra.mxu0 %v756_v29  ;;  %v1206_v29 = vmul.f32 %v5465_v18, %v5465_v18  ;;  %v5489_v55 = vsub.f32 %v5251_v16, %v4280_v13 }
 0x1bc   :  { %3898 = vmatprep.subr.bf16.mxu0 %v765_v2  ;;  %v4279_v2 = vld [vmem:[#allocation8 + $0x130] sm:$0xff] }
 0x1bd   :  { %v1333_v9 = vadd.f32 %v1332_v32, %v1206_v29  ;;  %v5486_v4 = vsub.f32 %v5249_v31, %v4279_v2  ;;  %7697 = vst [vmem:[#allocation105_spill] sm:$0xff] %v5489_v55 }
 0x1bf   :  { %3899 = vmatpush3.bf16.msra.mxu0 %v757_v42  ;;  %v5479_v42 = vsub.f32 %v5234_v34, %v4278_v56  ;;  %v1334_v27 = vadd.f32 %v1333_v9, %v1207_v41  ;;  %7696 = vst [vmem:[#allocation104_spill] sm:$0xff] %v5486_v4  ;;  %v1210_v32 = vmul.f32 %v5486_v4, %v5486_v4  ;;  %v4281_v41 = vld [vmem:[#allocation8 + $0x140] sm:$0xff]  ;;  %v4282_v56 = vld [vmem:[#allocation8 + $0x148] sm:$0xff] }
 0x1c0   :  { %v1211_v34 = vmul.f32 %v5489_v55, %v5489_v55  ;;  %v5496_v29 = vsub.f32 %v5266_v54, %v4281_v41  ;;  %v5499_v31 = vsub.f32 %v5268_v39, %v4282_v56  ;;  %v4283_v54 = vld [vmem:[#allocation8 + $0x150] sm:$0xff]  ;;  %v4284_v39 = vld [vmem:[#allocation8 + $0x158] sm:$0xff] }
 0x1c1   :  { %7695 = vst [vmem:[#allocation103_spill] sm:$0xff] %v5479_v42  ;;  %v1209_v14 = vmul.f32 %v5479_v42, %v5479_v42  ;;  %v1335_v23 = vadd.f32 %v1334_v27, %v1208_v37  ;;  %v3834_v37 = vpop.f32.mrb[8].mxu1  ;;  %v5511_v41 = vsub.f32 %v5285_v7, %v4284_v39  ;;  %v4288_v39 = vld [vmem:[#allocation8 + $0x178] sm:$0xff] }
 0x1c2   :  { %926 = vmatmul.mubr.bf16.vlgmr.msra.gmra.mrb[16].mxu0 %v7693_v15  ;;  %7698 = vst [vmem:[#allocation106_spill] sm:$0xff] %v5496_v29  ;;  %7699 = vst [vmem:[#allocation107_spill] sm:$0xff] %v5499_v31  ;;  %v1212_v16 = vmul.f32 %v5496_v29, %v5496_v29  ;;  %v3835_v27 = vpop.f32.mrb[9].mxu1  ;;  %v1213_v42 = vmul.f32 %v5499_v31, %v5499_v31  ;;  %v5602_v31 = vld [vmem:[#allocation7 + $0x48] sm:$0xff]  ;;  %v4296_v55 = vld [vmem:[#allocation8 + $0x1b8] sm:$0xff] }
 0x1c3   :  { %v1336_v53 = vadd.f32 %v1335_v23, %v1209_v14  ;;  %v5503_v2 = vadd.f32 %v3835_v27, %v3834_v37  ;;  %v3837_v14 = vpop.f32.mrb[10].mxu1  ;;  %7701 = vst [vmem:[#allocation109_spill] sm:$0xff] %v5511_v41  ;;  %v1215_v56 = vmul.f32 %v5511_v41, %v5511_v41  ;;  %v4285_v37 = vld [vmem:[#allocation8 + $0x160] sm:$0xff]  ;;  %v4294_v29 = vld [vmem:[#allocation8 + $0x1a8] sm:$0xff]  ;;  %v5631_v63 = vsub.f32 %v5245_v35, %v4296_v55 }
 0x1c4   :  { %v3838_v23 = vpop.f32.mrb[11].mxu1  ;;  %v5518_v27 = vsub.f32 %v5300_v59, %v4285_v37  ;;  %v5531_v59 = vsub.f32 %v5319_v8, %v4288_v39  ;;  %v7706_v37 = vld [vmem:[#allocation40_spill] sm:$0xff]  ;;  %v5547_v39 = vld [vmem:[#allocation7 + $0x8] sm:$0xff] }
 0x1c5   :  { %v1337_v9 = vadd.f32 %v1336_v53, %v1210_v32  ;;  %v5508_v32 = vsub.f32 %v5283_v45, %v4283_v54  ;;  %v4286_v23 = vld [vmem:[#allocation8 + $0x168] sm:$0xff]  ;;  %7715 = vst [vmem:[#allocation119_spill] sm:$0xff] %v5631_v63 }
 0x1c6   :  { %7702 = vst [vmem:[#allocation110_spill] sm:$0xff] %v5518_v27  ;;  %v5521_v45 = vsub.f32 %v5302_v36, %v4286_v23  ;;  %v1216_v7 = vmul.f32 %v5518_v27, %v5518_v27  ;;  %7705 = vst [vmem:[#allocation113_spill] sm:$0xff] %v5531_v59 }
 0x1c7   :  { %v1338_v13 = vadd.f32 %v1337_v9, %v1211_v34  ;;  %7700 = vst [vmem:[#allocation108_spill] sm:$0xff] %v5508_v32  ;;  %v1214_v34 = vmul.f32 %v5508_v32, %v5508_v32 }
 0x1c8   :  { %7703 = vst [vmem:[#allocation111_spill] sm:$0xff] %v5521_v45 }
 0x1c9   :  { %v1339_v53 = vadd.f32 %v1338_v13, %v1212_v16  ;;  %v1217_v13 = vmul.f32 %v5521_v45, %v5521_v45  ;;  %v4290_v45 = vld [vmem:[#allocation8 + $0x188] sm:$0xff] }
 0x1cb   :  { %v1340_v9 = vadd.f32 %v1339_v53, %v1213_v42  ;;  %v4287_v42 = vld [vmem:[#allocation8 + $0x170] sm:$0xff] }
 0x1cc   :  { %v5528_v54 = vsub.f32 %v5317_v26, %v4287_v42  ;;  %v7708_v26 = vld [vmem:[#allocation41_spill] sm:$0xff] }
 0x1cd   :  { %v1341_v14 = vadd.f32 %v1340_v9, %v1214_v34  ;;  %v4289_v9 = vld [vmem:[#allocation8 + $0x180] sm:$0xff]  ;;  %v5541_v42 = vsub.f32 %v7708_v26, %v4290_v45  ;;  %v3878_v45 = vpop.f32.mrb[12].mxu1 }
 0x1ce   :  { %7704 = vst [vmem:[#allocation112_spill] sm:$0xff] %v5528_v54  ;;  %v1218_v36 = vmul.f32 %v5528_v54, %v5528_v54  ;;  %v5536_v23 = vsub.f32 %v7706_v37, %v4289_v9  ;;  %v4291_v37 = vld [vmem:[#allocation8 + $0x190] sm:$0xff]  ;;  %v5587_v54 = vld [vmem:[#allocation7 + $0x38] sm:$0xff] }
 0x1cf   :  { %v1342_v16 = vadd.f32 %v1341_v14, %v1215_v56  ;;  %v1219_v56 = vmul.f32 %v5531_v59, %v5531_v59  ;;  %7709 = vst [vmem:[#allocation41_spill] sm:$0xff] %v5541_v42  ;;  %v4292_v59 = vld [vmem:[#allocation8 + $0x198] sm:$0xff] }
 0x1d0   :  { %7707 = vst [vmem:[#allocation40_spill] sm:$0xff] %v5536_v23  ;;  %v1220_v8 = vmul.f32 %v5536_v23, %v5536_v23  ;;  %v5575_v27 = vsub.f32 %v5212_v38, %v4292_v59  ;;  %v4293_v59 = vld [vmem:[#allocation8 + $0x1a0] sm:$0xff] }
 0x1d1   :  { %v1343_v53 = vadd.f32 %v1342_v16, %v1216_v7  ;;  %v5545_v16 = vld [vmem:[#allocation7] sm:$0xff] }
 0x1d2   :  { %7711 = vst [vmem:[#allocation115_spill] sm:$0xff] %v5575_v27 }
 0x1d3   :  { %v1344_v34 = vadd.f32 %v1343_v53, %v1217_v13  ;;  %v5549_v13 = vld [vmem:[#allocation7 + $0x10] sm:$0xff]  ;;  %v1221_v53 = vmul.f32 %v5541_v42, %v5541_v42 }
 0x1d5   :  { %v1345_v14 = vadd.f32 %v1344_v34, %v1218_v36  ;;  %v5554_v36 = vsub.f32 %v5210_v5, %v4291_v37  ;;  %v5558_v34 = vpack.c.bf16 %v5547_v39, %v5545_v16  ;;  %v5570_v5 = vld [vmem:[#allocation7 + $0x20] sm:$0xff] }
 0x1d7   :  { %v1346_v7 = vadd.f32 %v1345_v14, %v1219_v56  ;;  %7710 = vst [vmem:[#allocation114_spill] sm:$0xff] %v5554_v36  ;;  %v5560_v56 = vld [vmem:[#allocation7 + $0x18] sm:$0xff]  ;;  %v3879_v14 = vpop.f32.mrb[13].mxu1  ;;  %4019 = vmatpush3.bf16.msra.mxu1 %v5558_v34 }
 0x1d8   :  { %v5562_v26 = vadd.f32 %v3879_v14, %v3878_v45  ;;  %v5567_v42 = vpack.c.bf16 %v5560_v56, %v5549_v13  ;;  %4020 = vmatprep.subr.bf16.mxu1 %v7639_v33  ;;  %v1222_v45 = vmul.f32 %v5554_v36, %v5554_v36  ;;  %v5600_v36 = vld [vmem:[#allocation7 + $0x40] sm:$0xff] }
 0x1d9   :  { %v1347_v9 = vadd.f32 %v1346_v7, %v1220_v8  ;;  %v3881_v8 = vpop.f32.mrb[14].mxu1  ;;  %v5572_v7 = vld [vmem:[#allocation7 + $0x28] sm:$0xff] }
 0x1da   :  { %v3882_v37 = vpop.f32.mrb[15].mxu1  ;;  %v5582_v14 = vpack.c.bf16 %v5572_v7, %v5570_v5  ;;  %v5585_v8 = vld [vmem:[#allocation7 + $0x30] sm:$0xff] }
 0x1db   :  { %v1348_v23 = vadd.f32 %v1347_v9, %v1221_v53  ;;  %4021 = vmatpush3.bf16.msra.mxu1 %v5567_v42  ;;  %v1223_v53 = vmul.f32 %v5575_v27, %v5575_v27  ;;  %v5592_v9 = vsub.f32 %v5225_v25, %v4293_v59  ;;  %v5597_v37 = vpack.c.bf16 %v5587_v54, %v5585_v8  ;;  %v5615_v59 = vld [vmem:[#allocation7 + $0x50] sm:$0xff]  ;;  %v5617_v27 = vld [vmem:[#allocation7 + $0x58] sm:$0xff] }
 0x1dc   :  { %4022 = vmatprep.subr.bf16.mxu1 %v7639_v33 }
 0x1dd   :  { %v1349_v38 = vadd.f32 %v1348_v23, %v1222_v45  ;;  %7712 = vst [vmem:[#allocation116_spill] sm:$0xff] %v5592_v9  ;;  %v5605_v23 = vsub.f32 %v5227_v40, %v4294_v29  ;;  %v1224_v25 = vmul.f32 %v5592_v9, %v5592_v9  ;;  %v5612_v45 = vpack.c.bf16 %v5602_v31, %v5600_v36  ;;  %v4295_v29 = vld [vmem:[#allocation8 + $0x1b0] sm:$0xff] }
 0x1de   :  { %v5627_v9 = vpack.c.bf16 %v5617_v27, %v5615_v59 }
 0x1df   :  { %4023 = vmatpush3.bf16.msra.mxu1 %v5582_v14  ;;  %v1350_v41 = vadd.f32 %v1349_v38, %v1223_v53  ;;  %7713 = vst [vmem:[#allocation117_spill] sm:$0xff] %v5605_v23  ;;  %v1225_v53 = vmul.f32 %v5605_v23, %v5605_v23  ;;  %v5622_v38 = vsub.f32 %v5243_v51, %v4295_v29  ;;  %v4297_v29 = vld [vmem:[#allocation8 + $0x1c0] sm:$0xff] }
 0x1e0   :  { %4024 = vmatprep.subr.bf16.mxu1 %v7639_v33  ;;  %v1227_v51 = vmul.f32 %v5631_v63, %v5631_v63  ;;  %v5640_v23 = vsub.f32 %v5260_v52, %v4297_v29  ;;  %v5657_v52 = vld [vmem:[#allocation7 + $0x70] sm:$0xff]  ;;  %v4300_v63 = vld [vmem:[#allocation8 + $0x1d8] sm:$0xff] }
 0x1e1   :  { %v1351_v40 = vadd.f32 %v1350_v41, %v1224_v25  ;;  %7714 = vst [vmem:[#allocation118_spill] sm:$0xff] %v5622_v38  ;;  %v1226_v41 = vmul.f32 %v5622_v38, %v5622_v38  ;;  %v4298_v38 = vld [vmem:[#allocation8 + $0x1c8] sm:$0xff]  ;;  %7719 = vst [vmem:[#allocation123_spill] sm:$0xff] %v5657_v52  ;;  %v5673_v18 = vsub.f32 %v5279_v60, %v4300_v63 }
 0x1e2   :  { %7716 = vst [vmem:[#allocation120_spill] sm:$0xff] %v5640_v23  ;;  %v5651_v4 = vsub.f32 %v5262_v46, %v4298_v38  ;;  %v4299_v38 = vld [vmem:[#allocation8 + $0x1d0] sm:$0xff] }
 0x1e3   :  { %4025 = vmatpush3.bf16.msra.mxu1 %v5597_v37  ;;  %v1352_v32 = vadd.f32 %v1351_v40, %v1225_v53  ;;  %v5642_v53 = vld [vmem:[#allocation7 + $0x60] sm:$0xff]  ;;  %v5644_v40 = vld [vmem:[#allocation7 + $0x68] sm:$0xff]  ;;  %7722 = vst [vmem:[#allocation126_spill] sm:$0xff] %v5673_v18 }
 0x1e4   :  { %4026 = vmatprep.subr.bf16.mxu1 %v7639_v33  ;;  %7717 = vst [vmem:[#allocation121_spill] sm:$0xff] %v5644_v40  ;;  %v5648_v35 = vpack.c.bf16 %v5644_v40, %v5642_v53  ;;  %7718 = vst [vmem:[#allocation122_spill] sm:$0xff] %v5651_v4 }
 0x1e5   :  { %v1353_v25 = vadd.f32 %v1352_v32, %v1226_v41  ;;  %v1228_v32 = vmul.f32 %v5640_v23, %v5640_v23  ;;  %v5659_v41 = vld [vmem:[#allocation7 + $0x78] sm:$0xff] }
 0x1e6   :  { %7720 = vst [vmem:[#allocation124_spill] sm:$0xff] %v5659_v41  ;;  %v5663_v29 = vpack.c.bf16 %v5659_v41, %v5657_v52  ;;  %v4302_v52 = vld [vmem:[#allocation8 + $0x1e8] sm:$0xff] }
 0x1e7   :  { %4027 = vmatpush3.bf16.msra.mxu1 %v5612_v45  ;;  %v1354_v55 = vadd.f32 %v1353_v25, %v1227_v51  ;;  %v1229_v51 = vmul.f32 %v5651_v4, %v5651_v4  ;;  %v5668_v25 = vsub.f32 %v5277_v49, %v4299_v38  ;;  %v1231_v4 = vmul.f32 %v5673_v18, %v5673_v18 }
 0x1e8   :  { %4028 = vmatprep.subr.bf16.mxu1 %v7639_v33  ;;  %v5683_v40 = vsub.f32 %v5296_v19, %v4302_v52  ;;  %v7727_v52 = vld [vmem:[#allocation42_spill] sm:$0xff] }
 0x1e9   :  { %v1355_v46 = vadd.f32 %v1354_v55, %v1228_v32  ;;  %7721 = vst [vmem:[#allocation125_spill] sm:$0xff] %v5668_v25  ;;  %v1230_v41 = vmul.f32 %v5668_v25, %v5668_v25  ;;  %v4301_v32 = vld [vmem:[#allocation8 + $0x1e0] sm:$0xff]  ;;  %v4318_v25 = vld [vmem:[#allocation8 + $0x268] sm:$0xff] }
 0x1ea   :  { %v5680_v49 = vsub.f32 %v5294_v62, %v4301_v32  ;;  %7724 = vst [vmem:[#allocation128_spill] sm:$0xff] %v5683_v40  ;;  %v1233_v63 = vmul.f32 %v5683_v40, %v5683_v40  ;;  %v7729_v40 = vld [vmem:[#allocation43_spill] sm:$0xff] }
 0x1eb   :  { %4029 = vmatpush3.bf16.msra.mxu1 %v5627_v9  ;;  %v1356_v23 = vadd.f32 %v1355_v46, %v1229_v51  ;;  %v4303_v46 = vld [vmem:[#allocation8 + $0x1f0] sm:$0xff] }
 0x1ec   :  { %4030 = vmatprep.subr.bf16.mxu1 %v7639_v33  ;;  %7723 = vst [vmem:[#allocation127_spill] sm:$0xff] %v5680_v49  ;;  %v1232_v60 = vmul.f32 %v5680_v49, %v5680_v49  ;;  %v5690_v18 = vsub.f32 %v5311_v44, %v4303_v46  ;;  %v4307_v46 = vld [vmem:[#allocation8 + $0x210] sm:$0xff] }
 0x1ed   :  { %v1357_v55 = vadd.f32 %v1356_v23, %v1230_v41  ;;  %v4304_v41 = vld [vmem:[#allocation8 + $0x1f8] sm:$0xff] }
 0x1ee   :  { %7725 = vst [vmem:[#allocation129_spill] sm:$0xff] %v5690_v18  ;;  %v5693_v62 = vsub.f32 %v5313_v30, %v4304_v41  ;;  %v1234_v19 = vmul.f32 %v5690_v18, %v5690_v18  ;;  %v7731_v41 = vld [vmem:[#allocation44_spill] sm:$0xff]  ;;  %v7733_v18 = vld [vmem:[#allocation45_spill] sm:$0xff] }
 0x1ef   :  { %4031 = vmatpush3.bf16.msra.mxu1 %v5648_v35  ;;  %v1358_v38 = vadd.f32 %v1357_v55, %v1231_v4  ;;  %v4305_v4 = vld [vmem:[#allocation8 + $0x200] sm:$0xff]  ;;  %v5710_v49 = vsub.f32 %v7731_v41, %v4307_v46  ;;  %v7737_v46 = vld [vmem:[#allocation47_spill] sm:$0xff] }
 0x1f0   :  { %4032 = vmatprep.subr.bf16.mxu1 %v7639_v33  ;;  %7726 = vst [vmem:[#allocation130_spill] sm:$0xff] %v5693_v62  ;;  %v5698_v55 = vsub.f32 %v7727_v52, %v4305_v4  ;;  %v1235_v32 = vmul.f32 %v5693_v62, %v5693_v62  ;;  %v4308_v52 = vld [vmem:[#allocation8 + $0x218] sm:$0xff] }
 0x1f1   :  { %v1359_v51 = vadd.f32 %v1358_v38, %v1232_v60  ;;  %v4306_v60 = vld [vmem:[#allocation8 + $0x208] sm:$0xff]  ;;  %7732 = vst [vmem:[#allocation44_spill] sm:$0xff] %v5710_v49  ;;  %v5713_v62 = vsub.f32 %v7733_v18, %v4308_v52 }
 0x1f2   :  { %7728 = vst [vmem:[#allocation42_spill] sm:$0xff] %v5698_v55  ;;  %v5703_v44 = vsub.f32 %v7729_v40, %v4306_v60  ;;  %v1238_v40 = vmul.f32 %v5710_v49, %v5710_v49  ;;  %v4312_v49 = vld [vmem:[#allocation8 + $0x238] sm:$0xff] }
 0x1f3   :  { %4033 = vmatpush3.bf16.msra.mxu1 %v5663_v29  ;;  %v1360_v23 = vadd.f32 %v1359_v51, %v1233_v63  ;;  %v1236_v63 = vmul.f32 %v5698_v55, %v5698_v55  ;;  %7734 = vst [vmem:[#allocation45_spill] sm:$0xff] %v5713_v62  ;;  %v4310_v55 = vld [vmem:[#allocation8 + $0x228] sm:$0xff] }
 0x1f4   :  { %4056 = vmatprep.subr.bf16.mxu1 %v7639_v33  ;;  %7730 = vst [vmem:[#allocation43_spill] sm:$0xff] %v5703_v44  ;;  %v1237_v51 = vmul.f32 %v5703_v44, %v5703_v44  ;;  %v5723_v41 = vsub.f32 %v7737_v46, %v4310_v55 }
 0x1f5   :  { %v1361_v38 = vadd.f32 %v1360_v23, %v1234_v19  ;;  %v1239_v19 = vmul.f32 %v5713_v62, %v5713_v62 }
 0x1f6   :  { %7738 = vst [vmem:[#allocation47_spill] sm:$0xff] %v5723_v41 }
 0x1f7   :  { %v1362_v30 = vadd.f32 %v1361_v38, %v1235_v32  ;;  %v4309_v32 = vld [vmem:[#allocation8 + $0x220] sm:$0xff] }
 0x1f8   :  { %v7735_v38 = vld [vmem:[#allocation46_spill] sm:$0xff] }
 0x1f9   :  { %v1363_v4 = vadd.f32 %v1362_v30, %v1236_v63  ;;  %v5720_v60 = vsub.f32 %v7735_v38, %v4309_v32  ;;  %v1241_v30 = vmul.f32 %v5723_v41, %v5723_v41  ;;  %v7741_v32 = vld [vmem:[#allocation49_spill] sm:$0xff] }
 0x1fa   :  { %v5733_v38 = vsub.f32 %v7741_v32, %v4312_v49 }
 0x1fb   :  { %v1364_v23 = vadd.f32 %v1363_v4, %v1237_v51  ;;  %7736 = vst [vmem:[#allocation46_spill] sm:$0xff] %v5720_v60  ;;  %v1240_v18 = vmul.f32 %v5720_v60, %v5720_v60  ;;  %v4311_v51 = vld [vmem:[#allocation8 + $0x230] sm:$0xff] }
 0x1fc   :  { %v7739_v4 = vld [vmem:[#allocation48_spill] sm:$0xff]  ;;  %7742 = vst [vmem:[#allocation49_spill] sm:$0xff] %v5733_v38 }
 0x1fd   :  { %v1365_v44 = vadd.f32 %v1364_v23, %v1238_v40  ;;  %v5730_v52 = vsub.f32 %v7739_v4, %v4311_v51  ;;  %v1243_v23 = vmul.f32 %v5733_v38, %v5733_v38  ;;  %v7744_v4 = vld [vmem:[#allocation51_spill] sm:$0xff] }
 0x1fe   :  { %v4315_v60 = vld [vmem:[#allocation8 + $0x250] sm:$0xff] }
 0x1ff   :  { %v1366_v63 = vadd.f32 %v1365_v44, %v1239_v19  ;;  %7740 = vst [vmem:[#allocation48_spill] sm:$0xff] %v5730_v52  ;;  %v1242_v55 = vmul.f32 %v5730_v52, %v5730_v52  ;;  %v4313_v44 = vld [vmem:[#allocation8 + $0x240] sm:$0xff] }
 0x200   :  { %v5740_v19 = vsub.f32 %v5077_v57, %v4313_v44  ;;  %v7746_v57 = vld [vmem:[#allocation52_spill] sm:$0xff] }
 0x201   :  { %v1367_v62 = vadd.f32 %v1366_v63, %v1240_v18  ;;  %v4314_v63 = vld [vmem:[#allocation8 + $0x248] sm:$0xff]  ;;  %v5752_v44 = vsub.f32 %v7746_v57, %v4315_v60  ;;  %v5765_v60 = vsub.f32 %v5092_v48, %v4318_v25 }
 0x202   :  { %7743 = vst [vmem:[#allocation131_spill] sm:$0xff] %v5740_v19  ;;  %v5745_v49 = vsub.f32 %v7744_v4, %v4314_v63  ;;  %v1244_v32 = vmul.f32 %v5740_v19, %v5740_v19 }
 0x203   :  { %v1368_v40 = vadd.f32 %v1367_v62, %v1241_v30  ;;  %7747 = vst [vmem:[#allocation52_spill] sm:$0xff] %v5752_v44  ;;  %v1246_v63 = vmul.f32 %v5752_v44, %v5752_v44  ;;  %7751 = vst [vmem:[#allocation133_spill] sm:$0xff] %v5765_v60  ;;  %v1249_v57 = vmul.f32 %v5765_v60, %v5765_v60  ;;  %v4323_v60 = vld [vmem:[#allocation8 + $0x288] sm:$0xff] }
 0x204   :  { %7745 = vst [vmem:[#allocation51_spill] sm:$0xff] %v5745_v49  ;;  %v1245_v38 = vmul.f32 %v5745_v49, %v5745_v49 }
 0x205   :  { %v1369_v46 = vadd.f32 %v1368_v40, %v1242_v55  ;;  %v4316_v40 = vld [vmem:[#allocation8 + $0x258] sm:$0xff] }
 0x207   :  { %v1370_v62 = vadd.f32 %v1369_v46, %v1243_v23  ;;  %v4317_v46 = vld [vmem:[#allocation8 + $0x260] sm:$0xff] }
 0x209   :  { %v1371_v55 = vadd.f32 %v1370_v62, %v1244_v32 }
 0x20b   :  { %v1372_v4 = vadd.f32 %v1371_v55, %v1245_v38  ;;  %v4319_v38 = vld [vmem:[#allocation8 + $0x270] sm:$0xff] }
 0x20c   :  { %v5772_v55 = vsub.f32 %v5096_v21, %v4319_v38 }
 0x20d   :  { %v1373_v52 = vadd.f32 %v1372_v4, %v1246_v63  ;;  %v4321_v63 = vld [vmem:[#allocation8 + $0x280] sm:$0xff] }
 0x20e   :  { %7752 = vst [vmem:[#allocation134_spill] sm:$0xff] %v5772_v55  ;;  %v1250_v48 = vmul.f32 %v5772_v55, %v5772_v55  ;;  %v4322_v4 = vld [vmem:[#allocation5 + $0x280] sm:$0xff] }
 0x255   :  { %v5742_v41 = vpop.f32.mrb[8].mxu0 }
 0x256   :  { %v4016_v51 = vpop.f32.mrb[9].mxu0 }
 0x257   :  { %v699_v18 = vpop.f32.mrb[10].mxu0  ;;  %v7748_v51 = vld [vmem:[#allocation53_spill] sm:$0xff] }
 0x258   :  { %v4017_v30 = vpop.f32.mrb[11].mxu0  ;;  %v5755_v18 = vsub.f32 %v7748_v51, %v4316_v40  ;;  %v4320_v51 = vld [vmem:[#allocation8 + $0x278] sm:$0xff] }
 0x259   :  { %v5762_v30 = vsub.f32 %v5090_v28, %v4317_v46  ;;  %v5775_v28 = vsub.f32 %v5098_v0, %v4320_v51 }
 0x25a   :  { %7749 = vst [vmem:[#allocation53_spill] sm:$0xff] %v5755_v18  ;;  %v1247_v23 = vmul.f32 %v5755_v18, %v5755_v18 }
 0x25b   :  { %7750 = vst [vmem:[#allocation132_spill] sm:$0xff] %v5762_v30  ;;  %v1248_v32 = vmul.f32 %v5762_v30, %v5762_v30  ;;  %7753 = vst [vmem:[#allocation135_spill] sm:$0xff] %v5775_v28  ;;  %v1251_v21 = vmul.f32 %v5775_v28, %v5775_v28 }
 0x25c   :  { %v1374_v62 = vadd.f32 %v1373_v52, %v1247_v23  ;;  %v3647_v52 = vld [vmem:[%s7407_s2] ss:$0 sm:$0xff]  ;;  %v5782_v23 = vsub.f32 %v4322_v4, %v4321_v63 }
 0x25e   :  { %v1375_v40 = vadd.f32 %v1374_v62, %v1248_v32  ;;  %7754 = vst [vmem:[#allocation136_spill] sm:$0xff] %v5782_v23  ;;  %v808_v32 = vadd.f32 %v5503_v2, %v3647_v52  ;;  %v1252_v30 = vmul.f32 %v5782_v23, %v5782_v23  ;;  %v4325_v2 = vld [vmem:[#allocation8 + $0x290] sm:$0xff]  ;;  %v4339_v23 = vld [vmem:[#allocation5 + $0x2c8] sm:$0xff] }
 0x260   :  { %v1376_v25 = vadd.f32 %v1375_v40, %v1249_v57  ;;  %v4324_v57 = vld [vmem:[#allocation5 + $0x288] sm:$0xff] }
 0x261   :  { %v5787_v40 = vsub.f32 %v4324_v57, %v4323_v60 }
 0x262   :  { %v1377_v46 = vadd.f32 %v1376_v25, %v1250_v48  ;;  %v4326_v25 = vld [vmem:[#allocation5 + $0x290] sm:$0xff] }
 0x263   :  { %7755 = vst [vmem:[#allocation137_spill] sm:$0xff] %v5787_v40  ;;  %v1253_v48 = vmul.f32 %v5787_v40, %v5787_v40  ;;  %v5794_v52 = vsub.f32 %v4326_v25, %v4325_v2  ;;  %v4332_v2 = vld [vmem:[#allocation5 + $0x2a8] sm:$0xff] }
 0x264   :  { %v1378_v55 = vadd.f32 %v1377_v46, %v1251_v21 }
 0x265   :  { %7756 = vst [vmem:[#allocation138_spill] sm:$0xff] %v5794_v52  ;;  %v1254_v57 = vmul.f32 %v5794_v52, %v5794_v52 }
 0x275   :  { %v3856_v0 = vpop.f32.mrb[12].mxu0 }
 0x276   :  { %v3857_v62 = vpop.f32.mrb[13].mxu0 }
 0x277   :  { %v3858_v38 = vadd.f32 %v3857_v62, %v3856_v0  ;;  %v3859_v51 = vpop.f32.mrb[14].mxu0  ;;  %v1379_v0 = vadd.f32 %v1378_v55, %v1252_v30  ;;  %v4327_v62 = vld [vmem:[#allocation8 + $0x298] sm:$0xff] }
 0x278   :  { %v3860_v63 = vpop.f32.mrb[15].mxu0  ;;  %v4328_v51 = vld [vmem:[#allocation5 + $0x298] sm:$0xff] }
 0x279   :  { %v848_v4 = vadd.f32 %v3858_v38, %v808_v32  ;;  %v5796_v60 = vsub.f32 %v4328_v51, %v4327_v62  ;;  %v1380_v21 = vadd.f32 %v1379_v0, %v1253_v48  ;;  %v4330_v32 = vld [vmem:[#allocation5 + $0x2a0] sm:$0xff]  ;;  %v4333_v48 = vld [vmem:[#allocation8 + $0x2b0] sm:$0xff] }
 0x27a   :  { %v4334_v0 = vld [vmem:[#allocation5 + $0x2b0] sm:$0xff] }
 0x27b   :  { %v888_v49 = vadd.f32 %v5562_v26, %v848_v4  ;;  %7757 = vst [vmem:[#allocation139_spill] sm:$0xff] %v5796_v60  ;;  %v1255_v46 = vmul.f32 %v5796_v60, %v5796_v60  ;;  %v4329_v26 = vld [vmem:[#allocation8 + $0x2a0] sm:$0xff]  ;;  %v1381_v63 = vadd.f32 %v1380_v21, %v1254_v57  ;;  %v4331_v4 = vld [vmem:[#allocation8 + $0x2a8] sm:$0xff]  ;;  %v5810_v51 = vsub.f32 %v4334_v0, %v4333_v48  ;;  %v4335_v60 = vld [vmem:[#allocation8 + $0x2b8] sm:$0xff] }
 0x27c   :  { %v5802_v38 = vsub.f32 %v4330_v32, %v4329_v26  ;;  %v5804_v25 = vsub.f32 %v4332_v2, %v4331_v4  ;;  %v4336_v26 = vld [vmem:[#allocation5 + $0x2b8] sm:$0xff] }
 0x27d   :  { %v1382_v55 = vadd.f32 %v1381_v63, %v1255_v46  ;;  %7760 = vst [vmem:[#allocation142_spill] sm:$0xff] %v5810_v51  ;;  %v5812_v32 = vsub.f32 %v4336_v26, %v4335_v60  ;;  %v1258_v57 = vmul.f32 %v5810_v51, %v5810_v51  ;;  %v4337_v46 = vld [vmem:[#allocation8 + $0x2c0] sm:$0xff] }
 0x27e   :  { %7758 = vst [vmem:[#allocation140_spill] sm:$0xff] %v5802_v38  ;;  %7759 = vst [vmem:[#allocation141_spill] sm:$0xff] %v5804_v25  ;;  %v1256_v30 = vmul.f32 %v5802_v38, %v5802_v38  ;;  %v1257_v62 = vmul.f32 %v5804_v25, %v5804_v25  ;;  %v7762_v63 = vld [vmem:[#allocation50_spill] sm:$0xff] }
 0x27f   :  { %7761 = vst [vmem:[#allocation143_spill] sm:$0xff] %v5812_v32  ;;  %v1259_v4 = vmul.f32 %v5812_v32, %v5812_v32  ;;  %v5819_v2 = vsub.f32 %v7762_v63, %v4337_v46 }
 0x280   :  { %v1383_v40 = vadd.f32 %v1382_v55, %v1256_v30  ;;  %v4338_v55 = vld [vmem:[#allocation8 + $0x2c8] sm:$0xff] }
 0x281   :  { %7763 = vst [vmem:[#allocation50_spill] sm:$0xff] %v5819_v2  ;;  %v5821_v60 = vsub.f32 %v4339_v23, %v4338_v55  ;;  %v1260_v26 = vmul.f32 %v5819_v2, %v5819_v2  ;;  %v4345_v55 = vld [vmem:[#allocation5 + $0x2e0] sm:$0xff] }
 0x282   :  { %v1384_v21 = vadd.f32 %v1383_v40, %v1257_v62 }
 0x283   :  { %7764 = vst [vmem:[#allocation144_spill] sm:$0xff] %v5821_v60  ;;  %v1261_v46 = vmul.f32 %v5821_v60, %v5821_v60 }
 0x284   :  { %v1385_v25 = vadd.f32 %v1384_v21, %v1258_v57  ;;  %v4340_v57 = vld [vmem:[#allocation8 + $0x2d0] sm:$0xff] }
 0x285   :  { %v4341_v21 = vld [vmem:[#allocation5 + $0x2d0] sm:$0xff] }
 0x286   :  { %v1386_v40 = vadd.f32 %v1385_v25, %v1259_v4  ;;  %v5829_v63 = vsub.f32 %v4341_v21, %v4340_v57  ;;  %v4342_v25 = vld [vmem:[#allocation8 + $0x2d8] sm:$0xff]  ;;  %v4347_v57 = vld [vmem:[#allocation5 + $0x2e8] sm:$0xff] }
 0x287   :  { %v4343_v4 = vld [vmem:[#allocation5 + $0x2d8] sm:$0xff] }
 0x288   :  { %7765 = vst [vmem:[#allocation145_spill] sm:$0xff] %v5829_v63 }
 0x295   :  { %v3900_v38 = vpop.f32.mrb[16].mxu0 }
 0x296   :  { %v3901_v48 = vpop.f32.mrb[17].mxu0 }
 0x297   :  { %v3902_v0 = vadd.f32 %v3901_v48, %v3900_v38  ;;  %v3903_v30 = vpop.f32.mrb[18].mxu0  ;;  %v1387_v38 = vadd.f32 %v1386_v40, %v1260_v26 }
 0x298   :  { %v3904_v62 = vpop.f32.mrb[19].mxu0  ;;  %v4344_v30 = vld [vmem:[#allocation8 + $0x2e0] sm:$0xff] }
 0x299   :  { %v928_v51 = vadd.f32 %v3902_v0, %v888_v49  ;;  %v5834_v49 = vsub.f32 %v4343_v4, %v4342_v25  ;;  %v1388_v48 = vadd.f32 %v1387_v38, %v1261_v46  ;;  %v5844_v26 = vsub.f32 %v4345_v55, %v4344_v30  ;;  %v4346_v62 = vld [vmem:[#allocation8 + $0x2e8] sm:$0xff]  ;;  %v4349_v25 = vld [vmem:[#allocation5 + $0x2f0] sm:$0xff]  ;;  %v4351_v30 = vld [vmem:[#allocation5 + $0x2f8] sm:$0xff] }
 0x29a   :  { %v5846_v21 = vsub.f32 %v4347_v57, %v4346_v62  ;;  %v4352_v57 = vld [vmem:[#allocation8 + $0x300] sm:$0xff] }
 0x29b   :  { %v5825_v32 = vmax.f32 %v928_v51, 0.0  ;;  %7766 = vst [vmem:[#allocation146_spill] sm:$0xff] %v5834_v49  ;;  %v1262_v51 = vmul.f32 %v5829_v63, %v5829_v63  ;;  %v1263_v0 = vmul.f32 %v5834_v49, %v5834_v49  ;;  %7767 = vst [vmem:[#allocation147_spill] sm:$0xff] %v5844_v26 }
 0x29c   :  { %7768 = vst [vmem:[#allocation148_spill] sm:$0xff] %v5846_v21  ;;  %v1265_v38 = vmul.f32 %v5846_v21, %v5846_v21 }
 0x29d   :  { %990 = vst [vmem:[#allocation11] sm:$0xff] %v5825_v32  ;;  %v934_v23 = vpack.c.bf16 %v5825_v32, %v5825_v32  ;;  %v1389_v40 = vadd.f32 %v1388_v48, %v1262_v51  ;;  %v4350_v48 = vld [vmem:[#allocation8 + $0x2f8] sm:$0xff]  ;;  %vm1725_vm7 = vcmp.gt.f32.partialorder %v5825_v32, 0.0 }
 0x29e   :  { %v5856_v55 = vsub.f32 %v4351_v30, %v4350_v48  ;;  %v4354_v48 = vld [vmem:[#allocation8 + $0x310] sm:$0xff]  ;;  %v7774_v30 = vld [vmem:[#allocation34_spill] sm:$0xff] }
 0x29f   :  { %1543 = vxpose.xlu1.c.b16.start.end [1/1] (short) %v934_v23, 128  ;;  %4035 = vmatmul.mubr.bf16.vlgmr.msra.gmra.mrb[16].mxu1 %v934_v23  ;;  %v1390_v46 = vadd.f32 %v1389_v40, %v1263_v0  ;;  %v4348_v23 = vld [vmem:[#allocation8 + $0x2f0] sm:$0xff] }
 0x2a0   :  { %4057 = vmatpush3.bf16.xpose.msra.mxu1 %v5558_v34  ;;  %4072 = vmatprep.mubr.msk.bf16.mxu1 %vm4699_vm0, %v7639_v33  ;;  %v1264_v34 = vmul.f32 %v5844_v26, %v5844_v26  ;;  %v5854_v4 = vsub.f32 %v4349_v25, %v4348_v23  ;;  %7770 = vst [vmem:[#allocation150_spill] sm:$0xff] %v5856_v55 }
 0x2a1   :  { %4058 = vmatprep.subr.bf16.mxu1 %v7639_v33  ;;  %v5865_v23 = vsub.f32 %v5341_v50, %v4352_v57  ;;  %v5877_v50 = vsub.f32 %v5358_v43, %v4354_v48  ;;  %v4356_v43 = vld [vmem:[#allocation8 + $0x320] sm:$0xff] }
 0x2a2   :  { %7769 = vst [vmem:[#allocation149_spill] sm:$0xff] %v5854_v4  ;;  %v1391_v51 = vadd.f32 %v1390_v46, %v1264_v34  ;;  %v1266_v62 = vmul.f32 %v5854_v4, %v5854_v4  ;;  %v4353_v46 = vld [vmem:[#allocation8 + $0x308] sm:$0xff]  ;;  %v5890_v57 = vsub.f32 %v5377_v11, %v4356_v43  ;;  %v7849_v4 = vld [vmem:[#allocation36_spill] sm:$0xff] }
 0x2a3   :  { %7771 = vst [vmem:[#allocation151_spill] sm:$0xff] %v5865_v23  ;;  %v5868_v25 = vsub.f32 %v5343_v3, %v4353_v46  ;;  %7773 = vst [vmem:[#allocation153_spill] sm:$0xff] %v5877_v50  ;;  %v4355_v3 = vld [vmem:[#allocation8 + $0x318] sm:$0xff]  ;;  %v4357_v46 = vld [vmem:[#allocation8 + $0x328] sm:$0xff] }
 0x2a4   :  { %v1392_v0 = vadd.f32 %v1391_v51, %v1265_v38  ;;  %v1268_v38 = vmul.f32 %v5865_v23, %v5865_v23  ;;  %7776 = vst [vmem:[#allocation154_spill] sm:$0xff] %v5890_v57  ;;  %v7848_v23 = vld [vmem:[#allocation35_spill] sm:$0xff] }
 0x2a5   :  { %7772 = vst [vmem:[#allocation152_spill] sm:$0xff] %v5868_v25 }
 0x2a6   :  { %v1393_v40 = vadd.f32 %v1392_v0, %v1266_v62  ;;  %v5881_v0 = vsub.f32 %v5360_v20, %v4355_v3  ;;  %v5893_v20 = vsub.f32 %v5379_v12, %v4357_v46 }
 0x2a8   :  { %4059 = vmatpush3.bf16.xpose.msra.mxu1 %v5567_v42  ;;  %v1267_v42 = vmul.f32 %v5856_v55, %v5856_v55  ;;  %7775 = vst [vmem:[#allocation34_spill] sm:$0xff] %v5881_v0  ;;  %7777 = vst [vmem:[#allocation155_spill] sm:$0xff] %v5893_v20 }
 0x2a9   :  { %4060 = vmatprep.subr.bf16.mxu1 %v7639_v33 }
 0x2aa   :  { %v1394_v34 = vadd.f32 %v1393_v40, %v1267_v42  ;;  %v1271_v42 = vmul.f32 %v5881_v0, %v5881_v0 }
 0x2ac   :  { %v1395_v51 = vadd.f32 %v1394_v34, %v1268_v38  ;;  %v1272_v38 = vmul.f32 %v5890_v57, %v5890_v57 }
 0x2b0   :  { %4061 = vmatpush3.bf16.xpose.msra.mxu1 %v5582_v14  ;;  %v1269_v14 = vmul.f32 %v5868_v25, %v5868_v25 }
 0x2b1   :  { %4062 = vmatprep.subr.bf16.mxu1 %v7639_v33 }
 0x2b2   :  { %v1396_v62 = vadd.f32 %v1395_v51, %v1269_v14  ;;  %v4358_v51 = vld [vmem:[#allocation8 + $0x330] sm:$0xff] }
 0x2b3   :  { %v5902_v11 = vsub.f32 %v5394_v61, %v4358_v51  ;;  %v7784_v51 = vld [vmem:[#allocation97_spill] sm:$0xff] }
 0x2b5   :  { %7778 = vst [vmem:[#allocation156_spill] sm:$0xff] %v5902_v11 }
 0x2b8   :  { %4063 = vmatpush3.bf16.xpose.msra.mxu1 %v5597_v37  ;;  %v1270_v37 = vmul.f32 %v5877_v50, %v5877_v50 }
 0x2b9   :  { %4064 = vmatprep.subr.bf16.mxu1 %v7639_v33 }
 0x2ba   :  { %v1397_v40 = vadd.f32 %v1396_v62, %v1270_v37  ;;  %v1274_v62 = vmul.f32 %v5902_v11, %v5902_v11  ;;  %v4360_v37 = vld [vmem:[#allocation8 + $0x340] sm:$0xff] }
 0x2bb   :  { %v5914_v61 = vsub.f32 %v5411_v58, %v4360_v37 }
 0x2bc   :  { %1864 = vxpose.xlu1.c.b16.start.end [1/1] (short) %v7774_v30, 128  ;;  %v1398_v34 = vadd.f32 %v1397_v40, %v1271_v42  ;;  %v4359_v30 = vld [vmem:[#allocation8 + $0x338] sm:$0xff]  ;;  %v4361_v40 = vld [vmem:[#allocation8 + $0x348] sm:$0xff] }
 0x2bd   :  { %v5905_v12 = vsub.f32 %v5396_v22, %v4359_v30  ;;  %7780 = vst [vmem:[#allocation158_spill] sm:$0xff] %v5914_v61  ;;  %v5917_v22 = vsub.f32 %v5413_v47, %v4361_v40  ;;  %v1276_v43 = vmul.f32 %v5914_v61, %v5914_v61 }
 0x2be   :  { %v1399_v14 = vadd.f32 %v1398_v34, %v1272_v38  ;;  %v4362_v34 = vld [vmem:[#allocation8 + $0x350] sm:$0xff]  ;;  %v4363_v38 = vld [vmem:[#allocation8 + $0x358] sm:$0xff] }
 0x2bf   :  { %7779 = vst [vmem:[#allocation157_spill] sm:$0xff] %v5905_v12  ;;  %7781 = vst [vmem:[#allocation159_spill] sm:$0xff] %v5917_v22  ;;  %v5926_v58 = vsub.f32 %v5428_v6, %v4362_v34  ;;  %v5929_v47 = vsub.f32 %v5430_v10, %v4363_v38  ;;  %v7786_v6 = vld [vmem:[#allocation98_spill] sm:$0xff] }
 0x2c0   :  { %4065 = vmatpush3.bf16.xpose.msra.mxu1 %v5612_v45  ;;  %v1273_v45 = vmul.f32 %v5893_v20, %v5893_v20  ;;  %v7790_v38 = vld [vmem:[#allocation78_spill] sm:$0xff] }
 0x2c1   :  { %4066 = vmatprep.subr.bf16.mxu1 %v7639_v33  ;;  %7782 = vst [vmem:[#allocation160_spill] sm:$0xff] %v5926_v58  ;;  %7783 = vst [vmem:[#allocation161_spill] sm:$0xff] %v5929_v47 }
 0x2c2   :  { %v1400_v48 = vadd.f32 %v1399_v14, %v1273_v45  ;;  %v1278_v45 = vmul.f32 %v5926_v58, %v5926_v58  ;;  %v4364_v14 = vld [vmem:[#allocation8 + $0x360] sm:$0xff]  ;;  %v7833_v58 = vmov 1.0  }
 0x2c4   :  { %v1401_v3 = vadd.f32 %v1400_v48, %v1274_v62  ;;  %v5936_v48 = vsub.f32 %v7784_v51, %v4364_v14  ;;  %v4365_v62 = vld [vmem:[#allocation8 + $0x368] sm:$0xff]  ;;  %v7792_v14 = vld [vmem:[#allocation37_spill] sm:$0xff] }
 0x2c5   :  { %v7793_v51 = vld [vmem:[#allocation79_spill] sm:$0xff] }
 0x2c6   :  { %7785 = vst [vmem:[#allocation97_spill] sm:$0xff] %v5936_v48  ;;  %v1280_v10 = vmul.f32 %v5936_v48, %v5936_v48 }
 0x2c8   :  { %4067 = vmatpush3.bf16.xpose.msra.mxu1 %v5627_v9  ;;  %v1275_v9 = vmul.f32 %v5905_v12, %v5905_v12  ;;  %v7842_v12 = vld [vmem:[#allocation33_spill] sm:$0xff] }
 0x2c9   :  { %4068 = vmatprep.subr.bf16.mxu1 %v7639_v33 }
 0x2ca   :  { %v1402_v42 = vadd.f32 %v1401_v3, %v1275_v9  ;;  %v5939_v9 = vsub.f32 %v7786_v6, %v4365_v62  ;;  %v4370_v6 = vld [vmem:[#allocation8 + $0x390] sm:$0xff] }
 0x2cc   :  { %7787 = vst [vmem:[#allocation98_spill] sm:$0xff] %v5939_v9  ;;  %v1281_v3 = vmul.f32 %v5939_v9, %v5939_v9 }
 0x2d0   :  { %4069 = vmatpush3.bf16.xpose.msra.mxu1 %v5648_v35  ;;  %v1403_v35 = vadd.f32 %v1402_v42, %v1276_v43  ;;  %v4366_v42 = vld [vmem:[#allocation8 + $0x370] sm:$0xff] }
 0x2d1   :  { %4070 = vmatprep.subr.bf16.mxu1 %v7639_v33  ;;  %v1277_v33 = vmul.f32 %v5917_v22, %v5917_v22  ;;  %v5946_v40 = vsub.f32 %v5456_v24, %v4366_v42  ;;  %v4369_v24 = vld [vmem:[#allocation8 + $0x388] sm:$0xff] }
 0x2d3   :  { %v1404_v46 = vadd.f32 %v1403_v35, %v1277_v33  ;;  %7788 = vst [vmem:[#allocation162_spill] sm:$0xff] %v5946_v40  ;;  %v4367_v33 = vld [vmem:[#allocation8 + $0x378] sm:$0xff]  ;;  %v1282_v34 = vmul.f32 %v5946_v40, %v5946_v40 }
 0x2d4   :  { %v5949_v35 = vsub.f32 %v5458_v17, %v4367_v33  ;;  %v4371_v33 = vld [vmem:[#allocation10] sm:$0xff] }
 0x2d6   :  { %7789 = vst [vmem:[#allocation163_spill] sm:$0xff] %v5949_v35 }
 0x2d8   :  { %4071 = vmatpush3.bf16.xpose.msra.mxu1 %v5663_v29  ;;  %v1279_v29 = vmul.f32 %v5929_v47, %v5929_v47 }
 0x2d9   :  { %1896 = vxpose.xlu1.c.b16.start.end [1/1] (short) %v4923_v1, 128  ;;  %v1405_v1 = vadd.f32 %v1404_v46, %v1278_v45  ;;  %v4368_v46 = vld [vmem:[#allocation8 + $0x380] sm:$0xff] }
 0x2da   :  { %v5954_v45 = vsub.f32 %v7790_v38, %v4368_v46  ;;  %v4373_v38 = vld [vmem:[#allocation8 + $0x398] sm:$0xff] }
 0x2db   :  { %v1406_v30 = vadd.f32 %v1405_v1, %v1279_v29  ;;  %v1283_v29 = vmul.f32 %v5949_v35, %v5949_v35 }
 0x2dc   :  { %7791 = vst [vmem:[#allocation78_spill] sm:$0xff] %v5954_v45  ;;  %v1284_v17 = vmul.f32 %v5954_v45, %v5954_v45  ;;  %v7801_v45 = vld [vmem:[#allocation85_spill] sm:$0xff] }
 0x2dd   :  { %v1407_v37 = vadd.f32 %v1406_v30, %v1280_v10  ;;  %v5960_v30 = vsub.f32 %v7793_v51, %v4369_v24  ;;  %v7795_v10 = vld [vmem:[#allocation81_spill] sm:$0xff] }
 0x2df   :  { %v1408_v43 = vadd.f32 %v1407_v37, %v1281_v3  ;;  %7794 = vst [vmem:[#allocation37_spill] sm:$0xff] %v5960_v30  ;;  %v5965_v3 = vsub.f32 %v7795_v10, %v4370_v6  ;;  %v1285_v37 = vmul.f32 %v5960_v30, %v5960_v30  ;;  %v4375_v6 = vld [vmem:[#allocation8 + $0x3a0] sm:$0xff]  ;;  %v7799_v10 = vld [vmem:[#allocation84_spill] sm:$0xff]  ;;  %v4377_v30 = vld [vmem:[#allocation8 + $0x3a8] sm:$0xff] }
 0x2e1   :  { %v1409_v1 = vadd.f32 %v1408_v43, %v1282_v34  ;;  %7796 = vst [vmem:[#allocation79_spill] sm:$0xff] %v5965_v3  ;;  %v5970_v43 = vsub.f32 %v5545_v16, %v4371_v33  ;;  %v4372_v34 = vld [vmem:[#allocation10 + $0x8] sm:$0xff]  ;;  %v4374_v16 = vld [vmem:[#allocation10 + $0x10] sm:$0xff]  ;;  %v5990_v33 = vsub.f32 %v7799_v10, %v4375_v6 }
 0x2e2   :  { %v5973_v46 = vsub.f32 %v5547_v39, %v4372_v34  ;;  %v7803_v10 = vld [vmem:[#allocation87_spill] sm:$0xff] }
 0x2e3   :  { %v1410_v62 = vadd.f32 %v1409_v1, %v1283_v29  ;;  %v1286_v29 = vmul.f32 %v5965_v3, %v5965_v3  ;;  %v1451_v51 = vmul.f32 %v5970_v43, %v5970_v43  ;;  %v7823_v3 = vld [vmem:[#allocation99_spill] sm:$0xff] }
 0x2e5   :  { %v1411_v42 = vadd.f32 %v1410_v62, %v1284_v17  ;;  %v1452_v17 = vmul.f32 %v5973_v46, %v5973_v46  ;;  %v5985_v62 = vsub.f32 %v5549_v13, %v4374_v16  ;;  %v5998_v13 = vsub.f32 %v7801_v45, %v4377_v30  ;;  %v4380_v30 = vld [vmem:[#allocation10 + $0x28] sm:$0xff] }
 0x2e6   :  { %v1288_v16 = vmul.f32 %v5990_v33, %v5990_v33 }
 0x2e7   :  { %v1412_v1 = vadd.f32 %v1411_v42, %v1285_v37  ;;  %v4376_v37 = vld [vmem:[#allocation10 + $0x18] sm:$0xff]  ;;  %7802 = vst [vmem:[#allocation84_spill] sm:$0xff] %v5998_v13 }
 0x2e8   :  { %v5993_v42 = vsub.f32 %v5560_v56, %v4376_v37  ;;  %v1289_v56 = vmul.f32 %v5998_v13, %v5998_v13 }
 0x2e9   :  { %v1413_v34 = vadd.f32 %v1412_v1, %v1286_v29  ;;  %v4378_v1 = vld [vmem:[#allocation10 + $0x20] sm:$0xff] }
 0x2ea   :  { %v1454_v6 = vmul.f32 %v5993_v42, %v5993_v42 }
 0x2f6   :  { %1928 = vxpose.xlu1.c.b16.start.end [1/1] (short) %v7792_v14, 128  ;;  %v7797_v14 = vld [vmem:[#allocation82_spill] sm:$0xff] }
 0x2f7   :  { %v5976_v24 = vsub.f32 %v7797_v14, %v4373_v38  ;;  %7800 = vst [vmem:[#allocation82_spill] sm:$0xff] %v5990_v33  ;;  %v1467_v38 = vadd.f32 %v1452_v17, %v1451_v51  ;;  %v1453_v14 = vmul.f32 %v5985_v62, %v5985_v62  ;;  %v6005_v51 = vsub.f32 %v5570_v5, %v4378_v1  ;;  %v4379_v17 = vld [vmem:[#allocation8 + $0x3b0] sm:$0xff] }
 0x2f8   :  { %v6010_v37 = vsub.f32 %v7803_v10, %v4379_v17  ;;  %v6013_v33 = vsub.f32 %v5572_v7, %v4380_v30 }
 0x2f9   :  { %7798 = vst [vmem:[#allocation81_spill] sm:$0xff] %v5976_v24  ;;  %v1287_v39 = vmul.f32 %v5976_v24, %v5976_v24  ;;  %v1468_v29 = vadd.f32 %v1467_v38, %v1453_v14  ;;  %v4381_v38 = vld [vmem:[#allocation8 + $0x3b8] sm:$0xff] }
 0x2fa   :  { %7804 = vst [vmem:[#allocation85_spill] sm:$0xff] %v6010_v37  ;;  %v7805_v14 = vld [vmem:[#allocation88_spill] sm:$0xff]  ;;  %v1290_v1 = vmul.f32 %v6010_v37, %v6010_v37  ;;  %v1456_v17 = vmul.f32 %v6013_v33, %v6013_v33 }
 0x2fb   :  { %v1414_v24 = vadd.f32 %v1413_v34, %v1287_v39  ;;  %v1469_v45 = vadd.f32 %v1468_v29, %v1454_v6  ;;  %v1455_v39 = vmul.f32 %v6005_v51, %v6005_v51  ;;  %v6018_v5 = vsub.f32 %v7805_v14, %v4381_v38  ;;  %v4382_v6 = vld [vmem:[#allocation10 + $0x30] sm:$0xff]  ;;  %v4384_v14 = vld [vmem:[#allocation10 + $0x38] sm:$0xff] }
 0x2fc   :  { %v6025_v29 = vsub.f32 %v5585_v8, %v4382_v6  ;;  %v6034_v37 = vsub.f32 %v5587_v54, %v4384_v14 }
 0x2fd   :  { %v1415_v34 = vadd.f32 %v1414_v24, %v1288_v16  ;;  %7806 = vst [vmem:[#allocation87_spill] sm:$0xff] %v6018_v5  ;;  %v1470_v10 = vadd.f32 %v1469_v45, %v1455_v39  ;;  %v1291_v30 = vmul.f32 %v6018_v5, %v6018_v5  ;;  %v4383_v24 = vld [vmem:[#allocation8 + $0x3c0] sm:$0xff]  ;;  %v4385_v39 = vld [vmem:[#allocation8 + $0x3c8] sm:$0xff]  ;;  %v4389_v5 = vld [vmem:[#allocation8 + $0x3d8] sm:$0xff] }
 0x2fe   :  { %v7807_v16 = vld [vmem:[#allocation90_spill] sm:$0xff]  ;;  %v1457_v45 = vmul.f32 %v6025_v29, %v6025_v29 }
 0x2ff   :  { %v1416_v7 = vadd.f32 %v1415_v34, %v1289_v56  ;;  %v6030_v13 = vsub.f32 %v7807_v16, %v4383_v24  ;;  %v1471_v38 = vadd.f32 %v1470_v10, %v1456_v17  ;;  %v7809_v56 = vld [vmem:[#allocation91_spill] sm:$0xff]  ;;  %v1458_v24 = vmul.f32 %v6034_v37, %v6034_v37  ;;  %v4386_v17 = vld [vmem:[#allocation10 + $0x40] sm:$0xff] }
 0x300   :  { %v6039_v34 = vsub.f32 %v7809_v56, %v4385_v39  ;;  %v6046_v10 = vsub.f32 %v5600_v36, %v4386_v17  ;;  %v4388_v56 = vld [vmem:[#allocation10 + $0x48] sm:$0xff] }
 0x301   :  { %7808 = vst [vmem:[#allocation88_spill] sm:$0xff] %v6030_v13  ;;  %v1417_v8 = vadd.f32 %v1416_v7, %v1290_v1  ;;  %v1292_v6 = vmul.f32 %v6030_v13, %v6030_v13  ;;  %v4387_v1 = vld [vmem:[#allocation8 + $0x3d0] sm:$0xff]  ;;  %v7812_v7 = vld [vmem:[#allocation93_spill] sm:$0xff]  ;;  %v6054_v13 = vsub.f32 %v5602_v31, %v4388_v56  ;;  %v7815_v36 = vld [vmem:[#allocation94_spill] sm:$0xff] }
 0x302   :  { %7810 = vst [vmem:[#allocation90_spill] sm:$0xff] %v6039_v34  ;;  %7811 = vst [vmem:[#allocation91_spill] sm:$0xff] %v6046_v10  ;;  %v1293_v16 = vmul.f32 %v6039_v34, %v6039_v34  ;;  %v6051_v14 = vsub.f32 %v7812_v7, %v4387_v1  ;;  %v6059_v17 = vsub.f32 %v7815_v36, %v4389_v5  ;;  %v4392_v5 = vld [vmem:[#allocation10 + $0x58] sm:$0xff] }
 0x303   :  { %v1418_v54 = vadd.f32 %v1417_v8, %v1291_v30  ;;  %7814 = vst [vmem:[#allocation164_spill] sm:$0xff] %v6054_v13  ;;  %v1460_v8 = vmul.f32 %v6054_v13, %v6054_v13  ;;  %v6074_v36 = vsub.f32 %v5617_v27, %v4392_v5 }
 0x304   :  { %7813 = vst [vmem:[#allocation93_spill] sm:$0xff] %v6051_v14  ;;  %7816 = vst [vmem:[#allocation94_spill] sm:$0xff] %v6059_v17  ;;  %v1294_v30 = vmul.f32 %v6051_v14, %v6051_v14  ;;  %v1295_v7 = vmul.f32 %v6059_v17, %v6059_v17  ;;  %v4393_v14 = vld [vmem:[#allocation8 + $0x3e8] sm:$0xff]  ;;  %v4395_v17 = vld [vmem:[#allocation8 + $0x3f0] sm:$0xff] }
 0x305   :  { %7819 = vst [vmem:[#allocation165_spill] sm:$0xff] %v6074_v36  ;;  %v1462_v27 = vmul.f32 %v6074_v36, %v6074_v36 }
 0x313   :  { %1960 = vxpose.xlu1.c.b16.start.end [1/1] (short) %v7693_v15, 128  ;;  %v1472_v15 = vadd.f32 %v1471_v38, %v1457_v45  ;;  %v1459_v38 = vmul.f32 %v6046_v10, %v6046_v10  ;;  %v1419_v45 = vadd.f32 %v1418_v54, %v1292_v6  ;;  %v4391_v6 = vld [vmem:[#allocation8 + $0x3e0] sm:$0xff]  ;;  %v7817_v54 = vld [vmem:[#allocation95_spill] sm:$0xff] }
 0x314   :  { %v6071_v56 = vsub.f32 %v7817_v54, %v4391_v6 }
 0x315   :  { %v1473_v39 = vadd.f32 %v1472_v15, %v1458_v24  ;;  %v4390_v24 = vld [vmem:[#allocation10 + $0x50] sm:$0xff]  ;;  %v1420_v31 = vadd.f32 %v1419_v45, %v1293_v16  ;;  %v4394_v45 = vld [vmem:[#allocation10 + $0x60] sm:$0xff] }
 0x316   :  { %v6066_v15 = vsub.f32 %v5615_v59, %v4390_v24  ;;  %7818 = vst [vmem:[#allocation95_spill] sm:$0xff] %v6071_v56  ;;  %v7820_v59 = vld [vmem:[#allocation96_spill] sm:$0xff]  ;;  %v1296_v16 = vmul.f32 %v6071_v56, %v6071_v56  ;;  %v6084_v6 = vsub.f32 %v5642_v53, %v4394_v45 }
 0x317   :  { %v1474_v1 = vadd.f32 %v1473_v39, %v1459_v38  ;;  %v1421_v39 = vadd.f32 %v1420_v31, %v1294_v30  ;;  %v6079_v24 = vsub.f32 %v7820_v59, %v4393_v14  ;;  %v6089_v30 = vsub.f32 %v7823_v3, %v4395_v17  ;;  %v7825_v31 = vld [vmem:[#allocation121_spill] sm:$0xff]  ;;  %v7827_v45 = vld [vmem:[#allocation100_spill] sm:$0xff] }
 0x318   :  { %v1461_v34 = vmul.f32 %v6066_v15, %v6066_v15  ;;  %7822 = vst [vmem:[#allocation166_spill] sm:$0xff] %v6084_v6  ;;  %v1463_v53 = vmul.f32 %v6084_v6, %v6084_v6  ;;  %v4398_v17 = vld [vmem:[#allocation10 + $0x70] sm:$0xff] }
 0x319   :  { %v1475_v38 = vadd.f32 %v1474_v1, %v1460_v8  ;;  %7821 = vst [vmem:[#allocation96_spill] sm:$0xff] %v6079_v24  ;;  %v1422_v54 = vadd.f32 %v1421_v39, %v1295_v7  ;;  %7824 = vst [vmem:[#allocation99_spill] sm:$0xff] %v6089_v30  ;;  %v1297_v14 = vmul.f32 %v6079_v24, %v6079_v24  ;;  %v4396_v1 = vld [vmem:[#allocation10 + $0x68] sm:$0xff]  ;;  %v4397_v39 = vld [vmem:[#allocation8 + $0x3f8] sm:$0xff] }
 0x31a   :  { %v6094_v59 = vsub.f32 %v7825_v31, %v4396_v1  ;;  %v6099_v56 = vsub.f32 %v7827_v45, %v4397_v39  ;;  %v1298_v3 = vmul.f32 %v6089_v30, %v6089_v30  ;;  %v7831_v31 = vld [vmem:[#allocation124_spill] sm:$0xff] }
 0x31b   :  { %v1476_v5 = vadd.f32 %v1475_v38, %v1461_v34  ;;  %v1423_v8 = vadd.f32 %v1422_v54, %v1296_v16  ;;  %v7829_v38 = vld [vmem:[#allocation123_spill] sm:$0xff] }
 0x31c   :  { %7826 = vst [vmem:[#allocation121_spill] sm:$0xff] %v6094_v59  ;;  %7828 = vst [vmem:[#allocation100_spill] sm:$0xff] %v6099_v56  ;;  %v6104_v24 = vsub.f32 %v7829_v38, %v4398_v17  ;;  %v1464_v16 = vmul.f32 %v6094_v59, %v6094_v59  ;;  %v1299_v1 = vmul.f32 %v6099_v56, %v6099_v56 }
 0x31d   :  { %v1477_v7 = vadd.f32 %v1476_v5, %v1462_v27  ;;  %v1424_v34 = vadd.f32 %v1423_v8, %v1297_v14  ;;  %v4399_v5 = vld [vmem:[#allocation10 + $0x78] sm:$0xff]  ;;  %v1169_v8 = vld [vmem:[%s7409_s4] sm:$0x1] }
 0x31e   :  { %7830 = vst [vmem:[#allocation123_spill] sm:$0xff] %v6104_v24  ;;  %v6111_v39 = vsub.f32 %v7831_v31, %v4399_v5  ;;  %v1465_v45 = vmul.f32 %v6104_v24, %v6104_v24  ;;  %v2878_v5 = vand.u32 2147483647, %v5825_v32 }
 0x31f   :  { %v1478_v54 = vadd.f32 %v1477_v7, %v1463_v53  ;;  %v1425_v27 = vadd.f32 %v1424_v34, %v1298_v3  ;;  %v1170_v53 = vld [vmem:[%s7413_s8] sm:$0x1] }
 0x320   :  { %7832 = vst [vmem:[#allocation124_spill] sm:$0xff] %v6111_v39  ;;  %v1466_v3 = vmul.f32 %v6111_v39, %v6111_v39  ;;  %v6123_v17 = vsub.f32 %v1169_v8, %v1170_v53  ;;  %vm2879_vm2 = vcmp.lt.f32.partialorder %v2878_v5, inf }
 0x321   :  { %v1479_v14 = vadd.f32 %v1478_v54, %v1464_v16  ;;  %v1426_v7 = vadd.f32 %v1425_v27, %v1299_v1  ;;  %v6127_v54 = vpop.trf.xlu1  ;;  %v7565_v27 = vmov 1.0  }
 0x322   :  { %v1493_v16 = vmul.f32 %v6123_v17, %v6123_v17  ;;  %4040 = vmatprep.mubr.msk.bf16.mxu0 %vm1559_vm6, %v6127_v54 }
 0x323   :  { %v1480_v34 = vadd.f32 %v1479_v14, %v1465_v45  ;;  %v2880_v45 = vsel %vm2879_vm2, 0.0, %v7565_v27 }
 0x324   :  { %v1494_v31 = vsel %vm1438_vm1, %v1493_v16, 0.0  ;;  %v3646_v16 = vld [vmem:[%s7413_s8] ss:$0 sm:$0xff] }
 0x325   :  { %v1481_v38 = vadd.f32 %v1480_v34, %v1466_v3  ;;  %v6131_v1 = vpop.trf.xlu1  ;;  %v697_v56 = vadd.f32 %v3646_v16, %v5742_v41 }
 0x329   :  { %v6134_v14 = vpop.trf.xlu1 }
 0x32d   :  { %v6136_v8 = vpop.trf.xlu1 }
 0x331   :  { %v6138_v53 = vpop.trf.xlu1 }
 0x33c   :  { %1427 = vadd.xlane.f32.xlu1 %v1426_v7  ;;  %v6140_v7 = vpop.trf.xlu1 }
 0x340   :  { %1482 = vadd.xlane.f32.xlu1 %v1481_v38  ;;  %v6142_v3 = vpop.trf.xlu1  ;;  %v7578_v38 = vlaneseq }
 0x342   :  { %v993_v27 = vshrl.u32 %v7578_v38, 7 }
 0x344   :  { %1495 = vadd.xlane.f32.xlu1 %v1494_v31  ;;  %v6144_v34 = vpop.trf.xlu1  ;;  %v3648_v31 = vld [vmem:[%s7409_s4] ss:$0 sm:$0xff]  ;;  %vm994_vm3 = vcmp.lt.s32.totalorder %v993_v27, 2 }
 0x345   :  { %v999_v41 = vsel %vm994_vm3, %v697_v56, 0.0 }
 0x348   :  { %2881 = vadd.xlane.f32.xlu1 %v2880_v45  ;;  %v6149_v5 = vpop.trf.xlu1 }
 0x34c   :  { %v6156_v47 = vpop.trf.xlu1 }
 0x372   :  { %v984_v45 = vpop.f32.mrb[16].mxu1 }
 0x373   :  { %v985_v30 = vadd.f32 %v3648_v31, %v984_v45  ;;  %v4036_v9 = vpop.f32.mrb[17].mxu1 }
 0x374   :  { %v987_v35 = vpop.f32.mrb[18].mxu1  ;;  %v6163_v9 = vpop.trf.xlu1 }
 0x375   :  { %991 = vst [vmem:[#allocation12] sm:$0xff] %v985_v30  ;;  %v4037_v48 = vpop.f32.mrb[19].mxu1  ;;  %v2891_v40 = vand.u32 2147483647, %v985_v30  ;;  %v995_v22 = vsub.f32 %v985_v30, %v697_v56  ;;  %v1011_v35 = vmul.f32 %v999_v41, %v999_v41 }
 0x377   :  { %vm2892_vm4 = vcmp.lt.f32.partialorder %v2891_v40, inf  ;;  %v6158_v61 = vsel %vm994_vm3, %v995_v22, 0.0 }
 0x378   :  { %v2893_v20 = vsel %vm2892_vm4, 0.0, %v7833_v58  ;;  %v1000_v38 = vmul.f32 %v6158_v61, %v6158_v61  ;;  %v6165_v48 = vpop.trf.xlu1 }
 0x379   :  { %2894 = vadd.xlane.f32.xlu1 %v2893_v20  ;;  %v7836_v20 = vld [vmem:[#allocation32_spill] sm:$0xff] }
 0x37a   :  { %1001 = vadd.xlane.f32.xlu0 %v1000_v38 }
 0x37c   :  { %v6167_v30 = vpop.trf.xlu1 }
 0x37e   :  { %1012 = vadd.xlane.f32.xlu0 %v1011_v35 }
 0x380   :  { %v6169_v27 = vpop.trf.xlu1 }
 0x384   :  { %v6171_v22 = vpop.trf.xlu1 }
 0x388   :  { %v6173_v40 = vpop.trf.xlu1 }
 0x38c   :  { %v6175_v16 = vpop.trf.xlu1 }
 0x38d   :  { %7834 = vst [vmem:[#allocation167_spill] sm:$0xff] %v6175_v16 }
 0x390   :  { %v6177_v31 = vpop.trf.xlu1 }
 0x391   :  { %7835 = vst [vmem:[#allocation168_spill] sm:$0xff] %v6177_v31 }
 0x394   :  { %v6180_v56 = vpop.trf.xlu1 }
 0x395   :  { %7837 = vst [vmem:[#allocation32_spill] sm:$0xff] %v6180_v56 }
 0x398   :  { %v6182_v38 = vpop.trf.xlu1 }
 0x399   :  { %7838 = vst [vmem:[#allocation169_spill] sm:$0xff] %v6182_v38 }
 0x39c   :  { %v6184_v45 = vpop.trf.xlu1 }
 0x39d   :  { %7839 = vst [vmem:[#allocation170_spill] sm:$0xff] %v6184_v45 }
 0x3a0   :  { %v6186_v41 = vpop.trf.xlu1 }
 0x3a1   :  { %7840 = vst [vmem:[#allocation171_spill] sm:$0xff] %v6186_v41 }
 0x3a4   :  { %v6188_v35 = vpop.trf.xlu1 }
 0x3a5   :  { %7841 = vst [vmem:[#allocation172_spill] sm:$0xff] %v6188_v35 }
 0x3a8   :  { %v6191_v57 = vpop.trf.xlu1 }
 0x3a9   :  { %7843 = vst [vmem:[#allocation33_spill] sm:$0xff] %v6191_v57 }
 0x3ab   :  { %1880 = vxpose.xlu0.c.b16.start.end [1/1] (short) %v7836_v20, 128 }
 0x3ac   :  { %v6193_v11 = vpop.trf.xlu1 }
 0x3ad   :  { %7844 = vst [vmem:[#allocation173_spill] sm:$0xff] %v6193_v11 }
 0x3b0   :  { %v6195_v25 = vpop.trf.xlu1 }
 0x3b1   :  { %7845 = vst [vmem:[#allocation174_spill] sm:$0xff] %v6195_v25 }
 0x3b4   :  { %v6197_v0 = vpop.trf.xlu1 }
 0x3b5   :  { %7846 = vst [vmem:[#allocation175_spill] sm:$0xff] %v6197_v0 }
 0x3b8   :  { %v6199_v20 = vpop.trf.xlu1 }
 0x3b9   :  { %7847 = vst [vmem:[#allocation176_spill] sm:$0xff] %v6199_v20 }
 0x3bc   :  { %v6202_v50 = vpop.trf.xlu1 }
 0x3c0   :  { %v6204_v21 = vpop.trf.xlu1 }
 0x3c4   :  { %v6206_v55 = vpop.trf.xlu1 }
 0x3c8   :  { %1912 = vxpose.xlu0.c.b16.start.end [1/1] (short) %v7842_v12, 128  ;;  %v6208_v26 = vpop.trf.xlu1 }
 0x3cc   :  { %v6210_v12 = vpop.trf.xlu1 }
 0x3d0   :  { %v6213_v60 = vpop.trf.xlu1 }
 0x3d1   :  { %7850 = vst [vmem:[#allocation35_spill] sm:$0xff] %v6213_v60 }
 0x3d4   :  { %v6215_v28 = vpop.trf.xlu1 }
 0x3d5   :  { %7851 = vst [vmem:[#allocation36_spill] sm:$0xff] %v6215_v28 }
 0x3d8   :  { %v6219_v11 = vpop.trf.xlu1 }
 0x3d9   :  { %7852 = vst [vmem:[#allocation177_spill] sm:$0xff] %v6219_v11 }
 0x3e5   :  { %1944 = vxpose.xlu0.c.b16.start.end [1/1] (short) %v7848_v23, 128 }
 0x402   :  { %1976 = vxpose.xlu0.c.b16.start.end [1/1] (short) %v7849_v4, 128 }
 0x407   :  { %v1002_v49 = vpop.xlane.xlu0 %1001 }
 0x408   :  { %v1003_v2 = vrot.slane %v1002_v49, 4 }
 0x40a   :  { %v1004_v63 = vadd.f32 %v1003_v2, %v1002_v49  ;;  %v6223_v49 = vpop.trf.xlu1 }
 0x40b   :  { %v1013_v52 = vpop.xlane.xlu0 %1012  ;;  %7853 = vst [vmem:[#allocation178_spill] sm:$0xff] %v6223_v49 }
 0x40c   :  { %v1005_v23 = vrot.slane %v1004_v63, 2  ;;  %v1014_v18 = vrot.slane %v1013_v52, 4 }
 0x40e   :  { %v1015_v19 = vadd.f32 %v1014_v18, %v1013_v52  ;;  %v1006_v44 = vadd.f32 %v1005_v23, %v1004_v63  ;;  %v1150_v18 = vld [vmem:[%s7407_s2] sm:$0x1] }
 0x40f   :  { %v1151_v52 = vld [vmem:[%s7411_s6] sm:$0x1] }
 0x410   :  { %v1016_v20 = vrot.slane %v1015_v19, 2  ;;  %v1007_v0 = vrot.slane %v1006_v44, 1  ;;  %v6237_v63 = vsub.f32 %v1150_v18, %v1151_v52 }
 0x411   :  { %v6217_v25 = vpop.trf.xlu0 }
 0x412   :  { %v1008_v57 = vadd.f32 %v1007_v0, %v1006_v44  ;;  %v1017_v4 = vadd.f32 %v1016_v20, %v1015_v19  ;;  %v6235_v19 = vpop.trf.xlu1  ;;  %v1733_v32 = vmul.f32 0.2, %v6237_v63 }
 0x413   :  { %7854 = vst [vmem:[#allocation179_spill] sm:$0xff] %v6235_v19 }
 0x414   :  { %4211 = vpush %v1008_v57  ;;  %v1018_v35 = vrot.slane %v1017_v4, 1 }
 0x415   :  { %v6221_v41 = vpop.trf.xlu0 }
 0x416   :  { %v1019_v2 = vadd.f32 %v1018_v35, %v1017_v4  ;;  %v6241_v57 = vpop.trf.xlu1  ;;  %v1437_v35 = vmul.f32 %v6237_v63, %v6237_v63  ;;  %v1534_v63 = vmul.f32 0.2, %v6034_v37  ;;  %v1537_v37 = vmul.f32 0.2, %v6066_v15 }
 0x417   :  { %7855 = vst [vmem:[#allocation180_spill] sm:$0xff] %v6241_v57 }
 0x418   :  { %4213 = vpush %v1019_v2  ;;  %v1439_v23 = vsel %vm1438_vm1, %v1437_v35, 0.0 }
 0x419   :  { %v6225_v45 = vpop.trf.xlu0 }
 0x41a   :  { %v6250_v2 = vpop.trf.xlu1 }
 0x41b   :  { %7858 = vst [vmem:[#allocation183_spill] sm:$0xff] %v6250_v2 }
 0x41d   :  { %v6233_v44 = vpop.trf.xlu0 }
 0x41e   :  { %v1428_v18 = vpop.xlane.xlu1 %1427 }
 0x41f   :  { %v1429_v52 = vrot.slane %v1428_v18, 4 }
 0x421   :  { %v6239_v0 = vpop.trf.xlu0  ;;  %v1430_v19 = vadd.f32 %v1429_v52, %v1428_v18 }
 0x423   :  { %v1431_v31 = vrot.slane %v1430_v19, 2 }
 0x425   :  { %v6245_v20 = vpop.trf.xlu0  ;;  %v1432_v35 = vadd.f32 %v1431_v31, %v1430_v19 }
 0x426   :  { %7856 = vst [vmem:[#allocation181_spill] sm:$0xff] %v6245_v20 }
 0x427   :  { %v1433_v11 = vrot.slane %v1432_v35, 1 }
 0x429   :  { %v6248_v4 = vpop.trf.xlu0  ;;  %v1434_v2 = vadd.f32 %v1433_v11, %v1432_v35 }
 0x42a   :  { %7857 = vst [vmem:[#allocation182_spill] sm:$0xff] %v6248_v4 }
 0x42b   :  { %1440 = vadd.xlane.f32.xlu0 %v1439_v23  ;;  %4215 = vpush %v1434_v2 }
 0x42d   :  { %v6252_v38 = vpop.trf.xlu0 }
 0x42e   :  { %7859 = vst [vmem:[#allocation184_spill] sm:$0xff] %v6252_v38 }
 0x431   :  { %v6254_v56 = vpop.trf.xlu0 }
 0x432   :  { %7860 = vst [vmem:[#allocation185_spill] sm:$0xff] %v6254_v56 }
 0x435   :  { %v6256_v57 = vpop.trf.xlu0 }
 0x436   :  { %7861 = vst [vmem:[#allocation186_spill] sm:$0xff] %v6256_v57 }
 0x439   :  { %v6258_v49 = vpop.trf.xlu0 }
 0x43a   :  { %7862 = vst [vmem:[#allocation187_spill] sm:$0xff] %v6258_v49 }
 0x43d   :  { %v6260_v16 = vpop.trf.xlu0 }
 0x43e   :  { %7863 = vst [vmem:[#allocation188_spill] sm:$0xff] %v6260_v16 }
 0x441   :  { %v6262_v59 = vpop.trf.xlu0 }
 0x442   :  { %7864 = vst [vmem:[#allocation189_spill] sm:$0xff] %v6262_v59 }
 0x445   :  { %s6264_s2 = spop %4211  ;;  %v6267_v56 = vpop.trf.xlu0 }
 0x446   :  { %v7600_v23 = vstv %s6264_s2  ;;  %7865 = vst [vmem:[#allocation190_spill] sm:$0xff] %v6267_v56 }
 0x447   :  { %v1507_v18 = vmul.f32 0.015625, %v7600_v23 }
 0x449   :  { %v1510_v52 = vmax.f32 %v1507_v18, 1e-08  ;;  %s6271_s6 = spop %4213  ;;  %v6276_v59 = vpop.trf.xlu0 }
 0x44a   :  { %v7602_v31 = vstv %s6271_s6  ;;  %7866 = vst [vmem:[#allocation191_spill] sm:$0xff] %v6276_v59 }
 0x44b   :  { %v1508_v19 = vmul.f32 0.015625, %v7602_v31  ;;  %4253 = vrsqrt.f32 %v1510_v52 }
 0x44d   :  { %v1509_v11 = vmax.f32 %v1508_v19, 1e-08  ;;  %v6278_v2 = vpop.trf.xlu0 }
 0x44e   :  { %7867 = vst [vmem:[#allocation192_spill] sm:$0xff] %v6278_v2 }
 0x44f   :  { %4255 = vrcp.f32 %v1509_v11 }
 0x451   :  { %v6280_v16 = vpop.trf.xlu0 }
 0x455   :  { %v4254_v35 = vpop.eup %4253  ;;  %v6282_v38 = vpop.trf.xlu0 }
 0x456   :  { %v1512_v23 = vmul.f32 0.25, %v4254_v35 }
 0x459   :  { %v4256_v56 = vpop.eup %4255  ;;  %v6287_v19 = vpop.trf.xlu0 }
 0x45a   :  { %v1514_v18 = vmul.f32 0.5, %v4256_v56 }
 0x45c   :  { %v1515_v49 = vadd.f32 %v1514_v18, %v1512_v23 }
 0x45d   :  { %v6290_v23 = vpop.trf.xlu0 }
 0x45e   :  { %v1516_v57 = vmul.f32 0.03125, %v1515_v49  ;;  %v1525_v49 = vmul.f32 0.2, %v6123_v17 }
 0x460   :  { %v1517_v39 = vmul.f32 %v1516_v57, %v6158_v61 }
 0x461   :  { %v6294_v2 = vpop.trf.xlu0 }
 0x462   :  { %v1518_v31 = vpack.c.bf16 %v1517_v39, %v1517_v39  ;;  %v1519_v59 = vrot.slane %v1517_v39, 4 }
 0x464   :  { %4208 = vmatprep.subr.msk.bf16.mxu0 %vm1584_vm5, %v1518_v31  ;;  %4073 = vmatmul.mubr.bf16.vlgmr.msra.gmra.mrb[20].mxu1 %v1518_v31  ;;  %v1586_v52 = vsel %vm1584_vm5, %v1518_v31, 0  ;;  %v1520_v11 = vadd.f32 %v1519_v59, %v1517_v39 }
 0x465   :  { %4039 = vmatpush3.bf16.msra.mxu0 %v1586_v52  ;;  %v6297_v6 = vpop.trf.xlu0  ;;  %4150 = vmatprep.mubr.msk.bf16.mxu1 %vm1559_vm6, %v6202_v50 }
 0x466   :  { %v1521_v35 = vrot.slane %v1520_v11, 2 }
 0x468   :  { %v1522_v56 = vadd.f32 %v1521_v35, %v1520_v11  ;;  %4041 = vmatmul.mubr.msk.bf16.vlgmr.msra.gmra.mrb[20].mxu0 %vm1559_vm6, %v6131_v1  ;;  %v1483_v1 = vpop.xlane.xlu1 %1482 }
 0x469   :  { %v6299_v31 = vpop.trf.xlu0  ;;  %4044 = vmatprep.mubr.msk.bf16.mxu0 %vm1559_vm6, %v6134_v14 }
 0x46a   :  { %v1523_v18 = vrot.slane %v1522_v56, 1 }
 0x46c   :  { %v1524_v61 = vadd.f32 %v1523_v18, %v1522_v56 }
 0x46d   :  { %v6309_v59 = vpop.trf.xlu0 }
 0x46e   :  { %v6292_v57 = vadd.f32 %v1525_v49, %v1524_v61 }
 0x470   :  { %2877 = vst [vmem:[#allocation20] sm:$0x1] %v6292_v57  ;;  %4045 = vmatmul.mubr.msk.bf16.gmra.mrb[24].mxu0 %vm1559_vm6, %v6136_v8  ;;  %v1496_v8 = vpop.xlane.xlu1 %1495 }
 0x471   :  { %4048 = vmatprep.mubr.msk.bf16.mxu0 %vm1559_vm6, %v6138_v53  ;;  %v6315_v39 = vpop.trf.xlu0  ;;  %v1497_v11 = vrot.slane %v1496_v8, 4 }
 0x472   :  { %7868 = vst [vmem:[#allocation193_spill] sm:$0xff] %v6315_v39 }
 0x473   :  { %v1498_v18 = vadd.f32 %v1497_v11, %v1496_v8 }
 0x475   :  { %v6317_v17 = vpop.trf.xlu0 }
 0x476   :  { %7869 = vst [vmem:[#allocation194_spill] sm:$0xff] %v6317_v17 }
 0x478   :  { %4049 = vmatmul.mubr.msk.bf16.gmra.mrb[28].mxu0 %vm1559_vm6, %v6140_v7  ;;  %v2882_v7 = vpop.xlane.xlu1 %2881 }
 0x479   :  { %4052 = vmatprep.mubr.msk.bf16.mxu0 %vm1559_vm6, %v6142_v3  ;;  %v6323_v50 = vpop.trf.xlu0  ;;  %v1484_v3 = vrot.slane %v1483_v1, 4  ;;  %v2883_v49 = vrot.slane %v2882_v7, 4 }
 0x47a   :  { %7870 = vst [vmem:[#allocation195_spill] sm:$0xff] %v6323_v50  ;;  %v1499_v50 = vrot.slane %v1498_v18, 2 }
 0x47b   :  { %v1485_v56 = vadd.f32 %v1484_v3, %v1483_v1 }
 0x47c   :  { %v2895_v35 = vpop.xlane.xlu1 %2894 }
 0x47d   :  { %v6329_v54 = vpop.trf.xlu0  ;;  %v1486_v61 = vrot.slane %v1485_v56, 2 }
 0x47e   :  { %7871 = vst [vmem:[#allocation196_spill] sm:$0xff] %v6329_v54  ;;  %v2884_v54 = vadd.f32 %v2883_v49, %v2882_v7 }
 0x480   :  { %4053 = vmatmul.mubr.msk.bf16.gmra.mrb[32].mxu0 %vm1559_vm6, %v6144_v34  ;;  %v2885_v24 = vrot.slane %v2884_v54, 2 }
 0x481   :  { %4078 = vmatprep.mubr.msk.bf16.mxu0 %vm1559_vm6, %v6149_v5  ;;  %v6331_v14 = vpop.trf.xlu0  ;;  %v2896_v5 = vrot.slane %v2895_v35, 4 }
 0x482   :  { %7872 = vst [vmem:[#allocation197_spill] sm:$0xff] %v6331_v14  ;;  %v2886_v4 = vadd.f32 %v2885_v24, %v2884_v54 }
 0x483   :  { %v2897_v17 = vadd.f32 %v2896_v5, %v2895_v35 }
 0x484   :  { %v2887_v11 = vrot.slane %v2886_v4, 1 }
 0x485   :  { %v6333_v53 = vpop.trf.xlu0  ;;  %v2898_v13 = vrot.slane %v2897_v17, 2 }
 0x486   :  { %7873 = vst [vmem:[#allocation198_spill] sm:$0xff] %v6333_v53  ;;  %v1487_v53 = vadd.f32 %v1486_v61, %v1485_v56  ;;  %v2888_v35 = vadd.f32 %v2887_v11, %v2886_v4 }
 0x487   :  { %v2899_v60 = vadd.f32 %v2898_v13, %v2897_v17 }
 0x488   :  { %v1488_v28 = vrot.slane %v1487_v53, 1 }
 0x489   :  { %v6335_v52 = vpop.trf.xlu0  ;;  %v2900_v49 = vrot.slane %v2899_v60, 1 }
 0x48a   :  { %7874 = vst [vmem:[#allocation199_spill] sm:$0xff] %v6335_v52  ;;  %v1500_v52 = vadd.f32 %v1499_v50, %v1498_v18  ;;  %v1489_v8 = vadd.f32 %v1488_v28, %v1487_v53  ;;  %v7900_v18 = vld [vmem:[#allocation178_spill] sm:$0xff] }
 0x48b   :  { %v2901_v56 = vadd.f32 %v2900_v49, %v2899_v60 }
 0x48c   :  { %v1501_v3 = vrot.slane %v1500_v52, 1 }
 0x48d   :  { %v6337_v34 = vpop.trf.xlu0 }
 0x48e   :  { %7875 = vst [vmem:[#allocation200_spill] sm:$0xff] %v6337_v34  ;;  %v1502_v7 = vadd.f32 %v1501_v3, %v1500_v52  ;;  %v3515_v52 = vand.u32 2147483647, %v6292_v57 }
 0x490   :  { %vm3516_vm9 = vcmp.lt.f32.partialorder %v3515_v52, inf }
 0x4b8   :  { %v1441_v14 = vpop.xlane.xlu0 %1440 }
 0x4b9   :  { %v1442_v39 = vrot.slane %v1441_v14, 4 }
 0x4bb   :  { %v1443_v36 = vadd.f32 %v1442_v39, %v1441_v14 }
 0x4bd   :  { %v1444_v10 = vrot.slane %v1443_v36, 2 }
 0x4bf   :  { %v1445_v1 = vadd.f32 %v1444_v10, %v1443_v36 }
 0x4c1   :  { %v1446_v34 = vrot.slane %v1445_v1, 1 }
 0x4c3   :  { %v1447_v20 = vadd.f32 %v1446_v34, %v1445_v1 }
 0x4c5   :  { %4217 = vpush %v1447_v20 }
 0x4c6   :  { %4219 = vpush %v1489_v8 }
 0x4c7   :  { %4221 = vpush %v1502_v7 }
 0x4c8   :  { %4223 = vpush %v2888_v35 }
 0x4c9   :  { %4225 = vpush %v2901_v56  ;;  %v7902_v56 = vld [vmem:[#allocation179_spill] sm:$0xff] }
 0x537   :  { %v1719_v39 = vpop.f32.mrb[20].mxu1 }
 0x538   :  { %v1726_v24 = vsel %vm1725_vm7, %v1719_v39, 0.0  ;;  %v4074_v10 = vpop.f32.mrb[21].mxu1 }
 0x539   :  { %v1727_v36 = vrot.slane %v1726_v24, 4  ;;  %v1735_v13 = vpack.c.bf16 %v1726_v24, %v1726_v24  ;;  %v1722_v17 = vpop.f32.mrb[22].mxu1  ;;  %v7884_v10 = vld [vmem:[#allocation181_spill] sm:$0xff] }
 0x53a   :  { %v4075_v28 = vpop.f32.mrb[23].mxu1 }
 0x53b   :  { %v1728_v50 = vadd.f32 %v1727_v36, %v1726_v24  ;;  %4209 = vmatprep.subr.msk.bf16.mxu0 %vm1584_vm5, %v1735_v13  ;;  %4210 = vmatprep.subr.msk.bf16.mxu1 %vm1584_vm5, %v1735_v13  ;;  %v2185_v20 = vsel %vm1584_vm5, %v1735_v13, 0  ;;  %v7885_v36 = vld [vmem:[#allocation35_spill] sm:$0xff] }
 0x53c   :  { %4077 = vmatpush3.bf16.msra.mxu0 %v2185_v20  ;;  %4207 = vmatpush3.bf16.msra.mxu1 %v2185_v20 }
 0x53d   :  { %v1729_v60 = vrot.slane %v1728_v50, 2 }
 0x53f   :  { %v1730_v4 = vadd.f32 %v1729_v60, %v1728_v50  ;;  %4079 = vmatmul.mubr.msk.bf16.vlgmr.msra.gmra.mrb[36].mxu0 %vm1559_vm6, %v6156_v47  ;;  %4151 = vmatmul.mubr.msk.bf16.vlgmr.msra.gmra.mrb[24].mxu1 %vm1559_vm6, %v6204_v21  ;;  %v7886_v50 = vld [vmem:[#allocation182_spill] sm:$0xff]  ;;  %v7887_v60 = vld [vmem:[#allocation36_spill] sm:$0xff] }
 0x540   :  { %4082 = vmatprep.mubr.msk.bf16.mxu0 %vm1559_vm6, %v6163_v9  ;;  %4154 = vmatprep.mubr.msk.bf16.mxu1 %vm1559_vm6, %v6206_v55  ;;  %v3517_v9 = vsel %vm3516_vm9, 0.0, %v7833_v58 }
 0x541   :  { %v1731_v54 = vrot.slane %v1730_v4, 1 }
 0x543   :  { %v1732_v14 = vadd.f32 %v1731_v54, %v1730_v4  ;;  %v7888_v4 = vld [vmem:[#allocation91_spill] sm:$0xff]  ;;  %v7889_v54 = vld [vmem:[#allocation165_spill] sm:$0xff] }
 0x545   :  { %v1734_v53 = vadd.f32 %v1733_v32, %v1732_v14  ;;  %v1535_v32 = vmul.f32 0.2, %v7888_v4  ;;  %v1538_v14 = vmul.f32 0.2, %v7889_v54  ;;  %v7907_v4 = vld [vmem:[#allocation170_spill] sm:$0xff] }
 0x547   :  { %4083 = vmatmul.mubr.msk.bf16.gmra.mrb[40].mxu0 %vm1559_vm6, %v6165_v48  ;;  %v3426_v47 = vand.u32 2147483647, %v1734_v53  ;;  %2860 = vst [vmem:[#allocation17] sm:$0x1] %v1734_v53  ;;  %4155 = vmatmul.mubr.msk.bf16.gmra.mrb[28].mxu1 %vm1559_vm6, %v6208_v26  ;;  %v3518_v26 = vsel %vm1438_vm1, %v3517_v9, 0.0 }
 0x548   :  { %4086 = vmatprep.mubr.msk.bf16.mxu0 %vm1559_vm6, %v6167_v30  ;;  %4158 = vmatprep.mubr.msk.bf16.mxu1 %vm1559_vm6, %v6280_v16  ;;  %v1529_v48 = vmul.f32 0.2, %v5985_v62  ;;  %v4042_v30 = vpop.f32.mrb[20].mxu0 }
 0x549   :  { %vm3427_vm8 = vcmp.lt.f32.partialorder %v3426_v47, inf }
 0x54a   :  { %v3428_v21 = vsel %vm3427_vm8, 0.0, %v7833_v58  ;;  %v1631_v16 = vadd.f32 %v4042_v30, %v1529_v48 }
 0x54b   :  { %v3429_v55 = vsel %vm1438_vm1, %v3428_v21, 0.0  ;;  %v7890_v21 = vld [vmem:[#allocation164_spill] sm:$0xff] }
 0x54c   :  { %3430 = vadd.xlane.f32.xlu0 %v3429_v55  ;;  %2863 = vst [vmem:[#allocation18 + $0x10] sm:$0xff] %v1631_v16  ;;  %v1536_v55 = vmul.f32 0.2, %v7890_v21 }
 0x54f   :  { %4087 = vmatmul.mubr.msk.bf16.gmra.mrb[44].mxu0 %vm1559_vm6, %v6169_v27  ;;  %4159 = vmatmul.mubr.msk.bf16.gmra.mrb[32].mxu1 %vm1559_vm6, %v6282_v38  ;;  %v1622_v27 = vpop.f32.mrb[21].mxu0 }
 0x550   :  { %3519 = vadd.xlane.f32.xlu0 %v3518_v26  ;;  %4090 = vmatprep.mubr.msk.bf16.mxu0 %vm1559_vm6, %v6171_v22  ;;  %v1530_v22 = vmul.f32 0.2, %v5993_v42  ;;  %v1532_v42 = vmul.f32 0.2, %v6013_v33 }
 0x551   :  { %4162 = vmatprep.mubr.msk.bf16.mxu1 %vm1559_vm6, %v6287_v19 }
 0x557   :  { %4091 = vmatmul.mubr.msk.bf16.gmra.mrb[48].mxu0 %vm1559_vm6, %v6173_v40  ;;  %4163 = vmatmul.mubr.msk.bf16.gmra.mrb[36].mxu1 %vm1559_vm6, %v6290_v23  ;;  %v1528_v40 = vmul.f32 0.2, %v5973_v46  ;;  %v3443_v46 = vand.u32 2147483647, %v1631_v16  ;;  %v7893_v16 = vld [vmem:[#allocation123_spill] sm:$0xff] }
 0x558   :  { %4094 = vmatprep.mubr.msk.bf16.mxu0 %vm1559_vm6, %v6217_v25  ;;  %4166 = vmatprep.mubr.msk.bf16.mxu1 %vm1559_vm6, %v6294_v2  ;;  %v1527_v25 = vmul.f32 0.2, %v5970_v43 }
 0x559   :  { %vm6406_vm10 = vcmp.lt.f32.partialorder %v3443_v46, inf  ;;  %v7896_v46 = vld [vmem:[#allocation121_spill] sm:$0xff] }
 0x55a   :  { %v1623_v38 = vadd.f32 %v1622_v27, %v1527_v25  ;;  %v3475_v1 = vsel %vm6406_vm10, 0.0, %v7833_v58 }
 0x55c   :  { %2861 = vst [vmem:[#allocation18] sm:$0xff] %v1623_v38 }
 0x55f   :  { %4095 = vmatmul.mubr.msk.bf16.gmra.mrb[52].mxu0 %vm1559_vm6, %v6221_v41  ;;  %4167 = vmatmul.mubr.msk.bf16.gmra.mrb[40].mxu1 %vm1559_vm6, %v6297_v6  ;;  %v4043_v41 = vpop.f32.mrb[22].mxu0  ;;  %v1533_v6 = vmul.f32 0.2, %v6025_v29 }
 0x560   :  { %4098 = vmatprep.mubr.msk.bf16.mxu0 %vm1559_vm6, %v6225_v45  ;;  %4170 = vmatprep.mubr.msk.bf16.mxu1 %vm1559_vm6, %v6299_v31  ;;  %v1531_v45 = vmul.f32 0.2, %v6005_v51  ;;  %v1634_v62 = vadd.f32 %v4043_v41, %v1530_v22  ;;  %v1625_v43 = vpop.f32.mrb[23].mxu0  ;;  %v3441_v51 = vand.u32 2147483647, %v1623_v38  ;;  %v7894_v41 = vld [vmem:[#allocation166_spill] sm:$0xff] }
 0x561   :  { %v1626_v29 = vadd.f32 %v1625_v43, %v1528_v40  ;;  %v1541_v38 = vmul.f32 0.2, %v7893_v16  ;;  %v7919_v16 = vld [vmem:[#allocation198_spill] sm:$0xff] }
 0x562   :  { %2864 = vst [vmem:[#allocation18 + $0x18] sm:$0xff] %v1634_v62  ;;  %v3444_v2 = vand.u32 2147483647, %v1634_v62  ;;  %vm3457_vm11 = vcmp.lt.f32.partialorder %v3441_v51, inf  ;;  %v1540_v51 = vmul.f32 0.2, %v7896_v46 }
 0x563   :  { %2862 = vst [vmem:[#allocation18 + $0x8] sm:$0xff] %v1626_v29  ;;  %v3473_v31 = vsel %vm3457_vm11, 0.0, %v7833_v58  ;;  %v7928_v46 = vld [vmem:[#allocation173_spill] sm:$0xff] }
 0x564   :  { %vm6411_vm12 = vcmp.lt.f32.partialorder %v3444_v2, inf }
 0x565   :  { %v3476_v13 = vsel %vm6411_vm12, 0.0, %v7833_v58 }
 0x567   :  { %4099 = vmatmul.mubr.msk.bf16.gmra.mrb[56].mxu0 %vm1559_vm6, %v6233_v44  ;;  %4171 = vmatmul.mubr.msk.bf16.gmra.mrb[44].mxu1 %vm1559_vm6, %v6309_v59  ;;  %v4046_v44 = vpop.f32.mrb[24].mxu0 }
 0x568   :  { %4102 = vmatprep.mubr.msk.bf16.mxu0 %vm1559_vm6, %v6239_v0  ;;  %4174 = vmatprep.mubr.msk.bf16.mxu1 %vm1559_vm6, %v6210_v12  ;;  %v1647_v19 = vadd.f32 %v4046_v44, %v1533_v6  ;;  %v1638_v23 = vpop.f32.mrb[25].mxu0  ;;  %v3442_v0 = vand.u32 2147483647, %v1626_v29  ;;  %v1539_v6 = vmul.f32 0.2, %v7894_v41  ;;  %v7921_v41 = vld [vmem:[#allocation199_spill] sm:$0xff] }
 0x569   :  { %v1639_v12 = vadd.f32 %v1638_v23, %v1531_v45  ;;  %v4047_v57 = vpop.f32.mrb[26].mxu0 }
 0x56a   :  { %2867 = vst [vmem:[#allocation18 + $0x30] sm:$0xff] %v1647_v19  ;;  %v3447_v59 = vand.u32 2147483647, %v1647_v19  ;;  %v1641_v34 = vpop.f32.mrb[27].mxu0  ;;  %vm3458_vm13 = vcmp.lt.f32.partialorder %v3442_v0, inf  ;;  %v1650_v5 = vadd.f32 %v4047_v57, %v1534_v63  ;;  %v7895_v63 = vld [vmem:[#allocation124_spill] sm:$0xff] }
 0x56b   :  { %2865 = vst [vmem:[#allocation18 + $0x20] sm:$0xff] %v1639_v12  ;;  %v3445_v15 = vand.u32 2147483647, %v1639_v12  ;;  %v4050_v61 = vpop.f32.mrb[28].mxu0  ;;  %v3474_v3 = vsel %vm3458_vm13, 0.0, %v7833_v58  ;;  %v1642_v8 = vadd.f32 %v1641_v34, %v1532_v42  ;;  %v7897_v0 = vld [vmem:[#allocation184_spill] sm:$0xff] }
 0x56c   :  { %v6419_v11 = vadd.f32 %v4050_v61, %v1537_v37  ;;  %v1654_v7 = vpop.f32.mrb[29].mxu0  ;;  %v3489_v49 = vadd.f32 %v3474_v3, %v3473_v31  ;;  %vm6421_vm14 = vcmp.lt.f32.partialorder %v3447_v59, inf  ;;  %2868 = vst [vmem:[#allocation18 + $0x38] sm:$0xff] %v1650_v5  ;;  %v3448_v39 = vand.u32 2147483647, %v1650_v5  ;;  %v7898_v12 = vld [vmem:[#allocation177_spill] sm:$0xff] }
 0x56d   :  { %vm6425_vm15 = vcmp.lt.f32.partialorder %v3445_v15, inf  ;;  %v4051_v24 = vpop.f32.mrb[30].mxu0  ;;  %2866 = vst [vmem:[#allocation18 + $0x28] sm:$0xff] %v1642_v8  ;;  %v3446_v17 = vand.u32 2147483647, %v1642_v8  ;;  %v3479_v52 = vsel %vm6421_vm14, 0.0, %v7833_v58  ;;  %v1655_v25 = vadd.f32 %v1654_v7, %v1535_v32 }
 0x56e   :  { %2871 = vst [vmem:[#allocation18 + $0x50] sm:$0xff] %v6419_v11  ;;  %v1657_v28 = vpop.f32.mrb[31].mxu0  ;;  %v3490_v20 = vadd.f32 %v3489_v49, %v3475_v1  ;;  %v3477_v47 = vsel %vm6425_vm15, 0.0, %v7833_v58  ;;  %vm6450_vm1 = vcmp.lt.f32.partialorder %v3448_v39, inf  ;;  %v1666_v22 = vadd.f32 %v4051_v24, %v1538_v14  ;;  %v7899_v31 = vld [vmem:[#allocation167_spill] sm:$0xff]  ;;  %v7901_v49 = vld [vmem:[#allocation168_spill] sm:$0xff] }
 0x56f   :  { %4103 = vmatmul.mubr.msk.bf16.gmra.mrb[60].mxu0 %vm1559_vm6, %v7884_v10  ;;  %4175 = vmatmul.mubr.msk.bf16.gmra.mrb[48].mxu1 %vm1559_vm6, %v7885_v36  ;;  %v4054_v53 = vpop.f32.mrb[32].mxu0  ;;  %vm3462_vm0 = vcmp.lt.f32.partialorder %v3446_v17, inf  ;;  %v1658_v40 = vadd.f32 %v1657_v28, %v1536_v55  ;;  %2869 = vst [vmem:[#allocation18 + $0x40] sm:$0xff] %v1655_v25  ;;  %v3449_v43 = vand.u32 2147483647, %v1655_v25  ;;  %v3480_v57 = vsel %vm6450_vm1, 0.0, %v7833_v58 }
 0x570   :  { %4106 = vmatprep.mubr.msk.bf16.mxu0 %vm1559_vm6, %v7886_v50  ;;  %4178 = vmatprep.mubr.msk.bf16.mxu1 %vm1559_vm6, %v7887_v60  ;;  %v1670_v9 = vpop.f32.mrb[33].mxu0  ;;  %v3491_v26 = vadd.f32 %v3490_v20, %v3476_v13  ;;  %v3478_v30 = vsel %vm3462_vm0, 0.0, %v7833_v58  ;;  %v1542_v42 = vmul.f32 0.2, %v7895_v63  ;;  %v3451_v29 = vand.u32 2147483647, %v6419_v11 }
 0x571   :  { %v4055_v27 = vpop.f32.mrb[34].mxu0  ;;  %2872 = vst [vmem:[#allocation18 + $0x58] sm:$0xff] %v1666_v22  ;;  %2870 = vst [vmem:[#allocation18 + $0x48] sm:$0xff] %v1658_v40  ;;  %v3450_v44 = vand.u32 2147483647, %v1658_v40  ;;  %v1679_v2 = vadd.f32 %v4054_v53, %v1541_v38  ;;  %v1671_v19 = vadd.f32 %v1670_v9, %v1539_v6  ;;  %vm3465_vm2 = vcmp.lt.f32.partialorder %v3449_v43, inf }
 0x572   :  { %v1673_v45 = vpop.f32.mrb[35].mxu0  ;;  %v3492_v62 = vadd.f32 %v3491_v26, %v3477_v47  ;;  %v1682_v37 = vadd.f32 %v4055_v27, %v1542_v42  ;;  %v3452_v34 = vand.u32 2147483647, %v1666_v22  ;;  %v3481_v15 = vsel %vm3465_vm2, 0.0, %v7833_v58  ;;  %v7903_v39 = vld [vmem:[#allocation32_spill] sm:$0xff]  ;;  %v7905_v20 = vld [vmem:[#allocation169_spill] sm:$0xff] }
 0x573   :  { %v1674_v33 = vadd.f32 %v1673_v45, %v1540_v51  ;;  %2875 = vst [vmem:[#allocation18 + $0x70] sm:$0xff] %v1679_v2  ;;  %2873 = vst [vmem:[#allocation18 + $0x60] sm:$0xff] %v1671_v19  ;;  %vm3466_vm3 = vcmp.lt.f32.partialorder %v3450_v44, inf  ;;  %vm3467_vm4 = vcmp.lt.f32.partialorder %v3451_v29, inf  ;;  %v3453_v61 = vand.u32 2147483647, %v1671_v19 }
 0x574   :  { %v3493_v23 = vadd.f32 %v3492_v62, %v3478_v30  ;;  %2876 = vst [vmem:[#allocation18 + $0x78] sm:$0xff] %v1682_v37  ;;  %v3482_v1 = vsel %vm3466_vm3, 0.0, %v7833_v58  ;;  %vm3468_vm5 = vcmp.lt.f32.partialorder %v3452_v34, inf  ;;  %v3483_v11 = vsel %vm3467_vm4, 0.0, %v7833_v58  ;;  %v7904_v10 = vld [vmem:[#allocation180_spill] sm:$0xff]  ;;  %v7906_v60 = vld [vmem:[#allocation183_spill] sm:$0xff] }
 0x575   :  { %2874 = vst [vmem:[#allocation18 + $0x68] sm:$0xff] %v1674_v33  ;;  %v3454_v8 = vand.u32 2147483647, %v1674_v33  ;;  %vm3469_vm7 = vcmp.lt.f32.partialorder %v3453_v61, inf  ;;  %v3484_v35 = vsel %vm3468_vm5, 0.0, %v7833_v58  ;;  %v7908_v32 = vld [vmem:[#allocation193_spill] sm:$0xff] }
 0x576   :  { %v3494_v59 = vadd.f32 %v3493_v23, %v3479_v52  ;;  %v3485_v36 = vsel %vm3469_vm7, 0.0, %v7833_v58  ;;  %v3455_v54 = vand.u32 2147483647, %v1679_v2  ;;  %v3456_v14 = vand.u32 2147483647, %v1682_v37  ;;  %v7909_v53 = vld [vmem:[#allocation171_spill] sm:$0xff] }
 0x577   :  { %4107 = vmatmul.mubr.msk.bf16.gmra.mrb[64].mxu0 %vm1559_vm6, %v7897_v0  ;;  %4179 = vmatmul.mubr.msk.bf16.gmra.mrb[52].mxu1 %vm1559_vm6, %v7898_v12  ;;  %vm3470_vm8 = vcmp.lt.f32.partialorder %v3454_v8, inf  ;;  %v7910_v52 = vld [vmem:[#allocation194_spill] sm:$0xff]  ;;  %v7911_v47 = vld [vmem:[#allocation172_spill] sm:$0xff]  ;;  %v7912_v55 = vld [vmem:[#allocation195_spill] sm:$0xff] }
 0x578   :  { %4110 = vmatprep.mubr.msk.bf16.mxu0 %vm1559_vm6, %v7899_v31  ;;  %4182 = vmatprep.mubr.msk.bf16.mxu1 %vm1559_vm6, %v7900_v18  ;;  %v3495_v5 = vadd.f32 %v3494_v59, %v3480_v57  ;;  %v3486_v17 = vsel %vm3470_vm8, 0.0, %v7833_v58  ;;  %vm3471_vm9 = vcmp.lt.f32.partialorder %v3455_v54, inf  ;;  %vm3472_vm10 = vcmp.lt.f32.partialorder %v3456_v14, inf  ;;  %v7914_v30 = vld [vmem:[#allocation33_spill] sm:$0xff]  ;;  %v7915_v25 = vld [vmem:[#allocation196_spill] sm:$0xff]  ;;  %v7918_v40 = vld [vmem:[#allocation186_spill] sm:$0xff] }
 0x579   :  { %v3487_v21 = vsel %vm3471_vm9, 0.0, %v7833_v58  ;;  %v3488_v26 = vsel %vm3472_vm10, 0.0, %v7833_v58  ;;  %v7916_v27 = vld [vmem:[#allocation185_spill] sm:$0xff]  ;;  %v7920_v38 = vld [vmem:[#allocation187_spill] sm:$0xff]  ;;  %v7922_v6 = vld [vmem:[#allocation188_spill] sm:$0xff] }
 0x57a   :  { %v3496_v3 = vadd.f32 %v3495_v5, %v3481_v15  ;;  %v7917_v22 = vld [vmem:[#allocation197_spill] sm:$0xff]  ;;  %v7923_v45 = vld [vmem:[#allocation200_spill] sm:$0xff]  ;;  %v7925_v43 = vld [vmem:[#allocation190_spill] sm:$0xff] }
 0x57b   :  { %v7924_v62 = vld [vmem:[#allocation189_spill] sm:$0xff]  ;;  %v7926_v63 = vld [vmem:[#allocation191_spill] sm:$0xff]  ;;  %v7927_v42 = vld [vmem:[#allocation192_spill] sm:$0xff] }
 0x57c   :  { %v3497_v7 = vadd.f32 %v3496_v3, %v3482_v1  ;;  %v7929_v51 = vld [vmem:[#allocation174_spill] sm:$0xff]  ;;  %v7930_v29 = vld [vmem:[#allocation175_spill] sm:$0xff]  ;;  %v7931_v44 = vld [vmem:[#allocation176_spill] sm:$0xff] }
 0x57d   :  { %v7932_v2 = vld [vmem:[#allocation54_spill] sm:$0xff]  ;;  %v7933_v23 = vld [vmem:[#allocation28_spill] sm:$0xff]  ;;  %v7934_v33 = vld [vmem:[#allocation55_spill] sm:$0xff] }
 0x57e   :  { %v3498_v24 = vadd.f32 %v3497_v7, %v3483_v11  ;;  %v1738_v19 = vmul.f32 0.2, %v7932_v2  ;;  %v1736_v37 = vmul.f32 0.2, %v7933_v23  ;;  %v1739_v0 = vmul.f32 0.2, %v7934_v33 }
 0x57f   :  { %4111 = vmatmul.mubr.msk.bf16.gmra.mrb[68].mxu0 %vm1559_vm6, %v7901_v49  ;;  %4183 = vmatmul.mubr.msk.bf16.gmra.mrb[56].mxu1 %vm1559_vm6, %v7902_v56  ;;  %v7935_v57 = vld [vmem:[#allocation29_spill] sm:$0xff]  ;;  %v7936_v11 = vld [vmem:[#allocation58_spill] sm:$0xff]  ;;  %v7937_v49 = vld [vmem:[#allocation56_spill] sm:$0xff] }
 0x580   :  { %4114 = vmatprep.mubr.msk.bf16.mxu0 %vm1559_vm6, %v7903_v39  ;;  %4186 = vmatprep.mubr.msk.bf16.mxu1 %vm1559_vm6, %v7904_v10  ;;  %v3499_v13 = vadd.f32 %v3498_v24, %v3484_v35  ;;  %v1737_v31 = vmul.f32 0.2, %v7935_v57  ;;  %v1742_v7 = vmul.f32 0.2, %v7936_v11  ;;  %v1740_v35 = vmul.f32 0.2, %v7937_v49 }
 0x581   :  { %v7938_v24 = vld [vmem:[#allocation59_spill] sm:$0xff] }
 0x582   :  { %v3500_v28 = vadd.f32 %v3499_v13, %v3485_v36  ;;  %v1743_v10 = vmul.f32 0.2, %v7938_v24  ;;  %v7939_v13 = vld [vmem:[#allocation57_spill] sm:$0xff] }
 0x583   :  { %v7950_v24 = vld [vmem:[#allocation53_spill] sm:$0xff] }
 0x584   :  { %v3501_v50 = vadd.f32 %v3500_v28, %v3486_v17  ;;  %v1741_v17 = vmul.f32 0.2, %v7939_v13 }
 0x586   :  { %v3502_v9 = vadd.f32 %v3501_v50, %v3487_v21 }
 0x587   :  { %4115 = vmatmul.mubr.msk.bf16.gmra.mrb[72].mxu0 %vm1559_vm6, %v7905_v20  ;;  %4187 = vmatmul.mubr.msk.bf16.gmra.mrb[60].mxu1 %vm1559_vm6, %v7906_v60 }
 0x588   :  { %4118 = vmatprep.mubr.msk.bf16.mxu0 %vm1559_vm6, %v7907_v4  ;;  %4190 = vmatprep.mubr.msk.bf16.mxu1 %vm1559_vm6, %v7908_v32  ;;  %v6503_v48 = vadd.f32 %v3502_v9, %v3488_v26 }
 0x58a   :  { %7913 = vst [vmem:[#allocation181_spill] sm:$0xff] %v6503_v48 }
 0x58f   :  { %4119 = vmatmul.mubr.msk.bf16.gmra.mrb[76].mxu0 %vm1559_vm6, %v7909_v53  ;;  %4191 = vmatmul.mubr.msk.bf16.gmra.mrb[64].mxu1 %vm1559_vm6, %v7910_v52 }
 0x590   :  { %4122 = vmatprep.mubr.msk.bf16.mxu0 %vm1559_vm6, %v7911_v47  ;;  %4194 = vmatprep.mubr.msk.bf16.mxu1 %vm1559_vm6, %v7912_v55 }
 0x597   :  { %4123 = vmatmul.mubr.msk.bf16.gmra.mrb[80].mxu0 %vm1559_vm6, %v7914_v30  ;;  %4195 = vmatmul.mubr.msk.bf16.gmra.mrb[68].mxu1 %vm1559_vm6, %v7915_v25  ;;  %v7940_v30 = vld [vmem:[#allocation62_spill] sm:$0xff] }
 0x598   :  { %4126 = vmatprep.mubr.msk.bf16.mxu0 %vm1559_vm6, %v7916_v27  ;;  %4198 = vmatprep.mubr.msk.bf16.mxu1 %vm1559_vm6, %v7917_v22  ;;  %v1746_v25 = vmul.f32 0.2, %v7940_v30  ;;  %v7941_v27 = vld [vmem:[#allocation60_spill] sm:$0xff] }
 0x599   :  { %v1744_v22 = vmul.f32 0.2, %v7941_v27 }
 0x59f   :  { %4127 = vmatmul.mubr.msk.bf16.gmra.mrb[84].mxu0 %vm1559_vm6, %v7918_v40  ;;  %4199 = vmatmul.mubr.msk.bf16.gmra.mrb[72].mxu1 %vm1559_vm6, %v7919_v16 }
 0x5a0   :  { %4130 = vmatprep.mubr.msk.bf16.mxu0 %vm1559_vm6, %v7920_v38  ;;  %4202 = vmatprep.mubr.msk.bf16.mxu1 %vm1559_vm6, %v7921_v41 }
 0x5a7   :  { %4131 = vmatmul.mubr.msk.bf16.gmra.mrb[88].mxu0 %vm1559_vm6, %v7922_v6  ;;  %4203 = vmatmul.mubr.msk.bf16.gmra.mrb[76].mxu1 %vm1559_vm6, %v7923_v45  ;;  %v7942_v6 = vld [vmem:[#allocation63_spill] sm:$0xff] }
 0x5a8   :  { %4134 = vmatprep.mubr.msk.bf16.mxu0 %vm1559_vm6, %v7924_v62  ;;  %v1747_v45 = vmul.f32 0.2, %v7942_v6 }
 0x5af   :  { %4135 = vmatmul.mubr.msk.bf16.gmra.mrb[92].mxu0 %vm1559_vm6, %v7925_v43 }
 0x5b0   :  { %4138 = vmatprep.mubr.msk.bf16.mxu0 %vm1559_vm6, %v7926_v63  ;;  %v7943_v63 = vld [vmem:[#allocation61_spill] sm:$0xff] }
 0x5b7   :  { %4139 = vmatmul.mubr.msk.bf16.gmra.mrb[96].mxu0 %vm1559_vm6, %v7927_v42  ;;  %v1745_v42 = vmul.f32 0.2, %v7943_v63 }
 0x5b8   :  { %4142 = vmatprep.mubr.msk.bf16.mxu0 %vm1559_vm6, %v7928_v46 }
 0x5bf   :  { %4143 = vmatmul.mubr.msk.bf16.gmra.mrb[100].mxu0 %vm1559_vm6, %v7929_v51 }
 0x5c0   :  { %4146 = vmatprep.mubr.msk.bf16.mxu0 %vm1559_vm6, %v7930_v29 }
 0x5c7   :  { %4147 = vmatmul.mubr.msk.bf16.gmra.mrb[104].mxu0 %vm1559_vm6, %v7931_v44  ;;  %v7944_v44 = vld [vmem:[#allocation66_spill] sm:$0xff] }
 0x5c8   :  { %v1750_v2 = vmul.f32 0.2, %v7944_v44  ;;  %v7959_v44 = vld [vmem:[#allocation68_spill] sm:$0xff] }
 0x612   :  { %v4080_v12 = vpop.f32.mrb[36].mxu0 }
 0x613   :  { %v2230_v59 = vadd.f32 %v4080_v12, %v1738_v19  ;;  %v2221_v34 = vpop.f32.mrb[37].mxu0  ;;  %v4152_v19 = vpop.f32.mrb[24].mxu1 }
 0x614   :  { %v2222_v18 = vadd.f32 %v2221_v34, %v1736_v37  ;;  %v4081_v15 = vpop.f32.mrb[38].mxu0  ;;  %v2509_v57 = vpop.f32.mrb[25].mxu1 }
 0x615   :  { %2734 = vst [vmem:[#allocation15 + $0x10] sm:$0xff] %v2230_v59  ;;  %v2233_v5 = vadd.f32 %v4081_v15, %v1739_v0  ;;  %v2224_v61 = vpop.f32.mrb[39].mxu0  ;;  %v2907_v1 = vand.u32 2147483647, %v2230_v59 }
 0x616   :  { %2732 = vst [vmem:[#allocation15] sm:$0xff] %v2222_v18  ;;  %v2905_v3 = vand.u32 2147483647, %v2222_v18  ;;  %v2225_v8 = vadd.f32 %v2224_v61, %v1737_v31  ;;  %v7947_v18 = vld [vmem:[#allocation52_spill] sm:$0xff] }
 0x617   :  { %2735 = vst [vmem:[#allocation15 + $0x18] sm:$0xff] %v2233_v5  ;;  %v2908_v56 = vand.u32 2147483647, %v2233_v5  ;;  %vm3035_vm11 = vcmp.lt.f32.partialorder %v2907_v1, inf  ;;  %v1810_v15 = vmul.f32 0.2, %v7947_v18 }
 0x618   :  { %vm3033_vm6 = vcmp.lt.f32.partialorder %v2905_v3, inf  ;;  %2733 = vst [vmem:[#allocation15 + $0x8] sm:$0xff] %v2225_v8  ;;  %v2906_v39 = vand.u32 2147483647, %v2225_v8  ;;  %v3163_v14 = vsel %vm3035_vm11, 0.0, %v7833_v58  ;;  %v4153_v5 = vpop.f32.mrb[26].mxu1 }
 0x619   :  { %v3161_v28 = vsel %vm3033_vm6, 0.0, %v7833_v58  ;;  %vm3036_vm13 = vcmp.lt.f32.partialorder %v2908_v56, inf  ;;  %v7948_v8 = vld [vmem:[#allocation131_spill] sm:$0xff] }
 0x61a   :  { %vm3034_vm12 = vcmp.lt.f32.partialorder %v2906_v39, inf  ;;  %v4084_v36 = vpop.f32.mrb[40].mxu0  ;;  %v3164_v26 = vsel %vm3036_vm13, 0.0, %v7833_v58  ;;  %v1808_v11 = vmul.f32 0.2, %v7948_v8  ;;  %v2518_v39 = vadd.f32 %v4152_v19, %v1810_v15 }
 0x61b   :  { %v3162_v50 = vsel %vm3034_vm12, 0.0, %v7833_v58  ;;  %v2246_v20 = vadd.f32 %v4084_v36, %v1742_v7  ;;  %v2237_v60 = vpop.f32.mrb[41].mxu0  ;;  %v2512_v7 = vpop.f32.mrb[27].mxu1 }
 0x61c   :  { %v3289_v4 = vadd.f32 %v3162_v50, %v3161_v28  ;;  %v2238_v32 = vadd.f32 %v2237_v60, %v1740_v35  ;;  %v4085_v54 = vpop.f32.mrb[42].mxu0  ;;  %v7949_v35 = vld [vmem:[#allocation64_spill] sm:$0xff]  ;;  %v7951_v50 = vld [vmem:[#allocation67_spill] sm:$0xff]  ;;  %v7952_v60 = vld [vmem:[#allocation65_spill] sm:$0xff]  ;;  %2806 = vst [vmem:[#allocation15 + $0x250] sm:$0xff] %v2518_v39 }
 0x61d   :  { %2738 = vst [vmem:[#allocation15 + $0x30] sm:$0xff] %v2246_v20  ;;  %v2911_v53 = vand.u32 2147483647, %v2246_v20  ;;  %v2249_v52 = vadd.f32 %v4085_v54, %v1743_v10  ;;  %v2240_v47 = vpop.f32.mrb[43].mxu0  ;;  %v1748_v56 = vmul.f32 0.2, %v7949_v35 }
 0x61e   :  { %v3290_v21 = vadd.f32 %v3289_v4, %v3163_v14  ;;  %2736 = vst [vmem:[#allocation15 + $0x20] sm:$0xff] %v2238_v32  ;;  %v2909_v55 = vand.u32 2147483647, %v2238_v32  ;;  %v2241_v9 = vadd.f32 %v2240_v47, %v1741_v17  ;;  %v1811_v10 = vmul.f32 0.2, %v7950_v24 }
 0x61f   :  { %2739 = vst [vmem:[#allocation15 + $0x38] sm:$0xff] %v2249_v52  ;;  %v2912_v16 = vand.u32 2147483647, %v2249_v52  ;;  %vm3039_vm15 = vcmp.lt.f32.partialorder %v2911_v53, inf  ;;  %v1751_v20 = vmul.f32 0.2, %v7951_v50  ;;  %v2510_v32 = vadd.f32 %v2509_v57, %v1808_v11 }
 0x620   :  { %v3291_v40 = vadd.f32 %v3290_v21, %v3164_v26  ;;  %vm3037_vm14 = vcmp.lt.f32.partialorder %v2909_v55, inf  ;;  %2737 = vst [vmem:[#allocation15 + $0x28] sm:$0xff] %v2241_v9  ;;  %v2910_v38 = vand.u32 2147483647, %v2241_v9  ;;  %v3167_v23 = vsel %vm3039_vm15, 0.0, %v7833_v58  ;;  %v4156_v9 = vpop.f32.mrb[28].mxu1 }
 0x621   :  { %v3165_v41 = vsel %vm3037_vm14, 0.0, %v7833_v58  ;;  %vm6561_vm1 = vcmp.lt.f32.partialorder %v2912_v16, inf  ;;  %v1749_v4 = vmul.f32 0.2, %v7952_v60  ;;  %v2521_v52 = vadd.f32 %v4153_v5, %v1811_v10  ;;  %2804 = vst [vmem:[#allocation15 + $0x240] sm:$0xff] %v2510_v32  ;;  %v7960_v57 = vld [vmem:[#allocation71_spill] sm:$0xff] }
 0x622   :  { %v3292_v62 = vadd.f32 %v3291_v40, %v3165_v41  ;;  %vm3038_vm0 = vcmp.lt.f32.partialorder %v2910_v38, inf  ;;  %v4088_v43 = vpop.f32.mrb[44].mxu0  ;;  %v3168_v49 = vsel %vm6561_vm1, 0.0, %v7833_v58  ;;  %v7957_v41 = vld [vmem:[#allocation51_spill] sm:$0xff] }
 0x623   :  { %v3166_v46 = vsel %vm3038_vm0, 0.0, %v7833_v58  ;;  %v2262_v51 = vadd.f32 %v4088_v43, %v1746_v25  ;;  %v2253_v29 = vpop.f32.mrb[45].mxu0  ;;  %2807 = vst [vmem:[#allocation15 + $0x258] sm:$0xff] %v2521_v52  ;;  %v1809_v6 = vmul.f32 0.2, %v7957_v41  ;;  %v7968_v60 = vld [vmem:[#allocation135_spill] sm:$0xff] }
 0x624   :  { %v3293_v33 = vadd.f32 %v3292_v62, %v3166_v46  ;;  %v2254_v0 = vadd.f32 %v2253_v29, %v1744_v22  ;;  %v4089_v12 = vpop.f32.mrb[46].mxu0  ;;  %v2525_v22 = vpop.f32.mrb[29].mxu1 }
 0x625   :  { %2742 = vst [vmem:[#allocation15 + $0x50] sm:$0xff] %v2262_v51  ;;  %v2915_v31 = vand.u32 2147483647, %v2262_v51  ;;  %v2265_v59 = vadd.f32 %v4089_v12, %v1747_v45  ;;  %v2256_v34 = vpop.f32.mrb[47].mxu0  ;;  %v7958_v51 = vld [vmem:[#allocation70_spill] sm:$0xff]  ;;  %v2513_v19 = vadd.f32 %v2512_v7, %v1809_v6  ;;  %v7965_v7 = vld [vmem:[#allocation132_spill] sm:$0xff] }
 0x626   :  { %v3294_v61 = vadd.f32 %v3293_v33, %v3167_v23  ;;  %2740 = vst [vmem:[#allocation15 + $0x40] sm:$0xff] %v2254_v0  ;;  %v2913_v1 = vand.u32 2147483647, %v2254_v0  ;;  %v2257_v3 = vadd.f32 %v2256_v34, %v1745_v42  ;;  %v4157_v42 = vpop.f32.mrb[30].mxu1  ;;  %v1754_v29 = vmul.f32 0.2, %v7958_v51 }
 0x627   :  { %2743 = vst [vmem:[#allocation15 + $0x58] sm:$0xff] %v2265_v59  ;;  %v2916_v13 = vand.u32 2147483647, %v2265_v59  ;;  %vm6575_vm3 = vcmp.lt.f32.partialorder %v2915_v31, inf  ;;  %v6593_v23 = vpop.f32.mrb[31].mxu1  ;;  %v7961_v59 = vld [vmem:[#allocation69_spill] sm:$0xff] }
 0x628   :  { %v3295_v36 = vadd.f32 %v3294_v61, %v3168_v49  ;;  %vm3041_vm2 = vcmp.lt.f32.partialorder %v2913_v1, inf  ;;  %2741 = vst [vmem:[#allocation15 + $0x48] sm:$0xff] %v2257_v3  ;;  %v2914_v17 = vand.u32 2147483647, %v2257_v3  ;;  %v3171_v40 = vsel %vm6575_vm3, 0.0, %v7833_v58  ;;  %2805 = vst [vmem:[#allocation15 + $0x248] sm:$0xff] %v2513_v19 }
 0x629   :  { %v3169_v28 = vsel %vm3041_vm2, 0.0, %v7833_v58  ;;  %vm6580_vm5 = vcmp.lt.f32.partialorder %v2916_v13, inf  ;;  %v1755_v31 = vmul.f32 0.2, %v7960_v57  ;;  %v1753_v34 = vmul.f32 0.2, %v7961_v59 }
 0x62a   :  { %v3296_v14 = vadd.f32 %v3295_v36, %v3169_v28  ;;  %vm3042_vm4 = vcmp.lt.f32.partialorder %v2914_v17, inf  ;;  %v4092_v53 = vpop.f32.mrb[48].mxu0  ;;  %v3172_v46 = vsel %vm6580_vm5, 0.0, %v7833_v58  ;;  %v7964_v61 = vld [vmem:[#allocation134_spill] sm:$0xff]  ;;  %v1812_v49 = vmul.f32 0.2, %v7965_v7 }
 0x62b   :  { %v3170_v47 = vsel %vm3042_vm4, 0.0, %v7833_v58  ;;  %v2278_v21 = vadd.f32 %v4092_v53, %v1750_v2  ;;  %v2269_v55 = vpop.f32.mrb[49].mxu0  ;;  %v1752_v2 = vmul.f32 0.2, %v7959_v44  ;;  %v1814_v1 = vmul.f32 0.2, %v7964_v61 }
 0x62c   :  { %v3297_v30 = vadd.f32 %v3296_v14, %v3170_v47  ;;  %v2270_v25 = vadd.f32 %v2269_v55, %v1748_v56  ;;  %v4093_v27 = vpop.f32.mrb[50].mxu0  ;;  %v6605_v35 = vpop.f32.mrb[32].mxu1 }
 0x62d   :  { %2746 = vst [vmem:[#allocation15 + $0x70] sm:$0xff] %v2278_v21  ;;  %v2281_v16 = vadd.f32 %v4093_v27, %v1751_v20  ;;  %v2272_v38 = vpop.f32.mrb[51].mxu0  ;;  %v2919_v62 = vand.u32 2147483647, %v2278_v21  ;;  %v2534_v36 = vadd.f32 %v4156_v9, %v1814_v1  ;;  %v6611_v13 = vpop.f32.mrb[33].mxu1  ;;  %v2526_v20 = vadd.f32 %v2525_v22, %v1812_v49  ;;  %v7969_v9 = vld [vmem:[#allocation74_spill] sm:$0xff] }
 0x62e   :  { %v3298_v45 = vadd.f32 %v3297_v30, %v3171_v40  ;;  %2744 = vst [vmem:[#allocation15 + $0x60] sm:$0xff] %v2270_v25  ;;  %v2917_v43 = vand.u32 2147483647, %v2270_v25  ;;  %v2273_v63 = vadd.f32 %v2272_v38, %v1749_v4  ;;  %v1815_v4 = vmul.f32 0.2, %v7968_v60  ;;  %v6617_v32 = vpop.f32.mrb[34].mxu1 }
 0x62f   :  { %2747 = vst [vmem:[#allocation15 + $0x78] sm:$0xff] %v2281_v16  ;;  %v2920_v33 = vand.u32 2147483647, %v2281_v16  ;;  %vm6598_vm8 = vcmp.lt.f32.partialorder %v2919_v62, inf  ;;  %2810 = vst [vmem:[#allocation15 + $0x270] sm:$0xff] %v2534_v36  ;;  %v6619_v47 = vpop.f32.mrb[35].mxu1 }
 0x630   :  { %v3299_v37 = vadd.f32 %v3298_v45, %v3172_v46  ;;  %vm3045_vm7 = vcmp.lt.f32.partialorder %v2917_v43, inf  ;;  %2745 = vst [vmem:[#allocation15 + $0x68] sm:$0xff] %v2273_v63  ;;  %v2918_v0 = vand.u32 2147483647, %v2273_v63  ;;  %v3175_v17 = vsel %vm6598_vm8, 0.0, %v7833_v58  ;;  %2808 = vst [vmem:[#allocation15 + $0x260] sm:$0xff] %v2526_v20 }
 0x631   :  { %v3173_v12 = vsel %vm3045_vm7, 0.0, %v7833_v58  ;;  %vm6607_vm10 = vcmp.lt.f32.partialorder %v2920_v33, inf  ;;  %v1758_v26 = vmul.f32 0.2, %v7969_v9  ;;  %v2537_v30 = vadd.f32 %v4157_v42, %v1815_v4  ;;  %v7970_v22 = vld [vmem:[#allocation72_spill] sm:$0xff]  ;;  %v7971_v38 = vld [vmem:[#allocation75_spill] sm:$0xff] }
 0x632   :  { %v3300_v15 = vadd.f32 %v3299_v37, %v3173_v12  ;;  %vm3046_vm9 = vcmp.lt.f32.partialorder %v2918_v0, inf  ;;  %v4096_v5 = vpop.f32.mrb[52].mxu0  ;;  %v3176_v21 = vsel %vm6607_vm10, 0.0, %v7833_v58  ;;  %v1756_v40 = vmul.f32 0.2, %v7970_v22  ;;  %v7974_v43 = vld [vmem:[#allocation73_spill] sm:$0xff] }
 0x633   :  { %v3174_v3 = vsel %vm3046_vm9, 0.0, %v7833_v58  ;;  %v2294_v8 = vadd.f32 %v4096_v5, %v1754_v29  ;;  %v2285_v11 = vpop.f32.mrb[53].mxu0  ;;  %v1759_v41 = vmul.f32 0.2, %v7971_v38  ;;  %2811 = vst [vmem:[#allocation15 + $0x278] sm:$0xff] %v2537_v30  ;;  %v6638_v44 = vpop.f32.mrb[36].mxu1 }
 0x634   :  { %v3301_v39 = vadd.f32 %v3300_v15, %v3174_v3  ;;  %v2286_v24 = vadd.f32 %v2285_v11, %v1752_v2  ;;  %v4097_v10 = vpop.f32.mrb[54].mxu0  ;;  %v1757_v63 = vmul.f32 0.2, %v7974_v43  ;;  %v7977_v33 = vld [vmem:[#allocation133_spill] sm:$0xff]  ;;  %v7978_v12 = vld [vmem:[#allocation138_spill] sm:$0xff]  ;;  %v7979_v5 = vld [vmem:[#allocation80_spill] sm:$0xff] }
 0x635   :  { %2750 = vst [vmem:[#allocation15 + $0x90] sm:$0xff] %v2294_v8  ;;  %v2297_v28 = vadd.f32 %v4097_v10, %v1755_v31  ;;  %v2288_v50 = vpop.f32.mrb[55].mxu0  ;;  %v2923_v14 = vand.u32 2147483647, %v2294_v8  ;;  %v1813_v0 = vmul.f32 0.2, %v7977_v33 }
 0x636   :  { %v3302_v54 = vadd.f32 %v3301_v39, %v3175_v17  ;;  %2748 = vst [vmem:[#allocation15 + $0x80] sm:$0xff] %v2286_v24  ;;  %v2921_v53 = vand.u32 2147483647, %v2286_v24  ;;  %v2289_v52 = vadd.f32 %v2288_v50, %v1753_v34  ;;  %v1818_v57 = vmul.f32 0.2, %v7978_v12  ;;  %v6642_v31 = vpop.f32.mrb[37].mxu1 }
 0x637   :  { %2751 = vst [vmem:[#allocation15 + $0x98] sm:$0xff] %v2297_v28  ;;  %v2924_v55 = vand.u32 2147483647, %v2297_v28  ;;  %vm6628_vm11 = vcmp.lt.f32.partialorder %v2923_v14, inf  ;;  %v1762_v61 = vmul.f32 0.2, %v7979_v5  ;;  %v2529_v10 = vadd.f32 %v6593_v23, %v1813_v0 }
 0x638   :  { %v3303_v25 = vadd.f32 %v3302_v54, %v3176_v21  ;;  %vm3049_vm6 = vcmp.lt.f32.partialorder %v2921_v53, inf  ;;  %2749 = vst [vmem:[#allocation15 + $0x88] sm:$0xff] %v2289_v52  ;;  %v2922_v27 = vand.u32 2147483647, %v2289_v52  ;;  %v3179_v59 = vsel %vm6628_vm11, 0.0, %v7833_v58  ;;  %v7980_v11 = vld [vmem:[#allocation136_spill] sm:$0xff] }
 0x639   :  { %v3177_v16 = vsel %vm3049_vm6, 0.0, %v7833_v58  ;;  %vm6633_vm13 = vcmp.lt.f32.partialorder %v2924_v55, inf  ;;  %v1816_v7 = vmul.f32 0.2, %v7980_v11  ;;  %v6649_v49 = vpop.f32.mrb[38].mxu1  ;;  %v7981_v39 = vld [vmem:[#allocation76_spill] sm:$0xff]  ;;  %v2550_v36 = vadd.f32 %v6605_v35, %v1818_v57 }
 0x63a   :  { %v3304_v45 = vadd.f32 %v3303_v25, %v3177_v16  ;;  %vm3050_vm12 = vcmp.lt.f32.partialorder %v2922_v27, inf  ;;  %v4100_v62 = vpop.f32.mrb[56].mxu0  ;;  %v3180_v56 = vsel %vm6633_vm13, 0.0, %v7833_v58  ;;  %v1760_v24 = vmul.f32 0.2, %v7981_v39  ;;  %v6657_v17 = vpop.f32.mrb[39].mxu1 }
 0x63b   :  { %v3178_v46 = vsel %vm3050_vm12, 0.0, %v7833_v58  ;;  %v2310_v51 = vadd.f32 %v4100_v62, %v1758_v26  ;;  %v2301_v29 = vpop.f32.mrb[57].mxu0  ;;  %v7982_v4 = vld [vmem:[#allocation83_spill] sm:$0xff]  ;;  %v7983_v14 = vld [vmem:[#allocation77_spill] sm:$0xff]  ;;  %2809 = vst [vmem:[#allocation15 + $0x268] sm:$0xff] %v2529_v10  ;;  %2814 = vst [vmem:[#allocation15 + $0x290] sm:$0xff] %v2550_v36  ;;  %v2542_v21 = vadd.f32 %v6611_v13, %v1816_v7 }
 0x63c   :  { %v3305_v2 = vadd.f32 %v3304_v45, %v3178_v46  ;;  %v2302_v19 = vadd.f32 %v2301_v29, %v1756_v40  ;;  %v4101_v37 = vpop.f32.mrb[58].mxu0  ;;  %v1763_v54 = vmul.f32 0.2, %v7982_v4  ;;  %v1761_v53 = vmul.f32 0.2, %v7983_v14  ;;  %v6668_v30 = vpop.f32.mrb[40].mxu1 }
 0x63d   :  { %2754 = vst [vmem:[#allocation15 + $0xb0] sm:$0xff] %v2310_v51  ;;  %v2927_v34 = vand.u32 2147483647, %v2310_v51  ;;  %v2313_v18 = vadd.f32 %v4101_v37, %v1759_v41  ;;  %v2304_v15 = vpop.f32.mrb[59].mxu0  ;;  %v7988_v16 = vld [vmem:[#allocation92_spill] sm:$0xff]  ;;  %2812 = vst [vmem:[#allocation15 + $0x280] sm:$0xff] %v2542_v21 }
 0x63e   :  { %v3306_v1 = vadd.f32 %v3305_v2, %v3179_v59  ;;  %2752 = vst [vmem:[#allocation15 + $0xa0] sm:$0xff] %v2302_v19  ;;  %v2925_v3 = vand.u32 2147483647, %v2302_v19  ;;  %v2305_v8 = vadd.f32 %v2304_v15, %v1757_v63  ;;  %v1766_v38 = vmul.f32 0.2, %v7988_v16  ;;  %v6675_v41 = vpop.f32.mrb[41].mxu1 }
 0x63f   :  { %2755 = vst [vmem:[#allocation15 + $0xb8] sm:$0xff] %v2313_v18  ;;  %v2928_v50 = vand.u32 2147483647, %v2313_v18  ;;  %vm6662_vm15 = vcmp.lt.f32.partialorder %v2927_v34, inf  ;;  %v6680_v43 = vpop.f32.mrb[42].mxu1  ;;  %v7989_v51 = vld [vmem:[#allocation139_spill] sm:$0xff] }
 0x640   :  { %v3307_v28 = vadd.f32 %v3306_v1, %v3180_v56  ;;  %vm3053_vm14 = vcmp.lt.f32.partialorder %v2925_v3, inf  ;;  %2753 = vst [vmem:[#allocation15 + $0xa8] sm:$0xff] %v2305_v8  ;;  %v2926_v20 = vand.u32 2147483647, %v2305_v8  ;;  %v3183_v13 = vsel %vm6662_vm15, 0.0, %v7833_v58  ;;  %v6683_v2 = vpop.f32.mrb[43].mxu1 }
 0x641   :  { %v3181_v60 = vsel %vm3053_vm14, 0.0, %v7833_v58  ;;  %vm6670_vm1 = vcmp.lt.f32.partialorder %v2928_v50, inf  ;;  %v1819_v29 = vmul.f32 0.2, %v7989_v51  ;;  %v7990_v37 = vld [vmem:[#allocation86_spill] sm:$0xff]  ;;  %v7991_v0 = vld [vmem:[#allocation137_spill] sm:$0xff] }
 0x642   :  { %v3308_v23 = vadd.f32 %v3307_v28, %v3181_v60  ;;  %vm3054_vm0 = vcmp.lt.f32.partialorder %v2926_v20, inf  ;;  %v4104_v35 = vpop.f32.mrb[60].mxu0  ;;  %v3184_v19 = vsel %vm6670_vm1, 0.0, %v7833_v58  ;;  %v1764_v33 = vmul.f32 0.2, %v7990_v37  ;;  %v7992_v15 = vld [vmem:[#allocation39_spill] sm:$0xff] }
 0x643   :  { %v3182_v55 = vsel %vm3054_vm0, 0.0, %v7833_v58  ;;  %v2326_v9 = vadd.f32 %v4104_v35, %v1762_v61  ;;  %v2317_v26 = vpop.f32.mrb[61].mxu0  ;;  %v1817_v12 = vmul.f32 0.2, %v7991_v0  ;;  %v1767_v5 = vmul.f32 0.2, %v7992_v15 }
 0x644   :  { %v3309_v27 = vadd.f32 %v3308_v23, %v3182_v55  ;;  %v2318_v22 = vadd.f32 %v2317_v26, %v1760_v24  ;;  %v4105_v40 = vpop.f32.mrb[62].mxu0  ;;  %v7993_v61 = vld [vmem:[#allocation89_spill] sm:$0xff]  ;;  %v2553_v3 = vadd.f32 %v6617_v32, %v1819_v29  ;;  %v7996_v36 = vld [vmem:[#allocation142_spill] sm:$0xff]  ;;  %v6705_v4 = vpop.f32.mrb[44].mxu1  ;;  %v8001_v16 = vld [vmem:[#allocation140_spill] sm:$0xff] }
 0x645   :  { %2758 = vst [vmem:[#allocation15 + $0xd0] sm:$0xff] %v2326_v9  ;;  %v2931_v6 = vand.u32 2147483647, %v2326_v9  ;;  %v2329_v45 = vadd.f32 %v4105_v40, %v1763_v54  ;;  %v2320_v62 = vpop.f32.mrb[63].mxu0  ;;  %v1765_v1 = vmul.f32 0.2, %v7993_v61  ;;  %v2545_v56 = vadd.f32 %v6619_v47, %v1817_v12 }
 0x646   :  { %v3310_v63 = vadd.f32 %v3309_v27, %v3183_v13  ;;  %2756 = vst [vmem:[#allocation15 + $0xc0] sm:$0xff] %v2318_v22  ;;  %v2929_v42 = vand.u32 2147483647, %v2318_v22  ;;  %v2321_v46 = vadd.f32 %v2320_v62, %v1761_v53  ;;  %2815 = vst [vmem:[#allocation15 + $0x298] sm:$0xff] %v2553_v3  ;;  %v1822_v28 = vmul.f32 0.2, %v7996_v36 }
 0x647   :  { %2759 = vst [vmem:[#allocation15 + $0xd8] sm:$0xff] %v2329_v45  ;;  %v2932_v59 = vand.u32 2147483647, %v2329_v45  ;;  %vm6694_vm3 = vcmp.lt.f32.partialorder %v2931_v6, inf  ;;  %2813 = vst [vmem:[#allocation15 + $0x288] sm:$0xff] %v2545_v56  ;;  %v7999_v53 = vld [vmem:[#allocation101_spill] sm:$0xff] }
 0x648   :  { %v3311_v57 = vadd.f32 %v3310_v63, %v3184_v19  ;;  %vm3057_vm2 = vcmp.lt.f32.partialorder %v2929_v42, inf  ;;  %2757 = vst [vmem:[#allocation15 + $0xc8] sm:$0xff] %v2321_v46  ;;  %v2930_v34 = vand.u32 2147483647, %v2321_v46  ;;  %v3187_v47 = vsel %vm6694_vm3, 0.0, %v7833_v58  ;;  %v6712_v35 = vpop.f32.mrb[45].mxu1 }
 0x649   :  { %v3185_v18 = vsel %vm3057_vm2, 0.0, %v7833_v58  ;;  %vm6701_vm5 = vcmp.lt.f32.partialorder %v2932_v59, inf  ;;  %v1770_v52 = vmul.f32 0.2, %v7999_v53  ;;  %v2566_v23 = vadd.f32 %v6638_v44, %v1822_v28  ;;  %v6714_v25 = vpop.f32.mrb[46].mxu1  ;;  %v8000_v22 = vld [vmem:[#allocation30_spill] sm:$0xff] }
 0x64a   :  { %v3312_v11 = vadd.f32 %v3311_v57, %v3185_v18  ;;  %vm3058_vm4 = vcmp.lt.f32.partialorder %v2930_v34, inf  ;;  %v4108_v7 = vpop.f32.mrb[64].mxu0  ;;  %v3188_v27 = vsel %vm6701_vm5, 0.0, %v7833_v58  ;;  %v1768_v40 = vmul.f32 0.2, %v8000_v22  ;;  %v6721_v45 = vpop.f32.mrb[47].mxu1 }
 0x64b   :  { %v3186_v39 = vsel %vm3058_vm4, 0.0, %v7833_v58  ;;  %v2342_v24 = vadd.f32 %v4108_v7, %v1766_v38  ;;  %v2333_v10 = vpop.f32.mrb[65].mxu0  ;;  %2818 = vst [vmem:[#allocation15 + $0x2b0] sm:$0xff] %v2566_v23  ;;  %v1820_v38 = vmul.f32 0.2, %v8001_v16  ;;  %v8002_v63 = vld [vmem:[#allocation102_spill] sm:$0xff] }
 0x64c   :  { %v3313_v32 = vadd.f32 %v3312_v11, %v3186_v39  ;;  %v2334_v20 = vadd.f32 %v2333_v10, %v1764_v33  ;;  %v4109_v60 = vpop.f32.mrb[66].mxu0  ;;  %v1771_v42 = vmul.f32 0.2, %v8002_v63  ;;  %v8003_v46 = vld [vmem:[#allocation31_spill] sm:$0xff]  ;;  %v8006_v33 = vld [vmem:[#allocation104_spill] sm:$0xff]  ;;  %v8010_v11 = vld [vmem:[#allocation141_spill] sm:$0xff] }
 0x64d   :  { %2762 = vst [vmem:[#allocation15 + $0xf0] sm:$0xff] %v2342_v24  ;;  %v2345_v54 = vadd.f32 %v4109_v60, %v1767_v5  ;;  %v2336_v14 = vpop.f32.mrb[67].mxu0  ;;  %v2935_v55 = vand.u32 2147483647, %v2342_v24  ;;  %v1769_v51 = vmul.f32 0.2, %v8003_v46  ;;  %v6733_v34 = vadd.f32 %v6642_v31, %v1820_v38 }
 0x64e   :  { %v3314_v21 = vadd.f32 %v3313_v32, %v3187_v47  ;;  %2760 = vst [vmem:[#allocation15 + $0xe0] sm:$0xff] %v2334_v20  ;;  %v2933_v9 = vand.u32 2147483647, %v2334_v20  ;;  %v2337_v26 = vadd.f32 %v2336_v14, %v1765_v1  ;;  %v1774_v0 = vmul.f32 0.2, %v8006_v33  ;;  %v8007_v18 = vld [vmem:[#allocation143_spill] sm:$0xff] }
 0x64f   :  { %2763 = vst [vmem:[#allocation15 + $0xf8] sm:$0xff] %v2345_v54  ;;  %v2936_v13 = vand.u32 2147483647, %v2345_v54  ;;  %vm6726_vm8 = vcmp.lt.f32.partialorder %v2935_v55, inf  ;;  %v1823_v15 = vmul.f32 0.2, %v8007_v18 }
 0x650   :  { %v3315_v44 = vadd.f32 %v3314_v21, %v3188_v27  ;;  %vm3061_vm7 = vcmp.lt.f32.partialorder %v2933_v9, inf  ;;  %2761 = vst [vmem:[#allocation15 + $0xe8] sm:$0xff] %v2337_v26  ;;  %v2934_v6 = vand.u32 2147483647, %v2337_v26  ;;  %v6736_v5 = vpop.f32.mrb[48].mxu1  ;;  %v3191_v31 = vsel %vm6726_vm8, 0.0, %v7833_v58 }
 0x651   :  { %v3189_v62 = vsel %vm3061_vm7, 0.0, %v7833_v58  ;;  %vm6738_vm10 = vcmp.lt.f32.partialorder %v2936_v13, inf  ;;  %v1821_v7 = vmul.f32 0.2, %v8010_v11  ;;  %v6743_v56 = vpop.f32.mrb[49].mxu1  ;;  %2816 = vst [vmem:[#allocation15 + $0x2a0] sm:$0xff] %v6733_v34  ;;  %v6750_v36 = vadd.f32 %v6649_v49, %v1823_v15 }
 0x652   :  { %v3316_v19 = vadd.f32 %v3315_v44, %v3189_v62  ;;  %vm3062_vm9 = vcmp.lt.f32.partialorder %v2934_v6, inf  ;;  %v4112_v37 = vpop.f32.mrb[68].mxu0  ;;  %v6752_v28 = vpop.f32.mrb[50].mxu1  ;;  %v3192_v54 = vsel %vm6738_vm10, 0.0, %v7833_v58  ;;  %v8011_v14 = vld [vmem:[#allocation38_spill] sm:$0xff]  ;;  %v8012_v49 = vld [vmem:[#allocation145_spill] sm:$0xff] }
 0x653   :  { %v3190_v12 = vsel %vm3062_vm9, 0.0, %v7833_v58  ;;  %v2358_v57 = vadd.f32 %v4112_v37, %v1770_v52  ;;  %v2349_v59 = vpop.f32.mrb[69].mxu0  ;;  %v6755_v60 = vadd.f32 %v6657_v17, %v1821_v7  ;;  %v6757_v47 = vpop.f32.mrb[51].mxu1  ;;  %v1772_v53 = vmul.f32 0.2, %v8011_v14  ;;  %2819 = vst [vmem:[#allocation15 + $0x2b8] sm:$0xff] %v6750_v36 }
 0x654   :  { %v3317_v1 = vadd.f32 %v3316_v19, %v3190_v12  ;;  %v2350_v3 = vadd.f32 %v2349_v59, %v1768_v40  ;;  %v4113_v8 = vpop.f32.mrb[70].mxu0  ;;  %v1826_v52 = vmul.f32 0.2, %v8012_v49  ;;  %v8013_v9 = vld [vmem:[#allocation105_spill] sm:$0xff]  ;;  %v8016_v16 = vld [vmem:[#allocation103_spill] sm:$0xff]  ;;  %v6777_v63 = vpop.f32.mrb[52].mxu1 }
 0x655   :  { %2766 = vst [vmem:[#allocation15 + $0x110] sm:$0xff] %v2358_v57  ;;  %v2939_v39 = vand.u32 2147483647, %v2358_v57  ;;  %v2361_v24 = vadd.f32 %v4113_v8, %v1771_v42  ;;  %v2352_v10 = vpop.f32.mrb[71].mxu0  ;;  %2817 = vst [vmem:[#allocation15 + $0x2a8] sm:$0xff] %v6755_v60  ;;  %v8019_v19 = vld [vmem:[#allocation50_spill] sm:$0xff] }
 0x656   :  { %v3318_v50 = vadd.f32 %v3317_v1, %v3191_v31  ;;  %2764 = vst [vmem:[#allocation15 + $0x100] sm:$0xff] %v2350_v3  ;;  %v2937_v32 = vand.u32 2147483647, %v2350_v3  ;;  %v2353_v20 = vadd.f32 %v2352_v10, %v1769_v51  ;;  %v1775_v26 = vmul.f32 0.2, %v8013_v9  ;;  %v6784_v33 = vpop.f32.mrb[53].mxu1 }
 0x657   :  { %2767 = vst [vmem:[#allocation15 + $0x118] sm:$0xff] %v2361_v24  ;;  %v2940_v21 = vand.u32 2147483647, %v2361_v24  ;;  %vm6768_vm11 = vcmp.lt.f32.partialorder %v2939_v39, inf  ;;  %v1773_v38 = vmul.f32 0.2, %v8016_v16  ;;  %v6775_v62 = vadd.f32 %v6668_v30, %v1826_v52 }
 0x658   :  { %v3319_v23 = vadd.f32 %v3318_v50, %v3192_v54  ;;  %vm3065_vm6 = vcmp.lt.f32.partialorder %v2937_v32, inf  ;;  %2765 = vst [vmem:[#allocation15 + $0x108] sm:$0xff] %v2353_v20  ;;  %v2938_v55 = vand.u32 2147483647, %v2353_v20  ;;  %v1824_v37 = vmul.f32 0.2, %v8019_v19 }
 0x659   :  { %v3193_v17 = vsel %vm3065_vm6, 0.0, %v7833_v58  ;;  %vm6779_vm13 = vcmp.lt.f32.partialorder %v2940_v21, inf  ;;  %2822 = vst [vmem:[#allocation15 + $0x2d0] sm:$0xff] %v6775_v62  ;;  %v8020_v57 = vld [vmem:[#allocation146_spill] sm:$0xff]  ;;  %v6791_v3 = vpop.f32.mrb[54].mxu1  ;;  %v8021_v11 = vld [vmem:[#allocation108_spill] sm:$0xff] }
 0x65a   :  { %v3320_v22 = vadd.f32 %v3319_v23, %v3193_v17  ;;  %vm3066_vm12 = vcmp.lt.f32.partialorder %v2938_v55, inf  ;;  %v4116_v40 = vpop.f32.mrb[72].mxu0  ;;  %v1827_v59 = vmul.f32 0.2, %v8020_v57  ;;  %v3196_v8 = vsel %vm6779_vm13, 0.0, %v7833_v58  ;;  %v8022_v31 = vld [vmem:[#allocation106_spill] sm:$0xff] }
 0x65b   :  { %v3194_v44 = vsel %vm3066_vm12, 0.0, %v7833_v58  ;;  %v2374_v13 = vadd.f32 %v4116_v40, %v1774_v0  ;;  %v2365_v6 = vpop.f32.mrb[73].mxu0  ;;  %v3195_v0 = vsel %vm6768_vm11, 0.0, %v7833_v58  ;;  %v1778_v7 = vmul.f32 0.2, %v8021_v11  ;;  %v6801_v10 = vpop.f32.mrb[55].mxu1 }
 0x65c   :  { %v3321_v46 = vadd.f32 %v3320_v22, %v3194_v44  ;;  %v2366_v51 = vadd.f32 %v2365_v6, %v1772_v53  ;;  %v4117_v29 = vpop.f32.mrb[74].mxu0  ;;  %v1776_v39 = vmul.f32 0.2, %v8022_v31  ;;  %v6799_v24 = vadd.f32 %v6675_v41, %v1824_v37  ;;  %v8023_v14 = vld [vmem:[#allocation109_spill] sm:$0xff]  ;;  %v8024_v49 = vld [vmem:[#allocation107_spill] sm:$0xff]  ;;  %v8027_v27 = vld [vmem:[#allocation144_spill] sm:$0xff] }
 0x65d   :  { %2770 = vst [vmem:[#allocation15 + $0x130] sm:$0xff] %v2374_v13  ;;  %v2377_v30 = vadd.f32 %v4117_v29, %v1775_v26  ;;  %v2368_v12 = vpop.f32.mrb[75].mxu0  ;;  %v2943_v15 = vand.u32 2147483647, %v2374_v13  ;;  %v1779_v53 = vmul.f32 0.2, %v8023_v14  ;;  %v6812_v55 = vadd.f32 %v6680_v43, %v1827_v59 }
 0x65e   :  { %v3322_v18 = vadd.f32 %v3321_v46, %v3195_v0  ;;  %2768 = vst [vmem:[#allocation15 + $0x120] sm:$0xff] %v2366_v51  ;;  %v2941_v61 = vand.u32 2147483647, %v2366_v51  ;;  %v2369_v1 = vadd.f32 %v2368_v12, %v1773_v38  ;;  %v1777_v52 = vmul.f32 0.2, %v8024_v49  ;;  %2820 = vst [vmem:[#allocation15 + $0x2c0] sm:$0xff] %v6799_v24 }
 0x65f   :  { %2771 = vst [vmem:[#allocation15 + $0x138] sm:$0xff] %v2377_v30  ;;  %v2944_v32 = vand.u32 2147483647, %v2377_v30  ;;  %vm6807_vm15 = vcmp.lt.f32.partialorder %v2943_v15, inf  ;;  %v1825_v22 = vmul.f32 0.2, %v8027_v27 }
 0x660   :  { %v3323_v50 = vadd.f32 %v3322_v18, %v3196_v8  ;;  %vm3069_vm14 = vcmp.lt.f32.partialorder %v2941_v61, inf  ;;  %2769 = vst [vmem:[#allocation15 + $0x128] sm:$0xff] %v2369_v1  ;;  %v2942_v20 = vand.u32 2147483647, %v2369_v1  ;;  %v6816_v40 = vpop.f32.mrb[56].mxu1  ;;  %2823 = vst [vmem:[#allocation15 + $0x2d8] sm:$0xff] %v6812_v55 }
 0x661   :  { %v3197_v54 = vsel %vm3069_vm14, 0.0, %v7833_v58  ;;  %vm6818_vm1 = vcmp.lt.f32.partialorder %v2944_v32, inf  ;;  %v6823_v6 = vpop.f32.mrb[57].mxu1  ;;  %v3199_v43 = vsel %vm6807_vm15, 0.0, %v7833_v58  ;;  %v6829_v51 = vadd.f32 %v6683_v2, %v1825_v22  ;;  %v8030_v29 = vld [vmem:[#allocation149_spill] sm:$0xff]  ;;  %v8031_v15 = vld [vmem:[#allocation112_spill] sm:$0xff] }
 0x662   :  { %v3324_v41 = vadd.f32 %v3323_v50, %v3197_v54  ;;  %vm3070_vm0 = vcmp.lt.f32.partialorder %v2942_v20, inf  ;;  %v4120_v21 = vpop.f32.mrb[76].mxu0  ;;  %v1830_v19 = vmul.f32 0.2, %v8030_v29  ;;  %v6832_v37 = vpop.f32.mrb[58].mxu1  ;;  %v3200_v18 = vsel %vm6818_vm1, 0.0, %v7833_v58 }
 0x663   :  { %v3198_v17 = vsel %vm3070_vm0, 0.0, %v7833_v58  ;;  %v2390_v9 = vadd.f32 %v4120_v21, %v1778_v7  ;;  %v2381_v26 = vpop.f32.mrb[77].mxu0  ;;  %v6834_v59 = vpop.f32.mrb[59].mxu1  ;;  %v1782_v61 = vmul.f32 0.2, %v8031_v15  ;;  %v8032_v2 = vld [vmem:[#allocation110_spill] sm:$0xff] }
 0x664   :  { %v3325_v38 = vadd.f32 %v3324_v41, %v3198_v17  ;;  %v2382_v44 = vadd.f32 %v2381_v26, %v1776_v39  ;;  %v4121_v13 = vpop.f32.mrb[78].mxu0  ;;  %v1780_v1 = vmul.f32 0.2, %v8032_v2  ;;  %2821 = vst [vmem:[#allocation15 + $0x2c8] sm:$0xff] %v6829_v51  ;;  %v8033_v39 = vld [vmem:[#allocation113_spill] sm:$0xff]  ;;  %v6845_v32 = vadd.f32 %v6705_v4, %v1830_v19  ;;  %v8037_v21 = vld [vmem:[#allocation147_spill] sm:$0xff] }
 0x665   :  { %2774 = vst [vmem:[#allocation15 + $0x150] sm:$0xff] %v2390_v9  ;;  %v2393_v42 = vadd.f32 %v4121_v13, %v1779_v53  ;;  %v2384_v46 = vpop.f32.mrb[79].mxu0  ;;  %v2947_v30 = vand.u32 2147483647, %v2390_v9  ;;  %v1783_v50 = vmul.f32 0.2, %v8033_v39 }
 0x666   :  { %v3326_v0 = vadd.f32 %v3325_v38, %v3199_v43  ;;  %2772 = vst [vmem:[#allocation15 + $0x140] sm:$0xff] %v2382_v44  ;;  %v2945_v12 = vand.u32 2147483647, %v2382_v44  ;;  %v2385_v57 = vadd.f32 %v2384_v46, %v1777_v52  ;;  %v8036_v53 = vld [vmem:[#allocation111_spill] sm:$0xff]  ;;  %2826 = vst [vmem:[#allocation15 + $0x2f0] sm:$0xff] %v6845_v32  ;;  %v8040_v22 = vld [vmem:[#allocation150_spill] sm:$0xff] }
 0x667   :  { %2775 = vst [vmem:[#allocation15 + $0x158] sm:$0xff] %v2393_v42  ;;  %v2948_v11 = vand.u32 2147483647, %v2393_v42  ;;  %vm6847_vm3 = vcmp.lt.f32.partialorder %v2947_v30, inf  ;;  %v1781_v49 = vmul.f32 0.2, %v8036_v53 }
 0x668   :  { %v3327_v8 = vadd.f32 %v3326_v0, %v3200_v18  ;;  %vm3073_vm2 = vcmp.lt.f32.partialorder %v2945_v12, inf  ;;  %2773 = vst [vmem:[#allocation15 + $0x148] sm:$0xff] %v2385_v57  ;;  %v2946_v7 = vand.u32 2147483647, %v2385_v57  ;;  %v1828_v17 = vmul.f32 0.2, %v8037_v21 }
 0x669   :  { %v3201_v31 = vsel %vm3073_vm2, 0.0, %v7833_v58  ;;  %vm6855_vm5 = vcmp.lt.f32.partialorder %v2948_v11, inf  ;;  %v1831_v16 = vmul.f32 0.2, %v8040_v22  ;;  %v6860_v38 = vpop.f32.mrb[60].mxu1  ;;  %v3203_v44 = vsel %vm6847_vm3, 0.0, %v7833_v58 }
 0x66a   :  { %v3328_v54 = vadd.f32 %v3327_v8, %v3201_v31  ;;  %vm3074_vm4 = vcmp.lt.f32.partialorder %v2946_v7, inf  ;;  %v4124_v14 = vpop.f32.mrb[80].mxu0  ;;  %v8041_v42 = vld [vmem:[#allocation114_spill] sm:$0xff]  ;;  %v6867_v29 = vadd.f32 %v6712_v35, %v1828_v17  ;;  %v6869_v19 = vpop.f32.mrb[61].mxu1  ;;  %v3204_v15 = vsel %vm6855_vm5, 0.0, %v7833_v58  ;;  %v8044_v20 = vld [vmem:[#allocation115_spill] sm:$0xff] }
 0x66b   :  { %v3202_v52 = vsel %vm3074_vm4, 0.0, %v7833_v58  ;;  %v2406_v23 = vadd.f32 %v4124_v14, %v1782_v61  ;;  %v2397_v41 = vpop.f32.mrb[81].mxu0  ;;  %v1786_v46 = vmul.f32 0.2, %v8041_v42  ;;  %v6871_v18 = vpop.f32.mrb[62].mxu1  ;;  %v8042_v61 = vld [vmem:[#allocation40_spill] sm:$0xff]  ;;  %v6879_v35 = vadd.f32 %v6714_v25, %v1831_v16 }
 0x66c   :  { %v3329_v9 = vadd.f32 %v3328_v54, %v3202_v52  ;;  %v2398_v26 = vadd.f32 %v2397_v41, %v1780_v1  ;;  %v4125_v27 = vpop.f32.mrb[82].mxu0  ;;  %v1784_v2 = vmul.f32 0.2, %v8042_v61  ;;  %2824 = vst [vmem:[#allocation15 + $0x2e0] sm:$0xff] %v6867_v29  ;;  %v8043_v1 = vld [vmem:[#allocation148_spill] sm:$0xff]  ;;  %v6882_v11 = vpop.f32.mrb[63].mxu1 }
 0x66d   :  { %2778 = vst [vmem:[#allocation15 + $0x170] sm:$0xff] %v2406_v23  ;;  %v2409_v13 = vadd.f32 %v4125_v27, %v1783_v50  ;;  %v2400_v43 = vpop.f32.mrb[83].mxu0  ;;  %v2951_v30 = vand.u32 2147483647, %v2406_v23  ;;  %v1829_v8 = vmul.f32 0.2, %v8043_v1 }
 0x66e   :  { %v3330_v0 = vadd.f32 %v3329_v9, %v3203_v44  ;;  %2776 = vst [vmem:[#allocation15 + $0x160] sm:$0xff] %v2398_v26  ;;  %v2949_v12 = vand.u32 2147483647, %v2398_v26  ;;  %v2401_v57 = vadd.f32 %v2400_v43, %v1781_v49  ;;  %v1787_v54 = vmul.f32 0.2, %v8044_v20  ;;  %2827 = vst [vmem:[#allocation15 + $0x2f8] sm:$0xff] %v6879_v35 }
 0x66f   :  { %2779 = vst [vmem:[#allocation15 + $0x178] sm:$0xff] %v2409_v13  ;;  %v2952_v31 = vand.u32 2147483647, %v2409_v13  ;;  %vm6887_vm8 = vcmp.lt.f32.partialorder %v2951_v30, inf  ;;  %v8047_v49 = vld [vmem:[#allocation41_spill] sm:$0xff]  ;;  %v8048_v17 = vld [vmem:[#allocation118_spill] sm:$0xff]  ;;  %v6895_v9 = vadd.f32 %v6721_v45, %v1829_v8 }
 0x670   :  { %v3331_v7 = vadd.f32 %v3330_v0, %v3204_v15  ;;  %vm3077_vm7 = vcmp.lt.f32.partialorder %v2949_v12, inf  ;;  %2777 = vst [vmem:[#allocation15 + $0x168] sm:$0xff] %v2401_v57  ;;  %v2950_v39 = vand.u32 2147483647, %v2401_v57  ;;  %v1785_v52 = vmul.f32 0.2, %v8047_v49 }
 0x671   :  { %v3205_v50 = vsel %vm3077_vm7, 0.0, %v7833_v58  ;;  %v1790_v4 = vmul.f32 0.2, %v8048_v17  ;;  %v6897_v26 = vpop.f32.mrb[64].mxu1  ;;  %vm6899_vm10 = vcmp.lt.f32.partialorder %v2952_v31, inf  ;;  %v8051_v13 = vld [vmem:[#allocation153_spill] sm:$0xff] }
 0x672   :  { %v3332_v25 = vadd.f32 %v3331_v7, %v3205_v50  ;;  %vm3078_vm9 = vcmp.lt.f32.partialorder %v2950_v39, inf  ;;  %v4128_v53 = vpop.f32.mrb[84].mxu0  ;;  %v1834_v43 = vmul.f32 0.2, %v8051_v13  ;;  %v6904_v42 = vpop.f32.mrb[65].mxu1  ;;  %2825 = vst [vmem:[#allocation15 + $0x2e8] sm:$0xff] %v6895_v9 }
 0x673   :  { %v3206_v23 = vsel %vm3078_vm9, 0.0, %v7833_v58  ;;  %v2422_v41 = vadd.f32 %v4128_v53, %v1786_v46  ;;  %v2413_v21 = vpop.f32.mrb[85].mxu0  ;;  %v3207_v46 = vsel %vm6887_vm8, 0.0, %v7833_v58  ;;  %v6910_v12 = vpop.f32.mrb[66].mxu1  ;;  %v3208_v8 = vsel %vm6899_vm10, 0.0, %v7833_v58  ;;  %v8052_v7 = vld [vmem:[#allocation116_spill] sm:$0xff] }
 0x674   :  { %v3333_v22 = vadd.f32 %v3332_v25, %v3206_v23  ;;  %v2414_v16 = vadd.f32 %v2413_v21, %v1784_v2  ;;  %v4129_v44 = vpop.f32.mrb[86].mxu0  ;;  %v6913_v2 = vadd.f32 %v6736_v5, %v1834_v43  ;;  %v6915_v1 = vpop.f32.mrb[67].mxu1  ;;  %v1788_v31 = vmul.f32 0.2, %v8052_v7  ;;  %v8053_v39 = vld [vmem:[#allocation151_spill] sm:$0xff]  ;;  %v8055_v49 = vld [vmem:[#allocation117_spill] sm:$0xff] }
 0x675   :  { %2782 = vst [vmem:[#allocation15 + $0x190] sm:$0xff] %v2422_v41  ;;  %v2955_v45 = vand.u32 2147483647, %v2422_v41  ;;  %v2425_v0 = vadd.f32 %v4129_v44, %v1787_v54  ;;  %v2416_v30 = vpop.f32.mrb[87].mxu0  ;;  %v1832_v50 = vmul.f32 0.2, %v8053_v39 }
 0x676   :  { %v3334_v57 = vadd.f32 %v3333_v22, %v3207_v46  ;;  %2780 = vst [vmem:[#allocation15 + $0x180] sm:$0xff] %v2414_v16  ;;  %v2953_v15 = vand.u32 2147483647, %v2414_v16  ;;  %v2417_v61 = vadd.f32 %v2416_v30, %v1785_v52  ;;  %2830 = vst [vmem:[#allocation15 + $0x310] sm:$0xff] %v6913_v2  ;;  %v8054_v25 = vld [vmem:[#allocation119_spill] sm:$0xff]  ;;  %v8058_v44 = vld [vmem:[#allocation34_spill] sm:$0xff] }
 0x677   :  { %2783 = vst [vmem:[#allocation15 + $0x198] sm:$0xff] %v2425_v0  ;;  %v2956_v54 = vand.u32 2147483647, %v2425_v0  ;;  %v1791_v53 = vmul.f32 0.2, %v8054_v25  ;;  %vm6926_vm11 = vcmp.lt.f32.partialorder %v2955_v45, inf  ;;  %v6931_v17 = vadd.f32 %v6743_v56, %v1832_v50 }
 0x678   :  { %v3335_v20 = vadd.f32 %v3334_v57, %v3208_v8  ;;  %vm3081_vm6 = vcmp.lt.f32.partialorder %v2953_v15, inf  ;;  %2781 = vst [vmem:[#allocation15 + $0x188] sm:$0xff] %v2417_v61  ;;  %v2954_v14 = vand.u32 2147483647, %v2417_v61  ;;  %v1789_v52 = vmul.f32 0.2, %v8055_v49 }
 0x679   :  { %v3209_v5 = vsel %vm3081_vm6, 0.0, %v7833_v58  ;;  %v1835_v13 = vmul.f32 0.2, %v8058_v44  ;;  %v6935_v43 = vpop.f32.mrb[68].mxu1  ;;  %vm6937_vm13 = vcmp.lt.f32.partialorder %v2956_v54, inf  ;;  %2828 = vst [vmem:[#allocation15 + $0x300] sm:$0xff] %v6931_v17 }
 0x67a   :  { %v3336_v41 = vadd.f32 %v3335_v20, %v3209_v5  ;;  %vm3082_vm12 = vcmp.lt.f32.partialorder %v2954_v14, inf  ;;  %v4132_v21 = vpop.f32.mrb[88].mxu0  ;;  %v6942_v57 = vpop.f32.mrb[69].mxu1  ;;  %v3211_v56 = vsel %vm6926_vm11, 0.0, %v7833_v58  ;;  %v8061_v8 = vld [vmem:[#allocation152_spill] sm:$0xff]  ;;  %v3212_v5 = vsel %vm6937_vm13, 0.0, %v7833_v58 }
 0x67b   :  { %v3210_v27 = vsel %vm3082_vm12, 0.0, %v7833_v58  ;;  %v2438_v22 = vadd.f32 %v4132_v21, %v1790_v4  ;;  %v2429_v16 = vpop.f32.mrb[89].mxu0  ;;  %v6948_v61 = vadd.f32 %v6752_v28, %v1835_v13  ;;  %v1833_v7 = vmul.f32 0.2, %v8061_v8  ;;  %v6951_v39 = vpop.f32.mrb[70].mxu1  ;;  %v8062_v25 = vld [vmem:[#allocation125_spill] sm:$0xff] }
 0x67c   :  { %v3337_v45 = vadd.f32 %v3336_v41, %v3210_v27  ;;  %v2430_v0 = vadd.f32 %v2429_v16, %v1788_v31  ;;  %v4133_v30 = vpop.f32.mrb[90].mxu0  ;;  %v6953_v14 = vpop.f32.mrb[71].mxu1  ;;  %v8063_v28 = vld [vmem:[#allocation120_spill] sm:$0xff]  ;;  %v8064_v27 = vld [vmem:[#allocation126_spill] sm:$0xff] }
 0x67d   :  { %2786 = vst [vmem:[#allocation15 + $0x1b0] sm:$0xff] %v2438_v22  ;;  %v2441_v4 = vadd.f32 %v4133_v30, %v1791_v53  ;;  %v2432_v15 = vpop.f32.mrb[91].mxu0  ;;  %v2959_v50 = vand.u32 2147483647, %v2438_v22  ;;  %v1794_v53 = vmul.f32 0.2, %v8062_v25  ;;  %v6964_v16 = vadd.f32 %v6757_v47, %v1833_v7 }
 0x67e   :  { %v3338_v31 = vadd.f32 %v3337_v45, %v3211_v56  ;;  %2784 = vst [vmem:[#allocation15 + $0x1a0] sm:$0xff] %v2430_v0  ;;  %v2957_v20 = vand.u32 2147483647, %v2430_v0  ;;  %v2433_v54 = vadd.f32 %v2432_v15, %v1789_v52  ;;  %v1792_v49 = vmul.f32 0.2, %v8063_v28  ;;  %2831 = vst [vmem:[#allocation15 + $0x318] sm:$0xff] %v6948_v61 }
 0x67f   :  { %2787 = vst [vmem:[#allocation15 + $0x1b8] sm:$0xff] %v2441_v4  ;;  %v2960_v41 = vand.u32 2147483647, %v2441_v4  ;;  %v1795_v22 = vmul.f32 0.2, %v8064_v27  ;;  %vm6966_vm15 = vcmp.lt.f32.partialorder %v2959_v50, inf }
 0x680   :  { %v3339_v23 = vadd.f32 %v3338_v31, %v3212_v5  ;;  %vm3085_vm14 = vcmp.lt.f32.partialorder %v2957_v20, inf  ;;  %2785 = vst [vmem:[#allocation15 + $0x1a8] sm:$0xff] %v2433_v54  ;;  %v2958_v21 = vand.u32 2147483647, %v2433_v54  ;;  %v8067_v45 = vld [vmem:[#allocation122_spill] sm:$0xff]  ;;  %2829 = vst [vmem:[#allocation15 + $0x308] sm:$0xff] %v6964_v16 }
 0x681   :  { %v3213_v52 = vsel %vm3085_vm14, 0.0, %v7833_v58  ;;  %v1793_v0 = vmul.f32 0.2, %v8067_v45  ;;  %v8068_v15 = vld [vmem:[#allocation156_spill] sm:$0xff]  ;;  %vm6974_vm1 = vcmp.lt.f32.partialorder %v2960_v41, inf  ;;  %v8071_v20 = vld [vmem:[#allocation154_spill] sm:$0xff] }
 0x682   :  { %v3340_v13 = vadd.f32 %v3339_v23, %v3213_v52  ;;  %vm3086_vm0 = vcmp.lt.f32.partialorder %v2958_v21, inf  ;;  %v4136_v46 = vpop.f32.mrb[92].mxu0  ;;  %v1838_v8 = vmul.f32 0.2, %v8068_v15  ;;  %v1836_v54 = vmul.f32 0.2, %v8071_v20 }
 0x683   :  { %v3214_v30 = vsel %vm3086_vm0, 0.0, %v7833_v58  ;;  %v2454_v56 = vadd.f32 %v4136_v46, %v1794_v53  ;;  %v2445_v4 = vpop.f32.mrb[93].mxu0  ;;  %v6979_v5 = vpop.f32.mrb[72].mxu1  ;;  %v3215_v25 = vsel %vm6966_vm15, 0.0, %v7833_v58  ;;  %v8072_v23 = vld [vmem:[#allocation129_spill] sm:$0xff]  ;;  %v3216_v44 = vsel %vm6974_vm1, 0.0, %v7833_v58 }
 0x684   :  { %v3341_v7 = vadd.f32 %v3340_v13, %v3214_v30  ;;  %v2446_v31 = vadd.f32 %v2445_v4, %v1792_v49  ;;  %v4137_v50 = vpop.f32.mrb[94].mxu0  ;;  %v1798_v21 = vmul.f32 0.2, %v8072_v23  ;;  %v6986_v41 = vadd.f32 %v6777_v63, %v1838_v8  ;;  %v6988_v52 = vpop.f32.mrb[73].mxu1  ;;  %v8075_v4 = vld [vmem:[#allocation157_spill] sm:$0xff] }
 0x685   :  { %2790 = vst [vmem:[#allocation15 + $0x1d0] sm:$0xff] %v2454_v56  ;;  %v2457_v53 = vadd.f32 %v4137_v50, %v1795_v22  ;;  %v2448_v28 = vpop.f32.mrb[95].mxu0  ;;  %v2963_v27 = vand.u32 2147483647, %v2454_v56  ;;  %v6990_v45 = vpop.f32.mrb[74].mxu1  ;;  %v8074_v22 = vld [vmem:[#allocation127_spill] sm:$0xff]  ;;  %v6998_v63 = vadd.f32 %v6784_v33, %v1836_v54 }
 0x686   :  { %8073 = vst [vmem:[#allocation35_spill] sm:$0xff] %v6986_v41  ;;  %v3342_v49 = vadd.f32 %v3341_v7, %v3215_v25  ;;  %2788 = vst [vmem:[#allocation15 + $0x1c0] sm:$0xff] %v2446_v31  ;;  %v2961_v13 = vand.u32 2147483647, %v2446_v31  ;;  %v2449_v46 = vadd.f32 %v2448_v28, %v1793_v0  ;;  %v1796_v30 = vmul.f32 0.2, %v8074_v22 }
 0x687   :  { %2791 = vst [vmem:[#allocation15 + $0x1d8] sm:$0xff] %v2457_v53  ;;  %2834 = vst [vmem:[#allocation15 + $0x330] sm:$0xff] %v6986_v41  ;;  %v1839_v15 = vmul.f32 0.2, %v8075_v4  ;;  %v7001_v56 = vpop.f32.mrb[75].mxu1  ;;  %v8076_v31 = vld [vmem:[#allocation130_spill] sm:$0xff] }
 0x688   :  { %v3343_v8 = vadd.f32 %v3342_v49, %v3216_v44  ;;  %vm3089_vm2 = vcmp.lt.f32.partialorder %v2961_v13, inf  ;;  %v2964_v0 = vand.u32 2147483647, %v2457_v53  ;;  %2789 = vst [vmem:[#allocation15 + $0x1c8] sm:$0xff] %v2449_v46  ;;  %v2962_v7 = vand.u32 2147483647, %v2449_v46 }
 0x689   :  { %v3217_v47 = vsel %vm3089_vm2, 0.0, %v7833_v58  ;;  %v1799_v50 = vmul.f32 0.2, %v8076_v31  ;;  %2832 = vst [vmem:[#allocation15 + $0x320] sm:$0xff] %v6998_v63  ;;  %vm7006_vm3 = vcmp.lt.f32.partialorder %v2963_v27, inf  ;;  %v8079_v25 = vld [vmem:[#allocation128_spill] sm:$0xff]  ;;  %v7014_v44 = vadd.f32 %v6791_v3, %v1839_v15 }
 0x68a   :  { %v3344_v33 = vadd.f32 %v3343_v8, %v3217_v47  ;;  %vm3090_vm4 = vcmp.lt.f32.partialorder %v2962_v7, inf  ;;  %v4140_v54 = vpop.f32.mrb[96].mxu0  ;;  %v1797_v28 = vmul.f32 0.2, %v8079_v25  ;;  %v8080_v13 = vld [vmem:[#allocation44_spill] sm:$0xff]  ;;  %v7016_v22 = vpop.f32.mrb[76].mxu1 }
 0x68b   :  { %v3218_v23 = vsel %vm3090_vm4, 0.0, %v7833_v58  ;;  %v2470_v53 = vadd.f32 %v4140_v54, %v1798_v21  ;;  %v2461_v49 = vpop.f32.mrb[97].mxu0  ;;  %v1802_v46 = vmul.f32 0.2, %v8080_v13  ;;  %8081 = vst [vmem:[#allocation182_spill] sm:$0xff] %v7014_v44  ;;  %vm7018_vm5 = vcmp.lt.f32.partialorder %v2964_v0, inf }
 0x68c   :  { %v3345_v4 = vadd.f32 %v3344_v33, %v3218_v23  ;;  %v2462_v8 = vadd.f32 %v2461_v49, %v1796_v30  ;;  %v4141_v7 = vpop.f32.mrb[98].mxu0  ;;  %v8084_v47 = vld [vmem:[#allocation155_spill] sm:$0xff]  ;;  %v7023_v25 = vpop.f32.mrb[77].mxu1  ;;  %v3219_v21 = vsel %vm7006_vm3, 0.0, %v7833_v58  ;;  %2835 = vst [vmem:[#allocation15 + $0x338] sm:$0xff] %v7014_v44  ;;  %v3220_v20 = vsel %vm7018_vm5, 0.0, %v7833_v58 }
 0x68d   :  { %v1837_v31 = vmul.f32 0.2, %v8084_v47  ;;  %2794 = vst [vmem:[#allocation15 + $0x1f0] sm:$0xff] %v2470_v53  ;;  %v2967_v3 = vand.u32 2147483647, %v2470_v53  ;;  %v2473_v15 = vadd.f32 %v4141_v7, %v1799_v50  ;;  %v2464_v54 = vpop.f32.mrb[99].mxu0 }
 0x68e   :  { %v7029_v0 = vpop.f32.mrb[78].mxu1  ;;  %v3346_v13 = vadd.f32 %v3345_v4, %v3219_v21  ;;  %2792 = vst [vmem:[#allocation15 + $0x1e0] sm:$0xff] %v2462_v8  ;;  %v2965_v30 = vand.u32 2147483647, %v2462_v8  ;;  %v2465_v33 = vadd.f32 %v2464_v54, %v1797_v28  ;;  %v8085_v50 = vld [vmem:[#allocation42_spill] sm:$0xff]  ;;  %v8086_v7 = vld [vmem:[#allocation160_spill] sm:$0xff] }
 0x68f   :  { %v7032_v23 = vadd.f32 %v6801_v10, %v1837_v31  ;;  %v7034_v49 = vpop.f32.mrb[79].mxu1  ;;  %2795 = vst [vmem:[#allocation15 + $0x1f8] sm:$0xff] %v2473_v15  ;;  %v1800_v53 = vmul.f32 0.2, %v8085_v50  ;;  %v1842_v47 = vmul.f32 0.2, %v8086_v7 }
 0x690   :  { %v3347_v48 = vadd.f32 %v3346_v13, %v3220_v20  ;;  %vm3093_vm7 = vcmp.lt.f32.partialorder %v2965_v30, inf  ;;  %v2968_v4 = vand.u32 2147483647, %v2473_v15  ;;  %2793 = vst [vmem:[#allocation15 + $0x1e8] sm:$0xff] %v2465_v33  ;;  %v2966_v8 = vand.u32 2147483647, %v2465_v33 }
 0x691   :  { %2833 = vst [vmem:[#allocation15 + $0x328] sm:$0xff] %v7032_v23  ;;  %v3221_v10 = vsel %vm3093_vm7, 0.0, %v7833_v58  ;;  %v8087_v28 = vld [vmem:[#allocation45_spill] sm:$0xff]  ;;  %v8088_v21 = vld [vmem:[#allocation43_spill] sm:$0xff]  ;;  %vm3095_vm8 = vcmp.lt.f32.partialorder %v2967_v3, inf  ;;  %v7046_v50 = vadd.f32 %v6816_v40, %v1842_v47  ;;  %v8090_v33 = vld [vmem:[#allocation158_spill] sm:$0xff] }
 0x692   :  { %v1803_v31 = vmul.f32 0.2, %v8087_v28  ;;  %v1801_v54 = vmul.f32 0.2, %v8088_v21  ;;  %v3348_v27 = vadd.f32 %v3347_v48, %v3221_v10  ;;  %vm3094_vm9 = vcmp.lt.f32.partialorder %v2966_v8, inf  ;;  %v4144_v44 = vpop.f32.mrb[100].mxu0 }
 0x693   :  { %8089 = vst [vmem:[#allocation36_spill] sm:$0xff] %v7046_v50  ;;  %v3222_v13 = vsel %vm3094_vm9, 0.0, %v7833_v58  ;;  %v2486_v15 = vadd.f32 %v4144_v44, %v1802_v46  ;;  %v2477_v30 = vpop.f32.mrb[101].mxu0  ;;  %v1840_v20 = vmul.f32 0.2, %v8090_v33  ;;  %vm7050_vm10 = vcmp.lt.f32.partialorder %v2968_v4, inf }
 0x694   :  { %v3349_v28 = vadd.f32 %v3348_v27, %v3222_v13  ;;  %v2478_v41 = vadd.f32 %v2477_v30, %v1800_v53  ;;  %v4145_v21 = vpop.f32.mrb[102].mxu0  ;;  %2838 = vst [vmem:[#allocation15 + $0x350] sm:$0xff] %v7046_v50  ;;  %v3223_v48 = vsel %vm3095_vm8, 0.0, %v7833_v58  ;;  %v8093_v46 = vld [vmem:[#allocation161_spill] sm:$0xff]  ;;  %v3224_v53 = vsel %vm7050_vm10, 0.0, %v7833_v58  ;;  %v8094_v27 = vld [vmem:[#allocation48_spill] sm:$0xff] }
 0x695   :  { %2798 = vst [vmem:[#allocation15 + $0x210] sm:$0xff] %v2486_v15  ;;  %v2489_v40 = vadd.f32 %v4145_v21, %v1803_v31  ;;  %v2480_v3 = vpop.f32.mrb[103].mxu0  ;;  %v7057_v47 = vadd.f32 %v6823_v6, %v1840_v20  ;;  %v1843_v44 = vmul.f32 0.2, %v8093_v46  ;;  %v2971_v4 = vand.u32 2147483647, %v2486_v15 }
 0x696   :  { %v3350_v8 = vadd.f32 %v3349_v28, %v3223_v48  ;;  %2796 = vst [vmem:[#allocation15 + $0x200] sm:$0xff] %v2478_v41  ;;  %v2969_v10 = vand.u32 2147483647, %v2478_v41  ;;  %v2481_v33 = vadd.f32 %v2480_v3, %v1801_v54  ;;  %v1806_v13 = vmul.f32 0.2, %v8094_v27  ;;  %v8095_v30 = vld [vmem:[#allocation46_spill] sm:$0xff] }
 0x697   :  { %2799 = vst [vmem:[#allocation15 + $0x218] sm:$0xff] %v2489_v40  ;;  %v1804_v31 = vmul.f32 0.2, %v8095_v30  ;;  %2836 = vst [vmem:[#allocation15 + $0x340] sm:$0xff] %v7057_v47  ;;  %v2972_v20 = vand.u32 2147483647, %v2489_v40  ;;  %v7069_v21 = vadd.f32 %v6832_v37, %v1843_v44 }
 0x698   :  { %v3351_v6 = vadd.f32 %v3350_v8, %v3224_v53  ;;  %vm3097_vm6 = vcmp.lt.f32.partialorder %v2969_v10, inf  ;;  %2797 = vst [vmem:[#allocation15 + $0x208] sm:$0xff] %v2481_v33  ;;  %v2970_v28 = vand.u32 2147483647, %v2481_v33  ;;  %v8096_v41 = vld [vmem:[#allocation49_spill] sm:$0xff]  ;;  %vm3099_vm11 = vcmp.lt.f32.partialorder %v2971_v4, inf }
 0x699   :  { %v3225_v15 = vsel %vm3097_vm6, 0.0, %v7833_v58  ;;  %v1807_v54 = vmul.f32 0.2, %v8096_v41  ;;  %8097 = vst [vmem:[#allocation91_spill] sm:$0xff] %v7069_v21  ;;  %v8098_v3 = vld [vmem:[#allocation47_spill] sm:$0xff]  ;;  %2839 = vst [vmem:[#allocation15 + $0x358] sm:$0xff] %v7069_v21 }
 0x69a   :  { %v3352_v7 = vadd.f32 %v3351_v6, %v3225_v15  ;;  %vm3098_vm12 = vcmp.lt.f32.partialorder %v2970_v28, inf  ;;  %v4148_v48 = vpop.f32.mrb[104].mxu0  ;;  %v1805_v46 = vmul.f32 0.2, %v8098_v3  ;;  %v8099_v40 = vld [vmem:[#allocation159_spill] sm:$0xff]  ;;  %vm7075_vm13 = vcmp.lt.f32.partialorder %v2972_v20, inf }
 0x69b   :  { %v3226_v27 = vsel %vm3098_vm12, 0.0, %v7833_v58  ;;  %v2502_v8 = vadd.f32 %v4148_v48, %v1806_v13  ;;  %v2493_v10 = vpop.f32.mrb[105].mxu0  ;;  %v1841_v33 = vmul.f32 0.2, %v8099_v40  ;;  %v8102_v30 = vld [vmem:[#allocation162_spill] sm:$0xff]  ;;  %v3227_v28 = vsel %vm3099_vm11, 0.0, %v7833_v58 }
 0x69c   :  { %v3353_v37 = vadd.f32 %v3352_v7, %v3226_v27  ;;  %v2494_v44 = vadd.f32 %v2493_v10, %v1804_v31  ;;  %v4149_v4 = vpop.f32.mrb[106].mxu0  ;;  %v1846_v6 = vmul.f32 0.2, %v8102_v30  ;;  %v4400_v13 = vld [vmem:[#allocation15 + $0x240] sm:$0xff]  ;;  %v3228_v31 = vsel %vm7075_vm13, 0.0, %v7833_v58  ;;  %v8103_v7 = vld [vmem:[#allocation97_spill] sm:$0xff] }
 0x69d   :  { %2802 = vst [vmem:[#allocation15 + $0x230] sm:$0xff] %v2502_v8  ;;  %v2505_v15 = vadd.f32 %v4149_v4, %v1807_v54  ;;  %v2496_v41 = vpop.f32.mrb[107].mxu0  ;;  %v2977_v48 = vand.u32 2147483647, %v4400_v13  ;;  %v7082_v3 = vadd.f32 %v6834_v59, %v1841_v33  ;;  %v2975_v20 = vand.u32 2147483647, %v2502_v8 }
 0x69e   :  { %v3354_v40 = vadd.f32 %v3353_v37, %v3227_v28  ;;  %2800 = vst [vmem:[#allocation15 + $0x220] sm:$0xff] %v2494_v44  ;;  %v2973_v21 = vand.u32 2147483647, %v2494_v44  ;;  %v2497_v50 = vadd.f32 %v2496_v41, %v1805_v46  ;;  %v7089_v54 = vadd.f32 %v6860_v38, %v1846_v6  ;;  %v4401_v46 = vld [vmem:[#allocation15 + $0x250] sm:$0xff]  ;;  %v4402_v44 = vld [vmem:[#allocation15 + $0x258] sm:$0xff]  ;;  %v4405_v53 = vld [vmem:[#allocation15 + $0x268] sm:$0xff] }
 0x69f   :  { %2803 = vst [vmem:[#allocation15 + $0x238] sm:$0xff] %v2505_v15  ;;  %2837 = vst [vmem:[#allocation15 + $0x348] sm:$0xff] %v7082_v3  ;;  %v1844_v27 = vmul.f32 0.2, %v8103_v7  ;;  %v2976_v10 = vand.u32 2147483647, %v2505_v15 }
 0x6a0   :  { %vm3101_vm14 = vcmp.lt.f32.partialorder %v2973_v21, inf  ;;  %v3355_v59 = vadd.f32 %v3354_v40, %v3228_v31  ;;  %2801 = vst [vmem:[#allocation15 + $0x228] sm:$0xff] %v2497_v50  ;;  %v2974_v8 = vand.u32 2147483647, %v2497_v50  ;;  %v2979_v37 = vand.u32 2147483647, %v4401_v46 }
 0x6a1   :  { %v3229_v33 = vsel %vm3101_vm14, 0.0, %v7833_v58  ;;  %vm7093_vm15 = vcmp.lt.f32.partialorder %v2977_v48, inf  ;;  %v2980_v4 = vand.u32 2147483647, %v4402_v44  ;;  %2842 = vst [vmem:[#allocation15 + $0x370] sm:$0xff] %v7089_v54  ;;  %vm3103_vm0 = vcmp.lt.f32.partialorder %v2975_v20, inf }
 0x6a2   :  { %v3356_v38 = vadd.f32 %v3355_v59, %v3229_v33  ;;  %vm3102_vm1 = vcmp.lt.f32.partialorder %v2974_v8, inf  ;;  %v4403_v21 = vld [vmem:[#allocation15 + $0x248] sm:$0xff]  ;;  %v4404_v50 = vld [vmem:[#allocation15 + $0x260] sm:$0xff]  ;;  %v7100_v15 = vadd.f32 %v6869_v19, %v1844_v27  ;;  %vm3104_vm2 = vcmp.lt.f32.partialorder %v2976_v10, inf  ;;  %v8107_v40 = vld [vmem:[#allocation98_spill] sm:$0xff] }
 0x6a3   :  { %v2978_v30 = vand.u32 2147483647, %v4403_v21  ;;  %v3230_v6 = vsel %vm3102_vm1, 0.0, %v7833_v58  ;;  %v2981_v28 = vand.u32 2147483647, %v4404_v50  ;;  %v8106_v41 = vld [vmem:[#allocation163_spill] sm:$0xff] }
 0x6a4   :  { %v1847_v13 = vmul.f32 0.2, %v8106_v41  ;;  %v3357_v48 = vadd.f32 %v3356_v38, %v3230_v6  ;;  %v1845_v31 = vmul.f32 0.2, %v8107_v40  ;;  %v8108_v7 = vld [vmem:[#allocation79_spill] sm:$0xff]  ;;  %v3231_v20 = vsel %vm3103_vm0, 0.0, %v7833_v58 }
 0x6a5   :  { %v1850_v46 = vmul.f32 0.2, %v8108_v7  ;;  %2840 = vst [vmem:[#allocation15 + $0x360] sm:$0xff] %v7100_v15  ;;  %v8109_v8 = vld [vmem:[#allocation78_spill] sm:$0xff]  ;;  %v8110_v44 = vld [vmem:[#allocation81_spill] sm:$0xff]  ;;  %v3232_v50 = vsel %vm3104_vm2, 0.0, %v7833_v58 }
 0x6a6   :  { %v7108_v59 = vadd.f32 %v6871_v18, %v1847_v13  ;;  %v1848_v33 = vmul.f32 0.2, %v8109_v8  ;;  %v1851_v19 = vmul.f32 0.2, %v8110_v44  ;;  %v3358_v27 = vadd.f32 %v3357_v48, %v3231_v20  ;;  %v8111_v38 = vld [vmem:[#allocation37_spill] sm:$0xff]  ;;  %v4407_v7 = vld [vmem:[#allocation15 + $0x278] sm:$0xff] }
 0x6a7   :  { %v7113_v21 = vadd.f32 %v6882_v11, %v1845_v31  ;;  %v7116_v10 = vadd.f32 %v6897_v26, %v1850_v46  ;;  %v1849_v6 = vmul.f32 0.2, %v8111_v38  ;;  %v3233_v18 = vsel %vm7093_vm15, 0.0, %v7833_v58  ;;  %v8113_v8 = vld [vmem:[#allocation82_spill] sm:$0xff]  ;;  %v8114_v44 = vld [vmem:[#allocation87_spill] sm:$0xff] }
 0x6a8   :  { %2843 = vst [vmem:[#allocation15 + $0x378] sm:$0xff] %v7108_v59  ;;  %v7125_v41 = vadd.f32 %v6904_v42, %v1848_v33  ;;  %v7128_v13 = vadd.f32 %v6910_v12, %v1851_v19  ;;  %vm3107_vm3 = vcmp.lt.f32.partialorder %v2979_v37, inf  ;;  %v3359_v11 = vadd.f32 %v3358_v27, %v3232_v50 }
 0x6a9   :  { %vm3108_vm4 = vcmp.lt.f32.partialorder %v2980_v4, inf  ;;  %vm3106_vm5 = vcmp.lt.f32.partialorder %v2978_v30, inf  ;;  %2841 = vst [vmem:[#allocation15 + $0x368] sm:$0xff] %v7113_v21  ;;  %2846 = vst [vmem:[#allocation15 + $0x390] sm:$0xff] %v7116_v10  ;;  %vm3109_vm7 = vcmp.lt.f32.partialorder %v2981_v28, inf  ;;  %v7135_v26 = vadd.f32 %v6915_v1, %v1849_v6  ;;  %v4406_v28 = vld [vmem:[#allocation15 + $0x270] sm:$0xff] }
 0x6aa   :  { %2844 = vst [vmem:[#allocation15 + $0x380] sm:$0xff] %v7125_v41  ;;  %2847 = vst [vmem:[#allocation15 + $0x398] sm:$0xff] %v7128_v13  ;;  %v3360_v42 = vadd.f32 %v3359_v11, %v3233_v18  ;;  %v2982_v12 = vand.u32 2147483647, %v4405_v53  ;;  %v3235_v37 = vsel %vm3107_vm3, 0.0, %v7833_v58  ;;  %v3236_v4 = vsel %vm3108_vm4, 0.0, %v7833_v58 }
 0x6ab   :  { %v3234_v30 = vsel %vm3106_vm5, 0.0, %v7833_v58  ;;  %2845 = vst [vmem:[#allocation15 + $0x388] sm:$0xff] %v7135_v26  ;;  %v2983_v40 = vand.u32 2147483647, %v4406_v28  ;;  %v3237_v31 = vsel %vm3109_vm7, 0.0, %v7833_v58  ;;  %v8112_v1 = vld [vmem:[#allocation85_spill] sm:$0xff] }
 0x6ac   :  { %v3361_v48 = vadd.f32 %v3360_v42, %v3234_v30  ;;  %v2984_v46 = vand.u32 2147483647, %v4407_v7  ;;  %v1854_v20 = vmul.f32 0.2, %v8112_v1  ;;  %v1852_v33 = vmul.f32 0.2, %v8113_v8 }
 0x6ad   :  { %v1855_v19 = vmul.f32 0.2, %v8114_v44  ;;  %vm7145_vm8 = vcmp.lt.f32.partialorder %v2982_v12, inf  ;;  %v8117_v6 = vld [vmem:[#allocation84_spill] sm:$0xff]  ;;  %v8118_v18 = vld [vmem:[#allocation93_spill] sm:$0xff]  ;;  %vm3111_vm9 = vcmp.lt.f32.partialorder %v2983_v40, inf }
 0x6ae   :  { %v3362_v27 = vadd.f32 %v3361_v48, %v3235_v37  ;;  %v1853_v50 = vmul.f32 0.2, %v8117_v6  ;;  %v1858_v11 = vmul.f32 0.2, %v8118_v18  ;;  %v4408_v42 = vld [vmem:[#allocation15 + $0x280] sm:$0xff]  ;;  %v7152_v30 = vadd.f32 %v6935_v43, %v1854_v20  ;;  %v4410_v44 = vld [vmem:[#allocation15 + $0x290] sm:$0xff] }
 0x6af   :  { %v2985_v53 = vand.u32 2147483647, %v4408_v42  ;;  %v7155_v28 = vadd.f32 %v6942_v57, %v1852_v33  ;;  %v7158_v7 = vadd.f32 %v6951_v39, %v1855_v19  ;;  %v8119_v1 = vld [vmem:[#allocation88_spill] sm:$0xff]  ;;  %vm3112_vm10 = vcmp.lt.f32.partialorder %v2984_v46, inf }
 0x6b0   :  { %v3363_v37 = vadd.f32 %v3362_v27, %v3236_v4  ;;  %v7161_v12 = vadd.f32 %v6953_v14, %v1853_v50  ;;  %v7164_v48 = vadd.f32 %v6979_v5, %v1858_v11  ;;  %v1856_v8 = vmul.f32 0.2, %v8119_v1  ;;  %2850 = vst [vmem:[#allocation15 + $0x3b0] sm:$0xff] %v7152_v30  ;;  %v4409_v14 = vld [vmem:[#allocation15 + $0x288] sm:$0xff]  ;;  %v8120_v4 = vld [vmem:[#allocation94_spill] sm:$0xff]  ;;  %v8122_v11 = vld [vmem:[#allocation99_spill] sm:$0xff] }
 0x6b1   :  { %2848 = vst [vmem:[#allocation15 + $0x3a0] sm:$0xff] %v7155_v28  ;;  %2851 = vst [vmem:[#allocation15 + $0x3b8] sm:$0xff] %v7158_v7  ;;  %v3238_v39 = vsel %vm7145_vm8, 0.0, %v7833_v58  ;;  %v2986_v5 = vand.u32 2147483647, %v4409_v14  ;;  %vm3113_vm6 = vcmp.lt.f32.partialorder %v2985_v53, inf }
 0x6b2   :  { %v3364_v43 = vadd.f32 %v3363_v37, %v3237_v31  ;;  %2849 = vst [vmem:[#allocation15 + $0x3a8] sm:$0xff] %v7161_v12  ;;  %2854 = vst [vmem:[#allocation15 + $0x3d0] sm:$0xff] %v7164_v48  ;;  %v7173_v57 = vadd.f32 %v6988_v52, %v1856_v8  ;;  %v1859_v20 = vmul.f32 0.2, %v8120_v4  ;;  %v3239_v40 = vsel %vm3111_vm9, 0.0, %v7833_v58  ;;  %v8121_v27 = vld [vmem:[#allocation90_spill] sm:$0xff] }
 0x6b3   :  { %v3240_v52 = vsel %vm3112_vm10, 0.0, %v7833_v58  ;;  %v2987_v19 = vand.u32 2147483647, %v4410_v44  ;;  %v1857_v38 = vmul.f32 0.2, %v8121_v27  ;;  %v3241_v6 = vsel %vm3113_vm6, 0.0, %v7833_v58 }
 0x6b4   :  { %v3365_v33 = vadd.f32 %v3364_v43, %v3238_v39  ;;  %2852 = vst [vmem:[#allocation15 + $0x3c0] sm:$0xff] %v7173_v57  ;;  %v7182_v31 = vadd.f32 %v6990_v45, %v1859_v20  ;;  %v4411_v50 = vld [vmem:[#allocation15 + $0x298] sm:$0xff]  ;;  %vm3114_vm11 = vcmp.lt.f32.partialorder %v2986_v5, inf  ;;  %v1862_v42 = vmul.f32 0.2, %v8122_v11  ;;  %v8124_v39 = vld [vmem:[#allocation100_spill] sm:$0xff] }
 0x6b5   :  { %v2988_v18 = vand.u32 2147483647, %v4411_v50  ;;  %v2989_v45 = vand.u32 2147483647, %v6733_v34  ;;  %v7191_v37 = vadd.f32 %v7001_v56, %v1857_v38  ;;  %v8123_v1 = vld [vmem:[#allocation95_spill] sm:$0xff]  ;;  %v8125_v4 = vld [vmem:[#allocation96_spill] sm:$0xff] }
 0x6b6   :  { %v3366_v46 = vadd.f32 %v3365_v33, %v3239_v40  ;;  %2855 = vst [vmem:[#allocation15 + $0x3d8] sm:$0xff] %v7182_v31  ;;  %v1860_v8 = vmul.f32 0.2, %v8123_v1  ;;  %v7195_v43 = vadd.f32 %v7016_v22, %v1862_v42  ;;  %v1863_v14 = vmul.f32 0.2, %v8124_v39  ;;  %v4412_v44 = vld [vmem:[#allocation15 + $0x2b0] sm:$0xff] }
 0x6b7   :  { %v1861_v20 = vmul.f32 0.2, %v8125_v4  ;;  %vm3115_vm12 = vcmp.lt.f32.partialorder %v2987_v19, inf  ;;  %2853 = vst [vmem:[#allocation15 + $0x3c8] sm:$0xff] %v7191_v37  ;;  %v3242_v34 = vsel %vm3114_vm11, 0.0, %v7833_v58  ;;  %vm3116_vm13 = vcmp.lt.f32.partialorder %v2988_v18, inf }
 0x6b8   :  { %v3367_v53 = vadd.f32 %v3366_v46, %v3240_v52  ;;  %v7201_v33 = vadd.f32 %v7023_v25, %v1860_v8  ;;  %2858 = vst [vmem:[#allocation15 + $0x3f0] sm:$0xff] %v7195_v43  ;;  %v7206_v56 = vadd.f32 %v7029_v0, %v1863_v14  ;;  %vm3117_vm14 = vcmp.lt.f32.partialorder %v2989_v45, inf }
 0x6b9   :  { %v7209_v22 = vadd.f32 %v7034_v49, %v1861_v20  ;;  %v2990_v52 = vand.u32 2147483647, %v6755_v60  ;;  %v3243_v25 = vsel %vm3115_vm12, 0.0, %v7833_v58  ;;  %v2991_v0 = vand.u32 2147483647, %v4412_v44 }
 0x6ba   :  { %v3368_v5 = vadd.f32 %v3367_v53, %v3241_v6  ;;  %2856 = vst [vmem:[#allocation15 + $0x3e0] sm:$0xff] %v7201_v33  ;;  %2859 = vst [vmem:[#allocation15 + $0x3f8] sm:$0xff] %v7206_v56  ;;  %v3244_v19 = vsel %vm3116_vm13, 0.0, %v7833_v58  ;;  %v3245_v49 = vsel %vm3117_vm14, 0.0, %v7833_v58  ;;  %v2992_v38 = vand.u32 2147483647, %v6750_v36 }
 0x6bb   :  { %2857 = vst [vmem:[#allocation15 + $0x3e8] sm:$0xff] %v7209_v22  ;;  %vm3118_vm15 = vcmp.lt.f32.partialorder %v2990_v52, inf  ;;  %v2993_v60 = vand.u32 2147483647, %v6799_v24  ;;  %vm3119_vm0 = vcmp.lt.f32.partialorder %v2991_v0, inf }
 0x6bc   :  { %v3369_v40 = vadd.f32 %v3368_v5, %v3242_v34  ;;  %v3246_v50 = vsel %vm3118_vm15, 0.0, %v7833_v58  ;;  %vm3120_vm1 = vcmp.lt.f32.partialorder %v2992_v38, inf  ;;  %v2994_v11 = vand.u32 2147483647, %v6829_v51 }
 0x6bd   :  { %vm3121_vm2 = vcmp.lt.f32.partialorder %v2993_v60, inf  ;;  %v3247_v42 = vsel %vm3119_vm0, 0.0, %v7833_v58  ;;  %v2995_v45 = vand.u32 2147483647, %v6775_v62  ;;  %v3248_v1 = vsel %vm3120_vm1, 0.0, %v7833_v58 }
 0x6be   :  { %v3370_v46 = vadd.f32 %v3369_v40, %v3243_v25  ;;  %v3249_v36 = vsel %vm3121_vm2, 0.0, %v7833_v58  ;;  %v2996_v24 = vand.u32 2147483647, %v6812_v55  ;;  %vm3122_vm3 = vcmp.lt.f32.partialorder %v2994_v11, inf }
 0x6bf   :  { %v2997_v39 = vand.u32 2147483647, %v6867_v29  ;;  %vm3123_vm4 = vcmp.lt.f32.partialorder %v2995_v45, inf  ;;  %v3250_v4 = vsel %vm3122_vm3, 0.0, %v7833_v58  ;;  %v2998_v20 = vand.u32 2147483647, %v6895_v9 }
 0x6c0   :  { %v3371_v27 = vadd.f32 %v3370_v46, %v3244_v19  ;;  %vm3124_vm5 = vcmp.lt.f32.partialorder %v2996_v24, inf  ;;  %v3251_v62 = vsel %vm3123_vm4, 0.0, %v7833_v58  ;;  %v2999_v34 = vand.u32 2147483647, %v6845_v32 }
 0x6c1   :  { %vm3125_vm7 = vcmp.lt.f32.partialorder %v2997_v39, inf  ;;  %v3252_v40 = vsel %vm3124_vm5, 0.0, %v7833_v58  ;;  %v3000_v29 = vand.u32 2147483647, %v6879_v35  ;;  %vm3126_vm8 = vcmp.lt.f32.partialorder %v2998_v20, inf  ;;  %v8128_v20 = vld [vmem:[#allocation36_spill] sm:$0xff] }
 0x6c2   :  { %v3372_v6 = vadd.f32 %v3371_v27, %v3245_v49  ;;  %v3253_v55 = vsel %vm3125_vm7, 0.0, %v7833_v58  ;;  %v3001_v25 = vand.u32 2147483647, %v6931_v17  ;;  %vm3127_vm9 = vcmp.lt.f32.partialorder %v2999_v34, inf }
 0x6c3   :  { %v3254_v44 = vsel %vm3126_vm8, 0.0, %v7833_v58  ;;  %vm3128_vm10 = vcmp.lt.f32.partialorder %v3000_v29, inf  ;;  %v3002_v0 = vand.u32 2147483647, %v6964_v16  ;;  %v3255_v32 = vsel %vm3127_vm9, 0.0, %v7833_v58 }
 0x6c4   :  { %v3373_v18 = vadd.f32 %v3372_v6, %v3246_v50  ;;  %vm3129_vm6 = vcmp.lt.f32.partialorder %v3001_v25, inf  ;;  %v3003_v49 = vand.u32 2147483647, %v6913_v2  ;;  %v3256_v27 = vsel %vm3128_vm10, 0.0, %v7833_v58 }
 0x6c5   :  { %v3257_v35 = vsel %vm3129_vm6, 0.0, %v7833_v58  ;;  %v3004_v17 = vand.u32 2147483647, %v6948_v61  ;;  %vm3130_vm11 = vcmp.lt.f32.partialorder %v3002_v0, inf  ;;  %v3005_v60 = vand.u32 2147483647, %v6998_v63 }
 0x6c6   :  { %v3374_v53 = vadd.f32 %v3373_v18, %v3247_v42  ;;  %vm3131_vm12 = vcmp.lt.f32.partialorder %v3003_v49, inf  ;;  %v3258_v50 = vsel %vm3130_vm11, 0.0, %v7833_v58  ;;  %v3006_v18 = vand.u32 2147483647, %v7032_v23  ;;  %v8126_v42 = vld [vmem:[#allocation35_spill] sm:$0xff]  ;;  %v8127_v63 = vld [vmem:[#allocation182_spill] sm:$0xff] }
 0x6c7   :  { %vm3132_vm13 = vcmp.lt.f32.partialorder %v3004_v17, inf  ;;  %vm3133_vm14 = vcmp.lt.f32.partialorder %v3005_v60, inf  ;;  %v3259_v2 = vsel %vm3131_vm12, 0.0, %v7833_v58  ;;  %v3015_v0 = vand.u32 2147483647, %v7089_v54 }
 0x6c8   :  { %v3375_v8 = vadd.f32 %v3374_v53, %v3248_v1  ;;  %v3007_v53 = vand.u32 2147483647, %v8126_v42  ;;  %v3260_v45 = vsel %vm3132_vm13, 0.0, %v7833_v58  ;;  %v3261_v61 = vsel %vm3133_vm14, 0.0, %v7833_v58 }
 0x6c9   :  { %vm3134_vm15 = vcmp.lt.f32.partialorder %v3006_v18, inf  ;;  %vm3143_vm9 = vcmp.lt.f32.partialorder %v3015_v0, inf  ;;  %v3018_v17 = vand.u32 2147483647, %v7135_v26  ;;  %v3021_v18 = vand.u32 2147483647, %v7155_v28 }
 0x6ca   :  { %v3376_v14 = vadd.f32 %v3375_v8, %v3249_v36  ;;  %v3008_v36 = vand.u32 2147483647, %v8127_v63  ;;  %v3009_v8 = vand.u32 2147483647, %v7057_v47  ;;  %vm3135_vm0 = vcmp.lt.f32.partialorder %v3007_v53, inf  ;;  %v8129_v47 = vld [vmem:[#allocation91_spill] sm:$0xff] }
 0x6cb   :  { %v3262_v39 = vsel %vm3134_vm15, 0.0, %v7833_v58  ;;  %v3271_v54 = vsel %vm3143_vm9, 0.0, %v7833_v58  ;;  %vm3146_vm11 = vcmp.lt.f32.partialorder %v3018_v17, inf  ;;  %vm3149_vm14 = vcmp.lt.f32.partialorder %v3021_v18, inf }
 0x6cc   :  { %v3377_v51 = vadd.f32 %v3376_v14, %v3250_v4  ;;  %vm3136_vm1 = vcmp.lt.f32.partialorder %v3008_v36, inf  ;;  %vm3137_vm2 = vcmp.lt.f32.partialorder %v3009_v8, inf  ;;  %v3010_v14 = vand.u32 2147483647, %v7082_v3 }
 0x6cd   :  { %v3263_v4 = vsel %vm3135_vm0, 0.0, %v7833_v58  ;;  %v3265_v34 = vsel %vm3137_vm2, 0.0, %v7833_v58  ;;  %v3022_v42 = vand.u32 2147483647, %v7161_v12  ;;  %v3024_v28 = vand.u32 2147483647, %v7158_v7 }
 0x6ce   :  { %v3378_v5 = vadd.f32 %v3377_v51, %v3251_v62  ;;  %v3011_v62 = vand.u32 2147483647, %v8128_v20  ;;  %vm3138_vm3 = vcmp.lt.f32.partialorder %v3010_v14, inf  ;;  %v3025_v63 = vand.u32 2147483647, %v7173_v57 }
 0x6cf   :  { %v3266_v25 = vsel %vm3138_vm3, 0.0, %v7833_v58  ;;  %vm3150_vm15 = vcmp.lt.f32.partialorder %v3022_v42, inf  ;;  %v3028_v57 = vand.u32 2147483647, %v7182_v31 }
 0x6d0   :  { %v3379_v52 = vadd.f32 %v3378_v5, %v3252_v40  ;;  %v3264_v5 = vsel %vm3136_vm1, 0.0, %v7833_v58  ;;  %vm3139_vm4 = vcmp.lt.f32.partialorder %v3011_v62, inf  ;;  %v3278_v8 = vsel %vm3150_vm15, 0.0, %v7833_v58 }
 0x6d1   :  { %vm3152_vm1 = vcmp.lt.f32.partialorder %v3024_v28, inf  ;;  %vm3153_vm2 = vcmp.lt.f32.partialorder %v3025_v63, inf }
 0x6d2   :  { %v3380_v46 = vadd.f32 %v3379_v52, %v3253_v55  ;;  %v3012_v55 = vand.u32 2147483647, %v8129_v47  ;;  %v3013_v52 = vand.u32 2147483647, %v7100_v15  ;;  %v3016_v15 = vand.u32 2147483647, %v7108_v59 }
 0x6d3   :  { %v3280_v14 = vsel %vm3152_vm1, 0.0, %v7833_v58  ;;  %v3281_v7 = vsel %vm3153_vm2, 0.0, %v7833_v58 }
 0x6d4   :  { %v3381_v9 = vadd.f32 %v3380_v46, %v3254_v44  ;;  %vm3140_vm5 = vcmp.lt.f32.partialorder %v3012_v55, inf  ;;  %vm3141_vm7 = vcmp.lt.f32.partialorder %v3013_v52, inf  ;;  %v3014_v46 = vand.u32 2147483647, %v7113_v21 }
 0x6d5   :  { %v3267_v44 = vsel %vm3139_vm4, 0.0, %v7833_v58  ;;  %vm3144_vm10 = vcmp.lt.f32.partialorder %v3016_v15, inf }
 0x6d6   :  { %v3382_v19 = vadd.f32 %v3381_v9, %v3255_v32  ;;  %v3268_v32 = vsel %vm3140_vm5, 0.0, %v7833_v58  ;;  %vm3142_vm8 = vcmp.lt.f32.partialorder %v3014_v46, inf  ;;  %vm3156_vm5 = vcmp.lt.f32.partialorder %v3028_v57, inf }
 0x6d7   :  { %v3284_v47 = vsel %vm3156_vm5, 0.0, %v7833_v58 }
 0x6d8   :  { %v3383_v38 = vadd.f32 %v3382_v19, %v3256_v27  ;;  %v3269_v19 = vsel %vm3141_vm7, 0.0, %v7833_v58  ;;  %v3017_v27 = vand.u32 2147483647, %v7125_v41  ;;  %v3020_v41 = vand.u32 2147483647, %v7128_v13 }
 0x6d9   :  { %v3277_v13 = vsel %vm3149_vm14, 0.0, %v7833_v58 }
 0x6da   :  { %v3384_v6 = vadd.f32 %v3383_v38, %v3257_v35  ;;  %v3270_v38 = vsel %vm3142_vm8, 0.0, %v7833_v58  ;;  %vm3145_vm6 = vcmp.lt.f32.partialorder %v3017_v27, inf  ;;  %vm3148_vm13 = vcmp.lt.f32.partialorder %v3020_v41, inf }
 0x6db   :  { %v3273_v59 = vsel %vm3145_vm6, 0.0, %v7833_v58 }
 0x6dc   :  { %v3385_v16 = vadd.f32 %v3384_v6, %v3258_v50  ;;  %v3019_v6 = vand.u32 2147483647, %v7116_v10  ;;  %v3272_v50 = vsel %vm3144_vm10, 0.0, %v7833_v58 }
 0x6de   :  { %v3386_v11 = vadd.f32 %v3385_v16, %v3259_v2  ;;  %vm3147_vm12 = vcmp.lt.f32.partialorder %v3019_v6, inf }
 0x6df   :  { %v3275_v10 = vsel %vm3147_vm12, 0.0, %v7833_v58 }
 0x6e0   :  { %v3387_v1 = vadd.f32 %v3386_v11, %v3260_v45  ;;  %v3274_v11 = vsel %vm3146_vm11, 0.0, %v7833_v58  ;;  %v3023_v45 = vand.u32 2147483647, %v7152_v30 }
 0x6e2   :  { %v3388_v24 = vadd.f32 %v3387_v1, %v3261_v61  ;;  %v3276_v61 = vsel %vm3148_vm13, 0.0, %v7833_v58  ;;  %vm3151_vm0 = vcmp.lt.f32.partialorder %v3023_v45, inf }
 0x6e3   :  { %v3279_v30 = vsel %vm3151_vm0, 0.0, %v7833_v58 }
 0x6e4   :  { %v3389_v23 = vadd.f32 %v3388_v24, %v3262_v39  ;;  %v3026_v24 = vand.u32 2147483647, %v7191_v37 }
 0x6e6   :  { %v3390_v51 = vadd.f32 %v3389_v23, %v3263_v4  ;;  %v3027_v23 = vand.u32 2147483647, %v7164_v48  ;;  %vm3154_vm3 = vcmp.lt.f32.partialorder %v3026_v24, inf }
 0x6e7   :  { %v3282_v62 = vsel %vm3154_vm3, 0.0, %v7833_v58 }
 0x6e8   :  { %v3391_v40 = vadd.f32 %v3390_v51, %v3264_v5  ;;  %v3029_v51 = vand.u32 2147483647, %v7201_v33  ;;  %vm3155_vm4 = vcmp.lt.f32.partialorder %v3027_v23, inf  ;;  %v3030_v5 = vand.u32 2147483647, %v7209_v22 }
 0x6e9   :  { %v3283_v48 = vsel %vm3155_vm4, 0.0, %v7833_v58  ;;  %v3032_v33 = vand.u32 2147483647, %v7206_v56 }
 0x6ea   :  { %v3392_v29 = vadd.f32 %v3391_v40, %v3265_v34  ;;  %vm3157_vm7 = vcmp.lt.f32.partialorder %v3029_v51, inf  ;;  %v3031_v40 = vand.u32 2147483647, %v7195_v43  ;;  %vm3158_vm8 = vcmp.lt.f32.partialorder %v3030_v5, inf }
 0x6eb   :  { %v3285_v31 = vsel %vm3157_vm7, 0.0, %v7833_v58  ;;  %vm3160_vm10 = vcmp.lt.f32.partialorder %v3032_v33, inf }
 0x6ec   :  { %v3393_v3 = vadd.f32 %v3392_v29, %v3266_v25  ;;  %vm3159_vm9 = vcmp.lt.f32.partialorder %v3031_v40, inf  ;;  %v3286_v29 = vsel %vm3158_vm8, 0.0, %v7833_v58  ;;  %v3288_v46 = vsel %vm3160_vm10, 0.0, %v7833_v58 }
 0x6ed   :  { %v3287_v22 = vsel %vm3159_vm9, 0.0, %v7833_v58 }
 0x6ee   :  { %v3394_v9 = vadd.f32 %v3393_v3, %v3267_v44  ;;  %v8130_v44 = vld [vmem:[#allocation181_spill] sm:$0xff] }
 0x6f0   :  { %v3395_v49 = vadd.f32 %v3394_v9, %v3268_v32 }
 0x6f2   :  { %v3396_v35 = vadd.f32 %v3395_v49, %v3269_v19 }
 0x6f4   :  { %v3397_v21 = vadd.f32 %v3396_v35, %v3270_v38 }
 0x6f6   :  { %v3398_v60 = vadd.f32 %v3397_v21, %v3271_v54 }
 0x6f8   :  { %v3399_v16 = vadd.f32 %v3398_v60, %v3272_v50 }
 0x6fa   :  { %v3400_v2 = vadd.f32 %v3399_v16, %v3273_v59 }
 0x6fc   :  { %v3401_v26 = vadd.f32 %v3400_v2, %v3274_v11 }
 0x6fe   :  { %v3402_v53 = vadd.f32 %v3401_v26, %v3275_v10 }
 0x700   :  { %v3403_v1 = vadd.f32 %v3402_v53, %v3276_v61 }
 0x702   :  { %v3404_v36 = vadd.f32 %v3403_v1, %v3277_v13 }
 0x704   :  { %v3405_v12 = vadd.f32 %v3404_v36, %v3278_v8 }
 0x706   :  { %v3406_v39 = vadd.f32 %v3405_v12, %v3279_v30 }
 0x708   :  { %v3407_v4 = vadd.f32 %v3406_v39, %v3280_v14 }
 0x70a   :  { %v3408_v20 = vadd.f32 %v3407_v4, %v3281_v7 }
 0x70c   :  { %v3409_v37 = vadd.f32 %v3408_v20, %v3282_v62 }
 0x70e   :  { %v3410_v34 = vadd.f32 %v3409_v37, %v3283_v48 }
 0x710   :  { %v3411_v55 = vadd.f32 %v3410_v34, %v3284_v47 }
 0x712   :  { %v3412_v52 = vadd.f32 %v3411_v55, %v3285_v31 }
 0x714   :  { %v3413_v25 = vadd.f32 %v3412_v52, %v3286_v29 }
 0x716   :  { %v3414_v3 = vadd.f32 %v3413_v25, %v3287_v22 }
 0x718   :  { %v3415_v43 = vadd.f32 %v3414_v3, %v3288_v46 }
 0x71a   :  { %3416 = vadd.xlane.f32.xlu1 %v3415_v43 }
 0x71e   :  { %3504 = vadd.xlane.f32.xlu1 %v8130_v44 }
 0x71f   :  { %4534 = shalt.err (!%p4531_p2)
}
 0x720   :  { %s4535_s17 = scalar_lea.hbm %s7415_s10, 128 }
 0x721   :  { %p4536_p3 = scmp.ne.s32.totalorder %s7415_s10, %s4535_s17  ;;  %p4539_p4 = scmp.lt.u32.totalorder %s4535_s17, %s7415_s10 }
 0x723   :  { %p4541_p5 = pnand %p4539_p4, %p4536_p3 }
 0x725   :  { %4544 = shalt.err (!%p4541_p5)
}
 0x726   :  { %3562 = dma.vmem_to_hbm [thread:$0]  %s3560_s16, 128, %s7415_s10, [#allocation13]  }
 0x727   :  { %s4545_s25 = scalar_lea.vmem %s7303_s3, 16384  ;;  %p4550_p7 = scmp.lt.s32.totalorder %s7303_s3, %s7303_s3 }
 0x728   :  { %p4546_p6 = scmp.ne.s32.totalorder %s7303_s3, %s4545_s25  ;;  %p4551_p8 = scmp.lt.s32.totalorder %s4545_s25, %s4545_s25 }
 0x72a   :  { %p4552_p9 = por %p4551_p8, %p4550_p7 }
 0x72c   :  { %p4553_p10 = pnand %p4552_p9, %p4546_p6 }
 0x72e   :  { %4556 = shalt.err (!%p4553_p10)
}
 0x72f   :  { %s4557_s4 = scalar_lea.hbm %s7417_s12, 16384 }
 0x730   :  { %p4558_p11 = scmp.ne.s32.totalorder %s7417_s12, %s4557_s4  ;;  %p4561_p12 = scmp.lt.u32.totalorder %s4557_s4, %s7417_s12 }
 0x732   :  { %p4563_p13 = pnand %p4561_p12, %p4558_p11 }
 0x734   :  { %4566 = shalt.err (!%p4563_p13)
}
 0x735   :  { %3584 = dma.vmem_to_hbm [thread:$0]  %s7303_s3, 16384, %s7417_s12, [#allocation16], %s4692_s28, %s4692_s28, %s4693_s29  }
 0x736   :  { %s4703_s11 = smov [#allocation18]   ;;  %s4704_s7 = smov [#allocation11]  }
 0x737   :  { %s3600_s27 = sshll.u32 %s4703_s11, 4  ;;  %s3549_s19 = sshll.u32 %s4704_s7, 4  ;;  %s3601_s27 = int_to_ptr.vmem [resolvable:$true] %s3600_s27  ;;  %s3550_s19 = int_to_ptr.vmem [resolvable:$true] %s3549_s19 }
 0x738   :  { %s4567_s17 = scalar_lea.vmem %s3601_s27, 2048  ;;  %p4572_p1 = scmp.lt.s32.totalorder %s3601_s27, %s3601_s27 }
 0x739   :  { %p4568_p0 = scmp.ne.s32.totalorder %s3601_s27, %s4567_s17  ;;  %p4573_p2 = scmp.lt.s32.totalorder %s4567_s17, %s4567_s17 }
 0x73b   :  { %p4574_p3 = por %p4573_p2, %p4572_p1 }
 0x73d   :  { %p4575_p4 = pnand %p4574_p3, %p4568_p0 }
 0x73f   :  { %4578 = shalt.err (!%p4575_p4)
}
 0x740   :  { %s4579_s23 = scalar_lea.hbm %s7419_s14, 2048 }
 0x741   :  { %p4580_p5 = scmp.ne.s32.totalorder %s7419_s14, %s4579_s23  ;;  %p4583_p6 = scmp.lt.u32.totalorder %s4579_s23, %s7419_s14 }
 0x743   :  { %p4585_p7 = pnand %p4583_p6, %p4580_p5 }
 0x745   :  { %4588 = shalt.err (!%p4585_p7)
}
 0x746   :  { %3606 = dma.vmem_to_hbm [thread:$0]  %s3601_s27, 2048, %s7419_s14, [#allocation19], %s4692_s28, %s4692_s28, %s4693_s29  }
 0x747   :  { %s4589_s5 = scalar_lea.vmem %s3550_s19, 128  ;;  %p4594_p9 = scmp.lt.s32.totalorder %s3550_s19, %s3550_s19 }
 0x748   :  { %p4590_p8 = scmp.ne.s32.totalorder %s3550_s19, %s4589_s5  ;;  %p4595_p10 = scmp.lt.s32.totalorder %s4589_s5, %s4589_s5 }
 0x74a   :  { %p4596_p11 = por %p4595_p10, %p4594_p9 }
 0x74c   :  { %p4597_p12 = pnand %p4596_p11, %p4590_p8 }
 0x74e   :  { %4600 = shalt.err (!%p4597_p12)
}
 0x74f   :  { %s4601_s8 = scalar_lea.hbm %s7414_s9, 128 }
 0x750   :  { %p4602_p13 = scmp.ne.s32.totalorder %s7414_s9, %s4601_s8  ;;  %p4605_p0 = scmp.lt.u32.totalorder %s4601_s8, %s7414_s9 }
 0x752   :  { %p4607_p1 = pnand %p4605_p0, %p4602_p13 }
 0x754   :  { %4610 = shalt.err (!%p4607_p1)
}
 0x755   :  { %3552 = dma.vmem_to_hbm [thread:$0]  %s3550_s19, 128, %s7414_s9, [#allocation4]  }
 0x756   :  { %s4705_s29 = smov [#allocation17]  }
 0x757   :  { %s3591_s16 = sshll.u32 %s4705_s29, 4  ;;  %s3592_s16 = int_to_ptr.vmem [resolvable:$true] %s3591_s16 }
 0x758   :  { %s4611_s11 = scalar_lea.vmem %s3592_s16, 16  ;;  %s4615_s27 = scalar_lea.vmem %s3592_s16, 32 }
 0x759   :  { %p4612_p2 = scmp.ne.s32.totalorder %s3592_s16, %s4611_s11  ;;  %p4616_p3 = scmp.lt.s32.totalorder %s3592_s16, %s3592_s16 }
 0x75a   :  { %p4617_p4 = scmp.lt.s32.totalorder %s4615_s27, %s4611_s11 }
 0x75c   :  { %p4618_p5 = por %p4617_p4, %p4616_p3 }
 0x75e   :  { %p4619_p6 = pnand %p4618_p5, %p4612_p2 }
 0x760   :  { %4622 = shalt.err (!%p4619_p6)
}
 0x761   :  { %s4623_s20 = scalar_lea.hbm %s7418_s13, 16 }
 0x762   :  { %p4624_p7 = scmp.ne.s32.totalorder %s7418_s13, %s4623_s20  ;;  %p4627_p8 = scmp.lt.u32.totalorder %s4623_s20, %s7418_s13 }
 0x764   :  { %p4629_p9 = pnand %p4627_p8, %p4624_p7 }
 0x766   :  { %4632 = shalt.err (!%p4629_p9)
}
 0x767   :  { %3594 = dma.vmem_to_hbm [thread:$0]  %s3592_s16, 16, %s7418_s13, [#allocation16]  }
 0x768   :  { %s4706_s12 = smov [#allocation20]  }
 0x769   :  { %s3613_s3 = sshll.u32 %s4706_s12, 4  ;;  %s3614_s3 = int_to_ptr.vmem [resolvable:$true] %s3613_s3 }
 0x76a   :  { %s4633_s24 = scalar_lea.vmem %s3614_s3, 16  ;;  %s4637_s25 = scalar_lea.vmem %s3614_s3, 32 }
 0x76b   :  { %p4634_p10 = scmp.ne.s32.totalorder %s3614_s3, %s4633_s24  ;;  %p4638_p11 = scmp.lt.s32.totalorder %s3614_s3, %s3614_s3 }
 0x76c   :  { %p4639_p12 = scmp.lt.s32.totalorder %s4637_s25, %s4633_s24 }
 0x76e   :  { %p4640_p13 = por %p4639_p12, %p4638_p11 }
 0x770   :  { %p4641_p0 = pnand %p4640_p13, %p4634_p10 }
 0x772   :  { %4644 = shalt.err (!%p4641_p0)
}
 0x773   :  { %s4645_s4 = scalar_lea.hbm %s7420_s15, 16 }
 0x774   :  { %p4646_p1 = scmp.ne.s32.totalorder %s7420_s15, %s4645_s4  ;;  %p4649_p2 = scmp.lt.u32.totalorder %s4645_s4, %s7420_s15 }
 0x776   :  { %p4651_p3 = pnand %p4649_p2, %p4646_p1 }
 0x778   :  { %4654 = shalt.err (!%p4651_p3)
}
 0x779   :  { %3616 = dma.vmem_to_hbm [thread:$0]  %s3614_s3, 16, %s7420_s15, [#allocation19]   ;;  %v3431_v58 = vpop.xlane.xlu0 %3430  ;;  %v8131_v36 = vlaneseq  ;;  %v8132_v34 = vstv %s6271_s6  ;;  %v8133_v47 = vstv %s6264_s2 }
 0x77a   :  { %v3432_v56 = vrot.slane %v3431_v58, 4  ;;  %s4216_s15 = spop %4215  ;;  %s4707_s22 = smov [#allocation14]  }
 0x77b   :  { %s4218_s14 = spop %4217  ;;  %v1436_v61 = vstv %s4216_s15  ;;  %v3531_v8 = vand.u32 127, %v8131_v36  ;;  %s3569_s23 = sshll.u32 %s4707_s22, 4  ;;  %s3570_s23 = int_to_ptr.vmem [resolvable:$true] %s3569_s23 }
 0x77c   :  { %v3433_v0 = vadd.f32 %v3432_v56, %v3431_v58  ;;  %s4220_s28 = spop %4219  ;;  %v1449_v13 = vstv %s4218_s14  ;;  %s4655_s9 = scalar_lea.vmem %s3570_s23, 16 }
 0x77d   :  { %v3520_v9 = vpop.xlane.xlu0 %3519  ;;  %s4222_s29 = spop %4221  ;;  %v1450_v28 = vadd.f32 %v1449_v13, %v1436_v61  ;;  %v1491_v12 = vstv %s4220_s28  ;;  %vm3536_vm6 = vcmp.eq.s32.totalorder %v3531_v8, 4  ;;  %vm3535_vm11 = vcmp.eq.s32.totalorder %v3531_v8, 3  ;;  %p4656_p4 = scmp.ne.s32.totalorder %s3570_s23, %s4655_s9 }
 0x77e   :  { %v3521_v32 = vrot.slane %v3520_v9, 4  ;;  %v3434_v19 = vrot.slane %v3433_v0, 2  ;;  %s4224_s16 = spop %4223  ;;  %v1504_v4 = vstv %s4222_s29  ;;  %vm3534_vm12 = vcmp.eq.s32.totalorder %v3531_v8, 2  ;;  %s4659_s19 = scalar_lea.vmem %s3570_s23, 32 }
 0x77f   :  { %s4226_s11 = spop %4225  ;;  %v1492_v39 = vadd.f32 %v1491_v12, %v1450_v28  ;;  %v2890_v23 = vstv %s4224_s16  ;;  %vm3533_vm13 = vcmp.eq.s32.totalorder %v3531_v8, 1  ;;  %vm3532_vm14 = vcmp.eq.s32.totalorder %v3531_v8, 0  ;;  %p4660_p5 = scmp.lt.s32.totalorder %s3570_s23, %s3570_s23 }
 0x780   :  { %v3522_v49 = vadd.f32 %v3521_v32, %v3520_v9  ;;  %v3435_v17 = vadd.f32 %v3434_v19, %v3433_v0  ;;  %v2903_v14 = vstv %s4226_s11  ;;  %p4661_p6 = scmp.lt.s32.totalorder %s4659_s19, %s4655_s9 }
 0x781   :  { %v2904_v20 = vadd.f32 %v2903_v14, %v2890_v23  ;;  %v1505_v62 = vadd.f32 %v1504_v4, %v1492_v39 }
 0x782   :  { %v3523_v38 = vrot.slane %v3522_v49, 2  ;;  %v3436_v16 = vrot.slane %v3435_v17, 1  ;;  %p4662_p7 = por %p4661_p6, %p4660_p5 }
 0x784   :  { %v3524_v59 = vadd.f32 %v3523_v38, %v3522_v49  ;;  %v3437_v26 = vadd.f32 %v3436_v16, %v3435_v17  ;;  %p4663_p8 = pnand %p4662_p7, %p4656_p4 }
 0x786   :  { %v3525_v42 = vrot.slane %v3524_v59, 1 }
 0x788   :  { %v3526_v45 = vadd.f32 %v3525_v42, %v3524_v59 }
 0x7a7   :  { %v3417_v15 = vpop.xlane.xlu1 %3416 }
 0x7a8   :  { %v3418_v27 = vrot.slane %v3417_v15, 4 }
 0x7aa   :  { %v3419_v35 = vadd.f32 %v3418_v27, %v3417_v15 }
 0x7ab   :  { %v3505_v21 = vpop.xlane.xlu1 %3504 }
 0x7ac   :  { %v3420_v54 = vrot.slane %v3419_v35, 2  ;;  %v3506_v60 = vrot.slane %v3505_v21, 4 }
 0x7ae   :  { %v3507_v6 = vadd.f32 %v3506_v60, %v3505_v21  ;;  %v3421_v50 = vadd.f32 %v3420_v54, %v3419_v35 }
 0x7b0   :  { %v3508_v41 = vrot.slane %v3507_v6, 2  ;;  %v3422_v18 = vrot.slane %v3421_v50, 1 }
 0x7b2   :  { %v3509_v2 = vadd.f32 %v3508_v41, %v3507_v6  ;;  %v3423_v11 = vadd.f32 %v3422_v18, %v3421_v50 }
 0x7b4   :  { %4227 = vpush %v3423_v11  ;;  %v3510_v10 = vrot.slane %v3509_v2, 1 }
 0x7b5   :  { %4229 = vpush %v3437_v26 }
 0x7b6   :  { %v3511_v53 = vadd.f32 %v3510_v10, %v3509_v2 }
 0x7b8   :  { %4231 = vpush %v3511_v53 }
 0x7b9   :  { %4233 = vpush %v3526_v45 }
 0x7e5   :  { %s4228_s27 = spop %4227 }
 0x7e6   :  { %v3425_v1 = vstv %s4228_s27  ;;  %s4230_s7 = spop %4229 }
 0x7e7   :  { %v3439_v63 = vstv %s4230_s7 }
 0x7e8   :  { %v3440_v24 = vadd.f32 %v3439_v63, %v3425_v1 }
 0x7e9   :  { %s4232_s17 = spop %4231 }
 0x7ea   :  { %v3513_v30 = vstv %s4232_s17  ;;  %s4234_s20 = spop %4233 }
 0x7eb   :  { %v3514_v7 = vadd.f32 %v3513_v30, %v3440_v24  ;;  %v3528_v57 = vstv %s4234_s20 }
 0x7ed   :  { %v3529_v51 = vadd.f32 %v3528_v57, %v3514_v7 }
 0x7ef   :  { %v3537_v37 = vsel %vm3536_vm6, %v3529_v51, 0.0 }
 0x7f0   :  { %v3538_v5 = vsel %vm3535_vm11, %v2904_v20, %v3537_v37 }
 0x7f1   :  { %v3539_v48 = vsel %vm3534_vm12, %v1505_v62, %v3538_v5 }
 0x7f2   :  { %v3540_v40 = vsel %vm3533_vm13, %v8132_v34, %v3539_v48 }
 0x7f3   :  { %v3541_v31 = vsel %vm3532_vm14, %v8133_v47, %v3540_v40 }
 0x7f4   :  { %3542 = vst [vmem:[#allocation14] sm:$0x1] %v3541_v31 }
 0x7f5   :  { %4666 = shalt.err (!%p4663_p8)
}
 0x7f6   :  { %s8134_s12 = sld [smem:[#allocation201_spill]] }
 0x7fc   :  { %s4667_s3 = scalar_lea.hbm %s8134_s12, 16 }
 0x7fd   :  { %p4668_p9 = scmp.ne.s32.totalorder %s8134_s12, %s4667_s3  ;;  %p4671_p10 = scmp.lt.u32.totalorder %s4667_s3, %s8134_s12 }
 0x7ff   :  { %p4673_p11 = pnand %p4671_p10, %p4668_p9 }
 0x801   :  { %4676 = shalt.err (!%p4673_p11)
}
 0x802   :  { %3572 = dma.vmem_to_hbm [thread:$0]  %s3570_s23, 16, %s8134_s12, [#allocation13]  }
 0x803   :  { %4683 = dma.done.wait [#allocation4], 128  }
 0x804   :  { %4684 = vsyncadd [#allocation4], 4294967168 }
 0x805   :  { %4685 = dma.done.wait [#allocation13], 144  }
 0x806   :  { %4686 = vsyncadd [#allocation13], 4294967152 }
 0x807   :  { %4687 = dma.done.wait [#allocation16], 16400  }
 0x808   :  { %4688 = vsyncadd [#allocation16], 4294950896 }
 0x809   :  { %4689 = dma.done.wait [#allocation19], 2064  }
 0x80a   :  { %4690 = vsyncadd [#allocation19], 4294965232 }
 0x80b   :  { %3638 = vsyncpa [#allocation3], 1 }
 0x80c   :  { %3639 = vsyncpa [#allocation6], 1 }
 0x80d   :  { %3640 = vsyncpa [#allocation9], 1 }
 0x80e   :  { %3641 = vsyncpa [#allocation4], 1 }
 0x80f   :  { %3642 = vsyncpa [#allocation13], 1 }
 0x810   :  { %3643 = vsyncpa [#allocation16], 1 }
 0x811   :  { %3644 = vsyncpa [#allocation19], 1 }

</bundles_post_ra>
